<compile_context>
chip_gen: v5e
topology: v5e:2x2
jax: 0.10.0
libtpu: 0.0.40
codegen_flags: <defaults>
</compile_context>

<pallas_src>
import functools

import jax
import jax.numpy as jnp
from jax import lax
from jax.experimental import pallas as pl
from jax.experimental.pallas import tpu as pltpu

EPS = 1e-5
LANE = 128
_PAD_OFF = 8   # sublane-aligned offset of real data inside the halo scratch


def _round_up(x, m):
    return (x + m - 1) // m * m


# ----------------------------------------------------------------------------
# Kernel 1: [BN affine (+ReLU) prologue] -> 3x3 conv (9 shifted MXU matmuls)
#           -> raw conv output (bf16) + per-channel sum / sum-of-squares.
# Grid: one image per step ('arbitrary': the stats outputs are resident
# accumulators across the batch axis).
#
#   x_ref     : (1, H, W, Cin_p)   bf16   raw previous-stage activations
#   scale_ref : (1, Cin_p)         f32    fused BN scale  (stage 1: ones)
#   shift_ref : (1, Cin_p)         f32    fused BN shift  (stage 1: zeros)
#   w_ref     : (9, Cin_p, Cout_p) bf16   conv taps, one GEMM matrix per (kh,kw)
#   y_ref     : (1, H, W, Cout_p)  bf16   raw conv output (pre-BN)
#   sum_ref   : (1, Cout_p)        f32    per-channel sum   (resident accumulator)
#   sq_ref    : (1, Cout_p)        f32    per-channel sumsq (resident accumulator)
#   acc_ref   : (H*W, Cout_p)      f32    VMEM accumulator for the 9 matmuls
#   pad_ref   : (H+2, W+16, Cin_p) f32    zero-bordered halo scratch
# ----------------------------------------------------------------------------
def _conv_stage_kernel(x_ref, scale_ref, shift_ref, w_ref,
                       y_ref, sum_ref, sq_ref,
                       acc_ref, pad_ref, *, apply_relu):
    n = pl.program_id(0)
    _, H, W, Cin = x_ref.shape
    Cout = w_ref.shape[2]

    @pl.when(n == 0)
    def _init():
        pad_ref[...] = jnp.zeros_like(pad_ref)   # halo borders stay zero forever
        sum_ref[...] = jnp.zeros_like(sum_ref)
        sq_ref[...] = jnp.zeros_like(sq_ref)

    # Fused prologue: previous stage's BN affine (+ ReLU), in f32.
    a = x_ref[0].astype(jnp.float32) * scale_ref[...] + shift_ref[...]
    if apply_relu:
        a = jnp.maximum(a, 0.0)
    # Write interior of the halo scratch (sublane-aligned offset, full lanes).
    pad_ref[1:H + 1, _PAD_OFF:_PAD_OFF + W, :] = a

    # 3x3 conv as 9 shifted GEMMs on the MXU (bf16 inputs, f32 accumulation).
    for k in range(9):
        kh, kw = k // 3, k % 3
        c0 = _PAD_OFF - 1 + kw
        win = pad_ref[kh:kh + H, c0:c0 + W, :]
        win = win.reshape(H * W, Cin).astype(jnp.bfloat16)
        tap = jnp.dot(win, w_ref[k], preferred_element_type=jnp.float32)
        if k == 0:
            acc_ref[...] = tap
        else:
            acc_ref[...] += tap

    acc = acc_ref[...]
    y_ref[0] = acc.reshape(H, W, Cout).astype(y_ref.dtype)
    # One-pass BN statistics (row reduction goes to the XLU, free under MXU).
    sum_ref[...] += jnp.sum(acc, axis=0, keepdims=True)
    sq_ref[...] += jnp.sum(acc * acc, axis=0, keepdims=True)


def _conv_stage(x, scale, shift, w9, *, apply_relu):
    # TODO(synk): for very large images the per-image block should additionally
    # be halo-tiled along H; currently only the batch axis is tiled.
    n, h, w, cin_p = x.shape
    cout_p = w9.shape[2]
    kernel = functools.partial(_conv_stage_kernel, apply_relu=apply_relu)
    flops = 2 * n * h * w * 9 * cin_p * cout_p
    bytes_accessed = (n * h * w * cin_p * 2 + 9 * cin_p * cout_p * 2
                      + n * h * w * cout_p * 2 + 8 * cout_p)
    return pl.pallas_call(
        kernel,
        out_shape=(
            jax.ShapeDtypeStruct((n, h, w, cout_p), jnp.bfloat16),
            jax.ShapeDtypeStruct((1, cout_p), jnp.float32),
            jax.ShapeDtypeStruct((1, cout_p), jnp.float32),
        ),
        grid_spec=pltpu.PrefetchScalarGridSpec(
            num_scalar_prefetch=0,
            grid=(n,),
            in_specs=[
                pl.BlockSpec((1, h, w, cin_p), lambda i: (i, 0, 0, 0)),
                pl.BlockSpec((1, cin_p), lambda i: (0, 0)),
                pl.BlockSpec((1, cin_p), lambda i: (0, 0)),
                pl.BlockSpec((9, cin_p, cout_p), lambda i: (0, 0, 0)),
            ],
            out_specs=(
                pl.BlockSpec((1, h, w, cout_p), lambda i: (i, 0, 0, 0)),
                pl.BlockSpec((1, cout_p), lambda i: (0, 0)),
                pl.BlockSpec((1, cout_p), lambda i: (0, 0)),
            ),
            scratch_shapes=[
                pltpu.VMEM((h * w, cout_p), jnp.float32),
                pltpu.VMEM((h + 2, w + 2 * _PAD_OFF, cin_p), jnp.float32),
            ],
        ),
        compiler_params=pltpu.CompilerParams(
            dimension_semantics=("arbitrary",),
            vmem_limit_bytes=64 * 1024 * 1024,
        ),
        cost_estimate=pl.CostEstimate(flops=flops, transcendentals=0,
                                      bytes_accessed=bytes_accessed),
    )(x, scale, shift, w9)


# ----------------------------------------------------------------------------
# Kernel 2: final BN affine + ReLU (stage-2 epilogue), parallel over batch.
# ----------------------------------------------------------------------------
def _bn_relu_kernel(y_ref, scale_ref, shift_ref, o_ref):
    a = y_ref[0].astype(jnp.float32) * scale_ref[...] + shift_ref[...]
    o_ref[0] = jnp.maximum(a, 0.0).astype(o_ref.dtype)


def _bn_relu(y_raw, scale, shift):
    n, h, w, cp = y_raw.shape
    return pl.pallas_call(
        _bn_relu_kernel,
        out_shape=jax.ShapeDtypeStruct((n, h, w, cp), jnp.float32),
        grid_spec=pltpu.PrefetchScalarGridSpec(
            num_scalar_prefetch=0,
            grid=(n,),
            in_specs=[
                pl.BlockSpec((1, h, w, cp), lambda i: (i, 0, 0, 0)),
                pl.BlockSpec((1, cp), lambda i: (0, 0)),
                pl.BlockSpec((1, cp), lambda i: (0, 0)),
            ],
            out_specs=pl.BlockSpec((1, h, w, cp), lambda i: (i, 0, 0, 0)),
        ),
        compiler_params=pltpu.CompilerParams(
            dimension_semantics=("parallel",)),
    )(y_raw, scale, shift)


# ----------------------------------------------------------------------------
# Host glue (O(C) / layout-only work)
# ----------------------------------------------------------------------------
def _bn_affine(ch_sum, ch_sq, count, gamma_p, beta_p):
    mean = ch_sum / count
    var = jnp.maximum(ch_sq / count - mean * mean, 0.0)   # biased variance
    inv_std = lax.rsqrt(var + EPS)
    scale = gamma_p * inv_std
    shift = beta_p - mean * scale
    return scale, shift


def _pad_last(x, target):
    c = x.shape[-1]
    if c == target:
        return x
    pad = [(0, 0)] * (x.ndim - 1) + [(0, target - c)]
    return jnp.pad(x, pad)


def _prep_weight(w_oihw, cin_p, cout_p):
    c_out, c_in, kh, kw = w_oihw.shape
    wt = jnp.transpose(w_oihw, (2, 3, 1, 0))                      # (3,3,Cin,Cout)
    wt = jnp.pad(wt, ((0, 0), (0, 0), (0, cin_p - c_in), (0, cout_p - c_out)))
    return wt.reshape(kh * kw, cin_p, cout_p).astype(jnp.bfloat16)


# ----------------------------------------------------------------------------
# VGGBlock forward (NCHW in, NCHW out)
# ----------------------------------------------------------------------------
@jax.jit
def vgg_block_forward(x_nchw, params):
    n, c_in, h, w = x_nchw.shape
    c_mid = params["w1"].shape[0]
    c_out = params["w2"].shape[0]
    cin_p = _round_up(c_in, LANE)
    cmid_p = _round_up(c_mid, LANE)
    cout_p = _round_up(c_out, LANE)
    count = float(n * h * w)

    # NCHW -> NHWC, lane-dense channel padding, bf16 for the MXU.
    x = jnp.transpose(x_nchw, (0, 2, 3, 1))
    x = _pad_last(x, cin_p).astype(jnp.bfloat16)

    w1 = _prep_weight(params["w1"], cin_p, cmid_p)
    w2 = _prep_weight(params["w2"], cmid_p, cout_p)
    g1 = _pad_last(params["g1"][None, :], cmid_p).astype(jnp.float32)
    b1 = _pad_last(params["be1"][None, :], cmid_p).astype(jnp.float32)
    g2 = _pad_last(params["g2"][None, :], cout_p).astype(jnp.float32)
    b2 = _pad_last(params["be2"][None, :], cout_p).astype(jnp.float32)
    # NOTE: conv biases (params["b1"/"b2"]) are intentionally unused: a
    # per-channel constant added before BN mean subtraction cancels exactly.

    # Stage 1: conv1 + batch stats (identity prologue, no ReLU).
    ones = jnp.ones((1, cin_p), jnp.float32)
    zeros = jnp.zeros((1, cin_p), jnp.float32)
    y1_raw, s1, q1 = _conv_stage(x, ones, zeros, w1, apply_relu=False)
    scale1, shift1 = _bn_affine(s1, q1, count, g1, b1)

    # Stage 2: bn1+ReLU fused as conv2's prologue, + stage-2 batch stats.
    y2_raw, s2, q2 = _conv_stage(y1_raw, scale1, shift1, w2, apply_relu=True)
    scale2, shift2 = _bn_affine(s2, q2, count, g2, b2)

    # Finalize: bn2 + ReLU.
    y2 = _bn_relu(y2_raw, scale2, shift2)

    y2 = y2[..., :c_out]
    return jnp.transpose(y2, (0, 3, 1, 2))                        # back to NCHW


# ----------------------------------------------------------------------------
# Pure-JAX reference (no Pallas) for correctness checking
# ----------------------------------------------------------------------------
def _ref_forward(x_nchw, params):
    def conv(x, w, b):
        y = lax.conv_general_dilated(x, w, (1, 1), ((1, 1), (1, 1)),
                                     dimension_numbers=("NCHW", "OIHW", "NCHW"))
        return y + b[None, :, None, None]

    def bn_relu(x, g, be):
        mean = jnp.mean(x, axis=(0, 2, 3), keepdims=True)
        var = jnp.mean((x - mean) ** 2, axis=(0, 2, 3), keepdims=True)
        y = (x - mean) * lax.rsqrt(var + EPS)
        y = y * g[None, :, None, None] + be[None, :, None, None]
        return jnp.maximum(y, 0.0)

    x = bn_relu(conv(x_nchw, params["w1"], params["b1"]), params["g1"], params["be1"])
    x = bn_relu(conv(x, params["w2"], params["b2"]), params["g2"], params["be2"])
    return x


def init_params(key, in_channels, middle_channels, out_channels):
    ks = jax.random.split(key, 8)
    return {
        "w1": 0.1 * jax.random.normal(ks[0], (middle_channels, in_channels, 3, 3), jnp.float32),
        "b1": 0.1 * jax.random.normal(ks[1], (middle_channels,), jnp.float32),
        "g1": 1.0 + 0.1 * jax.random.normal(ks[2], (middle_channels,), jnp.float32),
        "be1": 0.1 * jax.random.normal(ks[3], (middle_channels,), jnp.float32),
        "w2": 0.1 * jax.random.normal(ks[4], (out_channels, middle_channels, 3, 3), jnp.float32),
        "b2": 0.1 * jax.random.normal(ks[5], (out_channels,), jnp.float32),
        "g2": 1.0 + 0.1 * jax.random.normal(ks[6], (out_channels,), jnp.float32),
        "be2": 0.1 * jax.random.normal(ks[7], (out_channels,), jnp.float32),
    }


if __name__ == "__main__":
    key = jax.random.PRNGKey(0)
    k_x, k_p = jax.random.split(key)

    N, C_IN, C_MID, C_OUT, H, W = 2, 4, 8, 4, 16, 16
    x = jax.random.normal(k_x, (N, C_IN, H, W), jnp.float32)
    params = init_params(k_p, C_IN, C_MID, C_OUT)

    out = jax.block_until_ready(vgg_block_forward(x, params))
    ref = jax.block_until_ready(_ref_forward(x, params))

    assert out.shape == (N, C_OUT, H, W)
    # bf16 MXU inputs / bf16 raw intermediates vs a pure-f32 reference:
    # allow mixed-precision rounding.
    assert jnp.allclose(out, ref, atol=5e-2, rtol=5e-2), "mismatch vs JAX reference"

    print("KERNEL_OK")
</pallas_src>

<mosaic_0001>
module attributes {stable_mosaic.version = 11 : i64} {
  func.func @_conv_stage_kernel(%arg0: i32, %arg1: memref<1x16x16x128xbf16, #tpu.memory_space<vmem>>, %arg2: memref<1x128xf32, #tpu.memory_space<vmem>>, %arg3: memref<1x128xf32, #tpu.memory_space<vmem>>, %arg4: memref<9x128x128xbf16, #tpu.memory_space<vmem>>, %arg5: memref<1x16x16x128xbf16, #tpu.memory_space<vmem>>, %arg6: memref<1x128xf32, #tpu.memory_space<vmem>>, %arg7: memref<1x128xf32, #tpu.memory_space<vmem>>, %arg8: memref<256x128xf32, #tpu.memory_space<vmem>>, %arg9: memref<18x32x128xf32, #tpu.memory_space<vmem>>) attributes {dimension_semantics = [#tpu.dimension_semantics<arbitrary>], iteration_bounds = array<i64: 2>, scalar_prefetch = 0 : i64, scratch_operands = 2 : i64, tpu.core_type = #tpu.core_type<tc>, window_params = [{transform_indices = @transform_0, window_bounds = array<i64: 1, 16, 16, 128>}, {pipeline_mode = #tpu.pipeline_mode<synchronous>, transform_indices = @transform_1, window_bounds = array<i64: 1, 128>}, {pipeline_mode = #tpu.pipeline_mode<synchronous>, transform_indices = @transform_2, window_bounds = array<i64: 1, 128>}, {pipeline_mode = #tpu.pipeline_mode<synchronous>, transform_indices = @transform_3, window_bounds = array<i64: 9, 128, 128>}, {transform_indices = @transform_4, window_bounds = array<i64: 1, 16, 16, 128>}, {pipeline_mode = #tpu.pipeline_mode<synchronous>, transform_indices = @transform_5, window_bounds = array<i64: 1, 128>}, {pipeline_mode = #tpu.pipeline_mode<synchronous>, transform_indices = @transform_6, window_bounds = array<i64: 1, 128>}]} {
    %c0_i32 = arith.constant 0 : i32
    %0 = arith.cmpi eq, %arg0, %c0_i32 : i32
    %1 = arith.extui %0 : i1 to i32
    %c0_i32_0 = arith.constant 0 : i32
    %2 = arith.cmpi ne, %1, %c0_i32_0 : i32
    scf.if %2 {
      %cst_114 = arith.constant 0.000000e+00 : f32
      %111 = vector.broadcast %cst_114 : f32 to vector<18x32x128xf32>
      %c0_115 = arith.constant 0 : index
      %c0_116 = arith.constant 0 : index
      %c0_117 = arith.constant 0 : index
      %112 = vector.load %arg9[%c0_115, %c0_116, %c0_117] : memref<18x32x128xf32, #tpu.memory_space<vmem>>, vector<18x32x128xf32>
      tpu.vector_store %arg9[%c0_115, %c0_116, %c0_117], %111 {strides = array<i32>} : memref<18x32x128xf32, #tpu.memory_space<vmem>>, vector<18x32x128xf32>,
      %cst_118 = arith.constant 0.000000e+00 : f32
      %113 = vector.broadcast %cst_118 : f32 to vector<1x128xf32>
      %c0_119 = arith.constant 0 : index
      %c0_120 = arith.constant 0 : index
      %114 = vector.load %arg6[%c0_119, %c0_120] : memref<1x128xf32, #tpu.memory_space<vmem>>, vector<1x128xf32>
      tpu.vector_store %arg6[%c0_119, %c0_120], %113 {strides = array<i32>} : memref<1x128xf32, #tpu.memory_space<vmem>>, vector<1x128xf32>,
      %cst_121 = arith.constant 0.000000e+00 : f32
      %115 = vector.broadcast %cst_121 : f32 to vector<1x128xf32>
      %c0_122 = arith.constant 0 : index
      %c0_123 = arith.constant 0 : index
      %116 = vector.load %arg7[%c0_122, %c0_123] : memref<1x128xf32, #tpu.memory_space<vmem>>, vector<1x128xf32>
      tpu.vector_store %arg7[%c0_122, %c0_123], %115 {strides = array<i32>} : memref<1x128xf32, #tpu.memory_space<vmem>>, vector<1x128xf32>,
    } else {
    }
    %c0 = arith.constant 0 : index
    %c0_1 = arith.constant 0 : index
    %c0_2 = arith.constant 0 : index
    %c0_3 = arith.constant 0 : index
    %3 = vector.load %arg1[%c0, %c0_1, %c0_2, %c0_3] : memref<1x16x16x128xbf16, #tpu.memory_space<vmem>>, vector<1x16x16x128xbf16>
    %4 = vector.shape_cast %3 : vector<1x16x16x128xbf16> to vector<16x16x128xbf16>
    %5 = arith.extf %4 : vector<16x16x128xbf16> to vector<16x16x128xf32>
    %c0_4 = arith.constant 0 : index
    %c0_5 = arith.constant 0 : index
    %6 = vector.load %arg2[%c0_4, %c0_5] : memref<1x128xf32, #tpu.memory_space<vmem>>, vector<1x128xf32>
    %7 = vector.shape_cast %6 : vector<1x128xf32> to vector<1x1x128xf32>
    %8 = vector.broadcast %7 : vector<1x1x128xf32> to vector<16x16x128xf32>
    %9 = arith.mulf %5, %8 : vector<16x16x128xf32>
    %c0_6 = arith.constant 0 : index
    %c0_7 = arith.constant 0 : index
    %10 = vector.load %arg3[%c0_6, %c0_7] : memref<1x128xf32, #tpu.memory_space<vmem>>, vector<1x128xf32>
    %11 = vector.shape_cast %10 : vector<1x128xf32> to vector<1x1x128xf32>
    %12 = vector.broadcast %11 : vector<1x1x128xf32> to vector<16x16x128xf32>
    %13 = arith.addf %9, %12 : vector<16x16x128xf32>
    %c1 = arith.constant 1 : index
    %c8 = arith.constant 8 : index
    %c0_8 = arith.constant 0 : index
    %14 = vector.load %arg9[%c1, %c8, %c0_8] : memref<18x32x128xf32, #tpu.memory_space<vmem>>, vector<16x16x128xf32>
    tpu.vector_store %arg9[%c1, %c8, %c0_8], %13 {strides = array<i32>} : memref<18x32x128xf32, #tpu.memory_space<vmem>>, vector<16x16x128xf32>,
    %c0_9 = arith.constant 0 : index
    %c7 = arith.constant 7 : index
    %c0_10 = arith.constant 0 : index
    %15 = vector.load %arg9[%c0_9, %c7, %c0_10] : memref<18x32x128xf32, #tpu.memory_space<vmem>>, vector<16x16x128xf32>
    %16 = vector.shape_cast %15 : vector<16x16x128xf32> to vector<256x128xf32>
    %17 = arith.truncf %16 : vector<256x128xf32> to vector<256x128xbf16>
    %c0_11 = arith.constant 0 : index
    %c0_12 = arith.constant 0 : index
    %c0_13 = arith.constant 0 : index
    %18 = vector.load %arg4[%c0_11, %c0_12, %c0_13] : memref<9x128x128xbf16, #tpu.memory_space<vmem>>, vector<1x128x128xbf16>
    %19 = vector.shape_cast %18 : vector<1x128x128xbf16> to vector<128x128xbf16>
    %cst = arith.constant dense<0.000000e+00> : vector<256x128xf32>
    %20 = tpu.matmul %17, %19, %cst {dimension_numbers = #tpu.dot_dimension_numbers<[1], [0], [0], [1], [0, 0, 1, 1], [], []>} : vector<256x128xbf16>, vector<128x128xbf16>, vector<256x128xf32> -> vector<256x128xf32>
    %c0_14 = arith.constant 0 : index
    %c0_15 = arith.constant 0 : index
    %21 = vector.load %arg8[%c0_14, %c0_15] : memref<256x128xf32, #tpu.memory_space<vmem>>, vector<256x128xf32>
    tpu.vector_store %arg8[%c0_14, %c0_15], %20 {strides = array<i32>} : memref<256x128xf32, #tpu.memory_space<vmem>>, vector<256x128xf32>,
    %c0_16 = arith.constant 0 : index
    %c8_17 = arith.constant 8 : index
    %c0_18 = arith.constant 0 : index
    %22 = vector.load %arg9[%c0_16, %c8_17, %c0_18] : memref<18x32x128xf32, #tpu.memory_space<vmem>>, vector<16x16x128xf32>
    %23 = vector.shape_cast %22 : vector<16x16x128xf32> to vector<256x128xf32>
    %24 = arith.truncf %23 : vector<256x128xf32> to vector<256x128xbf16>
    %c1_19 = arith.constant 1 : index
    %c0_20 = arith.constant 0 : index
    %c0_21 = arith.constant 0 : index
    %25 = vector.load %arg4[%c1_19, %c0_20, %c0_21] : memref<9x128x128xbf16, #tpu.memory_space<vmem>>, vector<1x128x128xbf16>
    %26 = vector.shape_cast %25 : vector<1x128x128xbf16> to vector<128x128xbf16>
    %cst_22 = arith.constant dense<0.000000e+00> : vector<256x128xf32>
    %27 = tpu.matmul %24, %26, %cst_22 {dimension_numbers = #tpu.dot_dimension_numbers<[1], [0], [0], [1], [0, 0, 1, 1], [], []>} : vector<256x128xbf16>, vector<128x128xbf16>, vector<256x128xf32> -> vector<256x128xf32>
    %c0_23 = arith.constant 0 : index
    %c0_24 = arith.constant 0 : index
    %28 = vector.load %arg8[%c0_23, %c0_24] : memref<256x128xf32, #tpu.memory_space<vmem>>, vector<256x128xf32>
    %29 = arith.addf %28, %27 : vector<256x128xf32>
    %c0_25 = arith.constant 0 : index
    %c0_26 = arith.constant 0 : index
    %30 = vector.load %arg8[%c0_25, %c0_26] : memref<256x128xf32, #tpu.memory_space<vmem>>, vector<256x128xf32>
    tpu.vector_store %arg8[%c0_25, %c0_26], %29 {strides = array<i32>} : memref<256x128xf32, #tpu.memory_space<vmem>>, vector<256x128xf32>,
    %c0_27 = arith.constant 0 : index
    %c9 = arith.constant 9 : index
    %c0_28 = arith.constant 0 : index
    %31 = vector.load %arg9[%c0_27, %c9, %c0_28] : memref<18x32x128xf32, #tpu.memory_space<vmem>>, vector<16x16x128xf32>
    %32 = vector.shape_cast %31 : vector<16x16x128xf32> to vector<256x128xf32>
    %33 = arith.truncf %32 : vector<256x128xf32> to vector<256x128xbf16>
    %c2 = arith.constant 2 : index
    %c0_29 = arith.constant 0 : index
    %c0_30 = arith.constant 0 : index
    %34 = vector.load %arg4[%c2, %c0_29, %c0_30] : memref<9x128x128xbf16, #tpu.memory_space<vmem>>, vector<1x128x128xbf16>
    %35 = vector.shape_cast %34 : vector<1x128x128xbf16> to vector<128x128xbf16>
    %cst_31 = arith.constant dense<0.000000e+00> : vector<256x128xf32>
    %36 = tpu.matmul %33, %35, %cst_31 {dimension_numbers = #tpu.dot_dimension_numbers<[1], [0], [0], [1], [0, 0, 1, 1], [], []>} : vector<256x128xbf16>, vector<128x128xbf16>, vector<256x128xf32> -> vector<256x128xf32>
    %c0_32 = arith.constant 0 : index
    %c0_33 = arith.constant 0 : index
    %37 = vector.load %arg8[%c0_32, %c0_33] : memref<256x128xf32, #tpu.memory_space<vmem>>, vector<256x128xf32>
    %38 = arith.addf %37, %36 : vector<256x128xf32>
    %c0_34 = arith.constant 0 : index
    %c0_35 = arith.constant 0 : index
    %39 = vector.load %arg8[%c0_34, %c0_35] : memref<256x128xf32, #tpu.memory_space<vmem>>, vector<256x128xf32>
    tpu.vector_store %arg8[%c0_34, %c0_35], %38 {strides = array<i32>} : memref<256x128xf32, #tpu.memory_space<vmem>>, vector<256x128xf32>,
    %c1_36 = arith.constant 1 : index
    %c7_37 = arith.constant 7 : index
    %c0_38 = arith.constant 0 : index
    %40 = vector.load %arg9[%c1_36, %c7_37, %c0_38] : memref<18x32x128xf32, #tpu.memory_space<vmem>>, vector<16x16x128xf32>
    %41 = vector.shape_cast %40 : vector<16x16x128xf32> to vector<256x128xf32>
    %42 = arith.truncf %41 : vector<256x128xf32> to vector<256x128xbf16>
    %c3 = arith.constant 3 : index
    %c0_39 = arith.constant 0 : index
    %c0_40 = arith.constant 0 : index
    %43 = vector.load %arg4[%c3, %c0_39, %c0_40] : memref<9x128x128xbf16, #tpu.memory_space<vmem>>, vector<1x128x128xbf16>
    %44 = vector.shape_cast %43 : vector<1x128x128xbf16> to vector<128x128xbf16>
    %cst_41 = arith.constant dense<0.000000e+00> : vector<256x128xf32>
    %45 = tpu.matmul %42, %44, %cst_41 {dimension_numbers = #tpu.dot_dimension_numbers<[1], [0], [0], [1], [0, 0, 1, 1], [], []>} : vector<256x128xbf16>, vector<128x128xbf16>, vector<256x128xf32> -> vector<256x128xf32>
    %c0_42 = arith.constant 0 : index
    %c0_43 = arith.constant 0 : index
    %46 = vector.load %arg8[%c0_42, %c0_43] : memref<256x128xf32, #tpu.memory_space<vmem>>, vector<256x128xf32>
    %47 = arith.addf %46, %45 : vector<256x128xf32>
    %c0_44 = arith.constant 0 : index
    %c0_45 = arith.constant 0 : index
    %48 = vector.load %arg8[%c0_44, %c0_45] : memref<256x128xf32, #tpu.memory_space<vmem>>, vector<256x128xf32>
    tpu.vector_store %arg8[%c0_44, %c0_45], %47 {strides = array<i32>} : memref<256x128xf32, #tpu.memory_space<vmem>>, vector<256x128xf32>,
    %c1_46 = arith.constant 1 : index
    %c8_47 = arith.constant 8 : index
    %c0_48 = arith.constant 0 : index
    %49 = vector.load %arg9[%c1_46, %c8_47, %c0_48] : memref<18x32x128xf32, #tpu.memory_space<vmem>>, vector<16x16x128xf32>
    %50 = vector.shape_cast %49 : vector<16x16x128xf32> to vector<256x128xf32>
    %51 = arith.truncf %50 : vector<256x128xf32> to vector<256x128xbf16>
    %c4 = arith.constant 4 : index
    %c0_49 = arith.constant 0 : index
    %c0_50 = arith.constant 0 : index
    %52 = vector.load %arg4[%c4, %c0_49, %c0_50] : memref<9x128x128xbf16, #tpu.memory_space<vmem>>, vector<1x128x128xbf16>
    %53 = vector.shape_cast %52 : vector<1x128x128xbf16> to vector<128x128xbf16>
    %cst_51 = arith.constant dense<0.000000e+00> : vector<256x128xf32>
    %54 = tpu.matmul %51, %53, %cst_51 {dimension_numbers = #tpu.dot_dimension_numbers<[1], [0], [0], [1], [0, 0, 1, 1], [], []>} : vector<256x128xbf16>, vector<128x128xbf16>, vector<256x128xf32> -> vector<256x128xf32>
    %c0_52 = arith.constant 0 : index
    %c0_53 = arith.constant 0 : index
    %55 = vector.load %arg8[%c0_52, %c0_53] : memref<256x128xf32, #tpu.memory_space<vmem>>, vector<256x128xf32>
    %56 = arith.addf %55, %54 : vector<256x128xf32>
    %c0_54 = arith.constant 0 : index
    %c0_55 = arith.constant 0 : index
    %57 = vector.load %arg8[%c0_54, %c0_55] : memref<256x128xf32, #tpu.memory_space<vmem>>, vector<256x128xf32>
    tpu.vector_store %arg8[%c0_54, %c0_55], %56 {strides = array<i32>} : memref<256x128xf32, #tpu.memory_space<vmem>>, vector<256x128xf32>,
    %c1_56 = arith.constant 1 : index
    %c9_57 = arith.constant 9 : index
    %c0_58 = arith.constant 0 : index
    %58 = vector.load %arg9[%c1_56, %c9_57, %c0_58] : memref<18x32x128xf32, #tpu.memory_space<vmem>>, vector<16x16x128xf32>
    %59 = vector.shape_cast %58 : vector<16x16x128xf32> to vector<256x128xf32>
    %60 = arith.truncf %59 : vector<256x128xf32> to vector<256x128xbf16>
    %c5 = arith.constant 5 : index
    %c0_59 = arith.constant 0 : index
    %c0_60 = arith.constant 0 : index
    %61 = vector.load %arg4[%c5, %c0_59, %c0_60] : memref<9x128x128xbf16, #tpu.memory_space<vmem>>, vector<1x128x128xbf16>
    %62 = vector.shape_cast %61 : vector<1x128x128xbf16> to vector<128x128xbf16>
    %cst_61 = arith.constant dense<0.000000e+00> : vector<256x128xf32>
    %63 = tpu.matmul %60, %62, %cst_61 {dimension_numbers = #tpu.dot_dimension_numbers<[1], [0], [0], [1], [0, 0, 1, 1], [], []>} : vector<256x128xbf16>, vector<128x128xbf16>, vector<256x128xf32> -> vector<256x128xf32>
    %c0_62 = arith.constant 0 : index
    %c0_63 = arith.constant 0 : index
    %64 = vector.load %arg8[%c0_62, %c0_63] : memref<256x128xf32, #tpu.memory_space<vmem>>, vector<256x128xf32>
    %65 = arith.addf %64, %63 : vector<256x128xf32>
    %c0_64 = arith.constant 0 : index
    %c0_65 = arith.constant 0 : index
    %66 = vector.load %arg8[%c0_64, %c0_65] : memref<256x128xf32, #tpu.memory_space<vmem>>, vector<256x128xf32>
    tpu.vector_store %arg8[%c0_64, %c0_65], %65 {strides = array<i32>} : memref<256x128xf32, #tpu.memory_space<vmem>>, vector<256x128xf32>,
    %c2_66 = arith.constant 2 : index
    %c7_67 = arith.constant 7 : index
    %c0_68 = arith.constant 0 : index
    %67 = vector.load %arg9[%c2_66, %c7_67, %c0_68] : memref<18x32x128xf32, #tpu.memory_space<vmem>>, vector<16x16x128xf32>
    %68 = vector.shape_cast %67 : vector<16x16x128xf32> to vector<256x128xf32>
    %69 = arith.truncf %68 : vector<256x128xf32> to vector<256x128xbf16>
    %c6 = arith.constant 6 : index
    %c0_69 = arith.constant 0 : index
    %c0_70 = arith.constant 0 : index
    %70 = vector.load %arg4[%c6, %c0_69, %c0_70] : memref<9x128x128xbf16, #tpu.memory_space<vmem>>, vector<1x128x128xbf16>
    %71 = vector.shape_cast %70 : vector<1x128x128xbf16> to vector<128x128xbf16>
    %cst_71 = arith.constant dense<0.000000e+00> : vector<256x128xf32>
    %72 = tpu.matmul %69, %71, %cst_71 {dimension_numbers = #tpu.dot_dimension_numbers<[1], [0], [0], [1], [0, 0, 1, 1], [], []>} : vector<256x128xbf16>, vector<128x128xbf16>, vector<256x128xf32> -> vector<256x128xf32>
    %c0_72 = arith.constant 0 : index
    %c0_73 = arith.constant 0 : index
    %73 = vector.load %arg8[%c0_72, %c0_73] : memref<256x128xf32, #tpu.memory_space<vmem>>, vector<256x128xf32>
    %74 = arith.addf %73, %72 : vector<256x128xf32>
    %c0_74 = arith.constant 0 : index
    %c0_75 = arith.constant 0 : index
    %75 = vector.load %arg8[%c0_74, %c0_75] : memref<256x128xf32, #tpu.memory_space<vmem>>, vector<256x128xf32>
    tpu.vector_store %arg8[%c0_74, %c0_75], %74 {strides = array<i32>} : memref<256x128xf32, #tpu.memory_space<vmem>>, vector<256x128xf32>,
    %c2_76 = arith.constant 2 : index
    %c8_77 = arith.constant 8 : index
    %c0_78 = arith.constant 0 : index
    %76 = vector.load %arg9[%c2_76, %c8_77, %c0_78] : memref<18x32x128xf32, #tpu.memory_space<vmem>>, vector<16x16x128xf32>
    %77 = vector.shape_cast %76 : vector<16x16x128xf32> to vector<256x128xf32>
    %78 = arith.truncf %77 : vector<256x128xf32> to vector<256x128xbf16>
    %c7_79 = arith.constant 7 : index
    %c0_80 = arith.constant 0 : index
    %c0_81 = arith.constant 0 : index
    %79 = vector.load %arg4[%c7_79, %c0_80, %c0_81] : memref<9x128x128xbf16, #tpu.memory_space<vmem>>, vector<1x128x128xbf16>
    %80 = vector.shape_cast %79 : vector<1x128x128xbf16> to vector<128x128xbf16>
    %cst_82 = arith.constant dense<0.000000e+00> : vector<256x128xf32>
    %81 = tpu.matmul %78, %80, %cst_82 {dimension_numbers = #tpu.dot_dimension_numbers<[1], [0], [0], [1], [0, 0, 1, 1], [], []>} : vector<256x128xbf16>, vector<128x128xbf16>, vector<256x128xf32> -> vector<256x128xf32>
    %c0_83 = arith.constant 0 : index
    %c0_84 = arith.constant 0 : index
    %82 = vector.load %arg8[%c0_83, %c0_84] : memref<256x128xf32, #tpu.memory_space<vmem>>, vector<256x128xf32>
    %83 = arith.addf %82, %81 : vector<256x128xf32>
    %c0_85 = arith.constant 0 : index
    %c0_86 = arith.constant 0 : index
    %84 = vector.load %arg8[%c0_85, %c0_86] : memref<256x128xf32, #tpu.memory_space<vmem>>, vector<256x128xf32>
    tpu.vector_store %arg8[%c0_85, %c0_86], %83 {strides = array<i32>} : memref<256x128xf32, #tpu.memory_space<vmem>>, vector<256x128xf32>,
    %c2_87 = arith.constant 2 : index
    %c9_88 = arith.constant 9 : index
    %c0_89 = arith.constant 0 : index
    %85 = vector.load %arg9[%c2_87, %c9_88, %c0_89] : memref<18x32x128xf32, #tpu.memory_space<vmem>>, vector<16x16x128xf32>
    %86 = vector.shape_cast %85 : vector<16x16x128xf32> to vector<256x128xf32>
    %87 = arith.truncf %86 : vector<256x128xf32> to vector<256x128xbf16>
    %c8_90 = arith.constant 8 : index
    %c0_91 = arith.constant 0 : index
    %c0_92 = arith.constant 0 : index
    %88 = vector.load %arg4[%c8_90, %c0_91, %c0_92] : memref<9x128x128xbf16, #tpu.memory_space<vmem>>, vector<1x128x128xbf16>
    %89 = vector.shape_cast %88 : vector<1x128x128xbf16> to vector<128x128xbf16>
    %cst_93 = arith.constant dense<0.000000e+00> : vector<256x128xf32>
    %90 = tpu.matmul %87, %89, %cst_93 {dimension_numbers = #tpu.dot_dimension_numbers<[1], [0], [0], [1], [0, 0, 1, 1], [], []>} : vector<256x128xbf16>, vector<128x128xbf16>, vector<256x128xf32> -> vector<256x128xf32>
    %c0_94 = arith.constant 0 : index
    %c0_95 = arith.constant 0 : index
    %91 = vector.load %arg8[%c0_94, %c0_95] : memref<256x128xf32, #tpu.memory_space<vmem>>, vector<256x128xf32>
    %92 = arith.addf %91, %90 : vector<256x128xf32>
    %c0_96 = arith.constant 0 : index
    %c0_97 = arith.constant 0 : index
    %93 = vector.load %arg8[%c0_96, %c0_97] : memref<256x128xf32, #tpu.memory_space<vmem>>, vector<256x128xf32>
    tpu.vector_store %arg8[%c0_96, %c0_97], %92 {strides = array<i32>} : memref<256x128xf32, #tpu.memory_space<vmem>>, vector<256x128xf32>,
    %c0_98 = arith.constant 0 : index
    %c0_99 = arith.constant 0 : index
    %94 = vector.load %arg8[%c0_98, %c0_99] : memref<256x128xf32, #tpu.memory_space<vmem>>, vector<256x128xf32>
    %95 = vector.shape_cast %94 : vector<256x128xf32> to vector<16x16x128xf32>
    %96 = arith.truncf %95 : vector<16x16x128xf32> to vector<16x16x128xbf16>
    %c0_100 = arith.constant 0 : index
    %c0_101 = arith.constant 0 : index
    %c0_102 = arith.constant 0 : index
    %c0_103 = arith.constant 0 : index
    %97 = vector.load %arg5[%c0_100, %c0_101, %c0_102, %c0_103] : memref<1x16x16x128xbf16, #tpu.memory_space<vmem>>, vector<1x16x16x128xbf16>
    %98 = vector.shape_cast %97 : vector<1x16x16x128xbf16> to vector<16x16x128xbf16>
    %99 = vector.shape_cast %96 : vector<16x16x128xbf16> to vector<1x16x16x128xbf16>
    tpu.vector_store %arg5[%c0_100, %c0_101, %c0_102, %c0_103], %99 {strides = array<i32>} : memref<1x16x16x128xbf16, #tpu.memory_space<vmem>>, vector<1x16x16x128xbf16>,
    %c0_104 = arith.constant 0 : index
    %c0_105 = arith.constant 0 : index
    %100 = vector.load %arg6[%c0_104, %c0_105] : memref<1x128xf32, #tpu.memory_space<vmem>>, vector<1x128xf32>
    %cst_106 = arith.constant dense<0.000000e+00> : vector<128xf32>
    %101 = vector.multi_reduction <add>, %94, %cst_106 [0] : vector<256x128xf32> to vector<128xf32>
    %102 = vector.shape_cast %101 : vector<128xf32> to vector<1x128xf32>
    %103 = arith.addf %100, %102 : vector<1x128xf32>
    %c0_107 = arith.constant 0 : index
    %c0_108 = arith.constant 0 : index
    %104 = vector.load %arg6[%c0_107, %c0_108] : memref<1x128xf32, #tpu.memory_space<vmem>>, vector<1x128xf32>
    tpu.vector_store %arg6[%c0_107, %c0_108], %103 {strides = array<i32>} : memref<1x128xf32, #tpu.memory_space<vmem>>, vector<1x128xf32>,
    %c0_109 = arith.constant 0 : index
    %c0_110 = arith.constant 0 : index
    %105 = vector.load %arg7[%c0_109, %c0_110] : memref<1x128xf32, #tpu.memory_space<vmem>>, vector<1x128xf32>
    %106 = arith.mulf %94, %94 : vector<256x128xf32>
    %cst_111 = arith.constant dense<0.000000e+00> : vector<128xf32>
    %107 = vector.multi_reduction <add>, %106, %cst_111 [0] : vector<256x128xf32> to vector<128xf32>
    %108 = vector.shape_cast %107 : vector<128xf32> to vector<1x128xf32>
    %109 = arith.addf %105, %108 : vector<1x128xf32>
    %c0_112 = arith.constant 0 : index
    %c0_113 = arith.constant 0 : index
    %110 = vector.load %arg7[%c0_112, %c0_113] : memref<1x128xf32, #tpu.memory_space<vmem>>, vector<1x128xf32>
    tpu.vector_store %arg7[%c0_112, %c0_113], %109 {strides = array<i32>} : memref<1x128xf32, #tpu.memory_space<vmem>>, vector<1x128xf32>,
    return
  }
  func.func @transform_0(%arg0: i32) -> (i32, i32, i32, i32) {
    %c0_i32 = arith.constant 0 : i32
    %c0_i32_0 = arith.constant 0 : i32
    %c0_i32_1 = arith.constant 0 : i32
    %c0_i32_2 = arith.constant 0 : i32
    return %arg0, %c0_i32, %c0_i32_0, %c0_i32_1 : i32, i32, i32, i32
  }
  func.func @transform_1(%arg0: i32) -> (i32, i32) {
    %c0_i32 = arith.constant 0 : i32
    %c0_i32_0 = arith.constant 0 : i32
    %c0_i32_1 = arith.constant 0 : i32
    return %c0_i32, %c0_i32_0 : i32, i32
  }
  func.func @transform_2(%arg0: i32) -> (i32, i32) {
    %c0_i32 = arith.constant 0 : i32
    %c0_i32_0 = arith.constant 0 : i32
    %c0_i32_1 = arith.constant 0 : i32
    return %c0_i32, %c0_i32_0 : i32, i32
  }
  func.func @transform_3(%arg0: i32) -> (i32, i32, i32) {
    %c0_i32 = arith.constant 0 : i32
    %c0_i32_0 = arith.constant 0 : i32
    %c0_i32_1 = arith.constant 0 : i32
    %c0_i32_2 = arith.constant 0 : i32
    return %c0_i32, %c0_i32_0, %c0_i32_1 : i32, i32, i32
  }
  func.func @transform_4(%arg0: i32) -> (i32, i32, i32, i32) {
    %c0_i32 = arith.constant 0 : i32
    %c0_i32_0 = arith.constant 0 : i32
    %c0_i32_1 = arith.constant 0 : i32
    %c0_i32_2 = arith.constant 0 : i32
    return %arg0, %c0_i32, %c0_i32_0, %c0_i32_1 : i32, i32, i32, i32
  }
  func.func @transform_5(%arg0: i32) -> (i32, i32) {
    %c0_i32 = arith.constant 0 : i32
    %c0_i32_0 = arith.constant 0 : i32
    %c0_i32_1 = arith.constant 0 : i32
    return %c0_i32, %c0_i32_0 : i32, i32
  }
  func.func @transform_6(%arg0: i32) -> (i32, i32) {
    %c0_i32 = arith.constant 0 : i32
    %c0_i32_0 = arith.constant 0 : i32
    %c0_i32_1 = arith.constant 0 : i32
    return %c0_i32, %c0_i32_0 : i32, i32
  }
}

module attributes {stable_mosaic.version = 11 : i64} {
  func.func @_conv_stage_kernel(%arg0: i32, %arg1: memref<1x16x16x128xbf16, #tpu.memory_space<vmem>>, %arg2: memref<1x128xf32, #tpu.memory_space<vmem>>, %arg3: memref<1x128xf32, #tpu.memory_space<vmem>>, %arg4: memref<9x128x128xbf16, #tpu.memory_space<vmem>>, %arg5: memref<1x16x16x128xbf16, #tpu.memory_space<vmem>>, %arg6: memref<1x128xf32, #tpu.memory_space<vmem>>, %arg7: memref<1x128xf32, #tpu.memory_space<vmem>>, %arg8: memref<256x128xf32, #tpu.memory_space<vmem>>, %arg9: memref<18x32x128xf32, #tpu.memory_space<vmem>>) attributes {dimension_semantics = [#tpu.dimension_semantics<arbitrary>], iteration_bounds = array<i64: 2>, scalar_prefetch = 0 : i64, scratch_operands = 2 : i64, tpu.core_type = #tpu.core_type<tc>, window_params = [{transform_indices = @transform_0, window_bounds = array<i64: 1, 16, 16, 128>}, {pipeline_mode = #tpu.pipeline_mode<synchronous>, transform_indices = @transform_1, window_bounds = array<i64: 1, 128>}, {pipeline_mode = #tpu.pipeline_mode<synchronous>, transform_indices = @transform_2, window_bounds = array<i64: 1, 128>}, {pipeline_mode = #tpu.pipeline_mode<synchronous>, transform_indices = @transform_3, window_bounds = array<i64: 9, 128, 128>}, {transform_indices = @transform_4, window_bounds = array<i64: 1, 16, 16, 128>}, {pipeline_mode = #tpu.pipeline_mode<synchronous>, transform_indices = @transform_5, window_bounds = array<i64: 1, 128>}, {pipeline_mode = #tpu.pipeline_mode<synchronous>, transform_indices = @transform_6, window_bounds = array<i64: 1, 128>}]} {
    %c0_i32 = arith.constant 0 : i32
    %0 = arith.cmpi eq, %arg0, %c0_i32 : i32
    %1 = arith.extui %0 : i1 to i32
    %c0_i32_0 = arith.constant 0 : i32
    %2 = arith.cmpi ne, %1, %c0_i32_0 : i32
    scf.if %2 {
      %cst_115 = arith.constant 0.000000e+00 : f32
      %113 = vector.broadcast %cst_115 : f32 to vector<18x32x128xf32>
      %c0_116 = arith.constant 0 : index
      %c0_117 = arith.constant 0 : index
      %c0_118 = arith.constant 0 : index
      %114 = vector.load %arg9[%c0_116, %c0_117, %c0_118] : memref<18x32x128xf32, #tpu.memory_space<vmem>>, vector<18x32x128xf32>
      tpu.vector_store %arg9[%c0_116, %c0_117, %c0_118], %113 {strides = array<i32>} : memref<18x32x128xf32, #tpu.memory_space<vmem>>, vector<18x32x128xf32>,
      %cst_119 = arith.constant 0.000000e+00 : f32
      %115 = vector.broadcast %cst_119 : f32 to vector<1x128xf32>
      %c0_120 = arith.constant 0 : index
      %c0_121 = arith.constant 0 : index
      %116 = vector.load %arg6[%c0_120, %c0_121] : memref<1x128xf32, #tpu.memory_space<vmem>>, vector<1x128xf32>
      tpu.vector_store %arg6[%c0_120, %c0_121], %115 {strides = array<i32>} : memref<1x128xf32, #tpu.memory_space<vmem>>, vector<1x128xf32>,
      %cst_122 = arith.constant 0.000000e+00 : f32
      %117 = vector.broadcast %cst_122 : f32 to vector<1x128xf32>
      %c0_123 = arith.constant 0 : index
      %c0_124 = arith.constant 0 : index
      %118 = vector.load %arg7[%c0_123, %c0_124] : memref<1x128xf32, #tpu.memory_space<vmem>>, vector<1x128xf32>
      tpu.vector_store %arg7[%c0_123, %c0_124], %117 {strides = array<i32>} : memref<1x128xf32, #tpu.memory_space<vmem>>, vector<1x128xf32>,
    } else {
    }
    %c0 = arith.constant 0 : index
    %c0_1 = arith.constant 0 : index
    %c0_2 = arith.constant 0 : index
    %c0_3 = arith.constant 0 : index
    %3 = vector.load %arg1[%c0, %c0_1, %c0_2, %c0_3] : memref<1x16x16x128xbf16, #tpu.memory_space<vmem>>, vector<1x16x16x128xbf16>
    %4 = vector.shape_cast %3 : vector<1x16x16x128xbf16> to vector<16x16x128xbf16>
    %5 = arith.extf %4 : vector<16x16x128xbf16> to vector<16x16x128xf32>
    %c0_4 = arith.constant 0 : index
    %c0_5 = arith.constant 0 : index
    %6 = vector.load %arg2[%c0_4, %c0_5] : memref<1x128xf32, #tpu.memory_space<vmem>>, vector<1x128xf32>
    %7 = vector.shape_cast %6 : vector<1x128xf32> to vector<1x1x128xf32>
    %8 = vector.broadcast %7 : vector<1x1x128xf32> to vector<16x16x128xf32>
    %9 = arith.mulf %5, %8 : vector<16x16x128xf32>
    %c0_6 = arith.constant 0 : index
    %c0_7 = arith.constant 0 : index
    %10 = vector.load %arg3[%c0_6, %c0_7] : memref<1x128xf32, #tpu.memory_space<vmem>>, vector<1x128xf32>
    %11 = vector.shape_cast %10 : vector<1x128xf32> to vector<1x1x128xf32>
    %12 = vector.broadcast %11 : vector<1x1x128xf32> to vector<16x16x128xf32>
    %13 = arith.addf %9, %12 : vector<16x16x128xf32>
    %cst = arith.constant 0.000000e+00 : f32
    %14 = vector.broadcast %cst : f32 to vector<16x16x128xf32>
    %15 = arith.maximumf %13, %14 : vector<16x16x128xf32>
    %c1 = arith.constant 1 : index
    %c8 = arith.constant 8 : index
    %c0_8 = arith.constant 0 : index
    %16 = vector.load %arg9[%c1, %c8, %c0_8] : memref<18x32x128xf32, #tpu.memory_space<vmem>>, vector<16x16x128xf32>
    tpu.vector_store %arg9[%c1, %c8, %c0_8], %15 {strides = array<i32>} : memref<18x32x128xf32, #tpu.memory_space<vmem>>, vector<16x16x128xf32>,
    %c0_9 = arith.constant 0 : index
    %c7 = arith.constant 7 : index
    %c0_10 = arith.constant 0 : index
    %17 = vector.load %arg9[%c0_9, %c7, %c0_10] : memref<18x32x128xf32, #tpu.memory_space<vmem>>, vector<16x16x128xf32>
    %18 = vector.shape_cast %17 : vector<16x16x128xf32> to vector<256x128xf32>
    %19 = arith.truncf %18 : vector<256x128xf32> to vector<256x128xbf16>
    %c0_11 = arith.constant 0 : index
    %c0_12 = arith.constant 0 : index
    %c0_13 = arith.constant 0 : index
    %20 = vector.load %arg4[%c0_11, %c0_12, %c0_13] : memref<9x128x128xbf16, #tpu.memory_space<vmem>>, vector<1x128x128xbf16>
    %21 = vector.shape_cast %20 : vector<1x128x128xbf16> to vector<128x128xbf16>
    %cst_14 = arith.constant dense<0.000000e+00> : vector<256x128xf32>
    %22 = tpu.matmul %19, %21, %cst_14 {dimension_numbers = #tpu.dot_dimension_numbers<[1], [0], [0], [1], [0, 0, 1, 1], [], []>} : vector<256x128xbf16>, vector<128x128xbf16>, vector<256x128xf32> -> vector<256x128xf32>
    %c0_15 = arith.constant 0 : index
    %c0_16 = arith.constant 0 : index
    %23 = vector.load %arg8[%c0_15, %c0_16] : memref<256x128xf32, #tpu.memory_space<vmem>>, vector<256x128xf32>
    tpu.vector_store %arg8[%c0_15, %c0_16], %22 {strides = array<i32>} : memref<256x128xf32, #tpu.memory_space<vmem>>, vector<256x128xf32>,
    %c0_17 = arith.constant 0 : index
    %c8_18 = arith.constant 8 : index
    %c0_19 = arith.constant 0 : index
    %24 = vector.load %arg9[%c0_17, %c8_18, %c0_19] : memref<18x32x128xf32, #tpu.memory_space<vmem>>, vector<16x16x128xf32>
    %25 = vector.shape_cast %24 : vector<16x16x128xf32> to vector<256x128xf32>
    %26 = arith.truncf %25 : vector<256x128xf32> to vector<256x128xbf16>
    %c1_20 = arith.constant 1 : index
    %c0_21 = arith.constant 0 : index
    %c0_22 = arith.constant 0 : index
    %27 = vector.load %arg4[%c1_20, %c0_21, %c0_22] : memref<9x128x128xbf16, #tpu.memory_space<vmem>>, vector<1x128x128xbf16>
    %28 = vector.shape_cast %27 : vector<1x128x128xbf16> to vector<128x128xbf16>
    %cst_23 = arith.constant dense<0.000000e+00> : vector<256x128xf32>
    %29 = tpu.matmul %26, %28, %cst_23 {dimension_numbers = #tpu.dot_dimension_numbers<[1], [0], [0], [1], [0, 0, 1, 1], [], []>} : vector<256x128xbf16>, vector<128x128xbf16>, vector<256x128xf32> -> vector<256x128xf32>
    %c0_24 = arith.constant 0 : index
    %c0_25 = arith.constant 0 : index
    %30 = vector.load %arg8[%c0_24, %c0_25] : memref<256x128xf32, #tpu.memory_space<vmem>>, vector<256x128xf32>
    %31 = arith.addf %30, %29 : vector<256x128xf32>
    %c0_26 = arith.constant 0 : index
    %c0_27 = arith.constant 0 : index
    %32 = vector.load %arg8[%c0_26, %c0_27] : memref<256x128xf32, #tpu.memory_space<vmem>>, vector<256x128xf32>
    tpu.vector_store %arg8[%c0_26, %c0_27], %31 {strides = array<i32>} : memref<256x128xf32, #tpu.memory_space<vmem>>, vector<256x128xf32>,
    %c0_28 = arith.constant 0 : index
    %c9 = arith.constant 9 : index
    %c0_29 = arith.constant 0 : index
    %33 = vector.load %arg9[%c0_28, %c9, %c0_29] : memref<18x32x128xf32, #tpu.memory_space<vmem>>, vector<16x16x128xf32>
    %34 = vector.shape_cast %33 : vector<16x16x128xf32> to vector<256x128xf32>
    %35 = arith.truncf %34 : vector<256x128xf32> to vector<256x128xbf16>
    %c2 = arith.constant 2 : index
    %c0_30 = arith.constant 0 : index
    %c0_31 = arith.constant 0 : index
    %36 = vector.load %arg4[%c2, %c0_30, %c0_31] : memref<9x128x128xbf16, #tpu.memory_space<vmem>>, vector<1x128x128xbf16>
    %37 = vector.shape_cast %36 : vector<1x128x128xbf16> to vector<128x128xbf16>
    %cst_32 = arith.constant dense<0.000000e+00> : vector<256x128xf32>
    %38 = tpu.matmul %35, %37, %cst_32 {dimension_numbers = #tpu.dot_dimension_numbers<[1], [0], [0], [1], [0, 0, 1, 1], [], []>} : vector<256x128xbf16>, vector<128x128xbf16>, vector<256x128xf32> -> vector<256x128xf32>
    %c0_33 = arith.constant 0 : index
    %c0_34 = arith.constant 0 : index
    %39 = vector.load %arg8[%c0_33, %c0_34] : memref<256x128xf32, #tpu.memory_space<vmem>>, vector<256x128xf32>
    %40 = arith.addf %39, %38 : vector<256x128xf32>
    %c0_35 = arith.constant 0 : index
    %c0_36 = arith.constant 0 : index
    %41 = vector.load %arg8[%c0_35, %c0_36] : memref<256x128xf32, #tpu.memory_space<vmem>>, vector<256x128xf32>
    tpu.vector_store %arg8[%c0_35, %c0_36], %40 {strides = array<i32>} : memref<256x128xf32, #tpu.memory_space<vmem>>, vector<256x128xf32>,
    %c1_37 = arith.constant 1 : index
    %c7_38 = arith.constant 7 : index
    %c0_39 = arith.constant 0 : index
    %42 = vector.load %arg9[%c1_37, %c7_38, %c0_39] : memref<18x32x128xf32, #tpu.memory_space<vmem>>, vector<16x16x128xf32>
    %43 = vector.shape_cast %42 : vector<16x16x128xf32> to vector<256x128xf32>
    %44 = arith.truncf %43 : vector<256x128xf32> to vector<256x128xbf16>
    %c3 = arith.constant 3 : index
    %c0_40 = arith.constant 0 : index
    %c0_41 = arith.constant 0 : index
    %45 = vector.load %arg4[%c3, %c0_40, %c0_41] : memref<9x128x128xbf16, #tpu.memory_space<vmem>>, vector<1x128x128xbf16>
    %46 = vector.shape_cast %45 : vector<1x128x128xbf16> to vector<128x128xbf16>
    %cst_42 = arith.constant dense<0.000000e+00> : vector<256x128xf32>
    %47 = tpu.matmul %44, %46, %cst_42 {dimension_numbers = #tpu.dot_dimension_numbers<[1], [0], [0], [1], [0, 0, 1, 1], [], []>} : vector<256x128xbf16>, vector<128x128xbf16>, vector<256x128xf32> -> vector<256x128xf32>
    %c0_43 = arith.constant 0 : index
    %c0_44 = arith.constant 0 : index
    %48 = vector.load %arg8[%c0_43, %c0_44] : memref<256x128xf32, #tpu.memory_space<vmem>>, vector<256x128xf32>
    %49 = arith.addf %48, %47 : vector<256x128xf32>
    %c0_45 = arith.constant 0 : index
    %c0_46 = arith.constant 0 : index
    %50 = vector.load %arg8[%c0_45, %c0_46] : memref<256x128xf32, #tpu.memory_space<vmem>>, vector<256x128xf32>
    tpu.vector_store %arg8[%c0_45, %c0_46], %49 {strides = array<i32>} : memref<256x128xf32, #tpu.memory_space<vmem>>, vector<256x128xf32>,
    %c1_47 = arith.constant 1 : index
    %c8_48 = arith.constant 8 : index
    %c0_49 = arith.constant 0 : index
    %51 = vector.load %arg9[%c1_47, %c8_48, %c0_49] : memref<18x32x128xf32, #tpu.memory_space<vmem>>, vector<16x16x128xf32>
    %52 = vector.shape_cast %51 : vector<16x16x128xf32> to vector<256x128xf32>
    %53 = arith.truncf %52 : vector<256x128xf32> to vector<256x128xbf16>
    %c4 = arith.constant 4 : index
    %c0_50 = arith.constant 0 : index
    %c0_51 = arith.constant 0 : index
    %54 = vector.load %arg4[%c4, %c0_50, %c0_51] : memref<9x128x128xbf16, #tpu.memory_space<vmem>>, vector<1x128x128xbf16>
    %55 = vector.shape_cast %54 : vector<1x128x128xbf16> to vector<128x128xbf16>
    %cst_52 = arith.constant dense<0.000000e+00> : vector<256x128xf32>
    %56 = tpu.matmul %53, %55, %cst_52 {dimension_numbers = #tpu.dot_dimension_numbers<[1], [0], [0], [1], [0, 0, 1, 1], [], []>} : vector<256x128xbf16>, vector<128x128xbf16>, vector<256x128xf32> -> vector<256x128xf32>
    %c0_53 = arith.constant 0 : index
    %c0_54 = arith.constant 0 : index
    %57 = vector.load %arg8[%c0_53, %c0_54] : memref<256x128xf32, #tpu.memory_space<vmem>>, vector<256x128xf32>
    %58 = arith.addf %57, %56 : vector<256x128xf32>
    %c0_55 = arith.constant 0 : index
    %c0_56 = arith.constant 0 : index
    %59 = vector.load %arg8[%c0_55, %c0_56] : memref<256x128xf32, #tpu.memory_space<vmem>>, vector<256x128xf32>
    tpu.vector_store %arg8[%c0_55, %c0_56], %58 {strides = array<i32>} : memref<256x128xf32, #tpu.memory_space<vmem>>, vector<256x128xf32>,
    %c1_57 = arith.constant 1 : index
    %c9_58 = arith.constant 9 : index
    %c0_59 = arith.constant 0 : index
    %60 = vector.load %arg9[%c1_57, %c9_58, %c0_59] : memref<18x32x128xf32, #tpu.memory_space<vmem>>, vector<16x16x128xf32>
    %61 = vector.shape_cast %60 : vector<16x16x128xf32> to vector<256x128xf32>
    %62 = arith.truncf %61 : vector<256x128xf32> to vector<256x128xbf16>
    %c5 = arith.constant 5 : index
    %c0_60 = arith.constant 0 : index
    %c0_61 = arith.constant 0 : index
    %63 = vector.load %arg4[%c5, %c0_60, %c0_61] : memref<9x128x128xbf16, #tpu.memory_space<vmem>>, vector<1x128x128xbf16>
    %64 = vector.shape_cast %63 : vector<1x128x128xbf16> to vector<128x128xbf16>
    %cst_62 = arith.constant dense<0.000000e+00> : vector<256x128xf32>
    %65 = tpu.matmul %62, %64, %cst_62 {dimension_numbers = #tpu.dot_dimension_numbers<[1], [0], [0], [1], [0, 0, 1, 1], [], []>} : vector<256x128xbf16>, vector<128x128xbf16>, vector<256x128xf32> -> vector<256x128xf32>
    %c0_63 = arith.constant 0 : index
    %c0_64 = arith.constant 0 : index
    %66 = vector.load %arg8[%c0_63, %c0_64] : memref<256x128xf32, #tpu.memory_space<vmem>>, vector<256x128xf32>
    %67 = arith.addf %66, %65 : vector<256x128xf32>
    %c0_65 = arith.constant 0 : index
    %c0_66 = arith.constant 0 : index
    %68 = vector.load %arg8[%c0_65, %c0_66] : memref<256x128xf32, #tpu.memory_space<vmem>>, vector<256x128xf32>
    tpu.vector_store %arg8[%c0_65, %c0_66], %67 {strides = array<i32>} : memref<256x128xf32, #tpu.memory_space<vmem>>, vector<256x128xf32>,
    %c2_67 = arith.constant 2 : index
    %c7_68 = arith.constant 7 : index
    %c0_69 = arith.constant 0 : index
    %69 = vector.load %arg9[%c2_67, %c7_68, %c0_69] : memref<18x32x128xf32, #tpu.memory_space<vmem>>, vector<16x16x128xf32>
    %70 = vector.shape_cast %69 : vector<16x16x128xf32> to vector<256x128xf32>
    %71 = arith.truncf %70 : vector<256x128xf32> to vector<256x128xbf16>
    %c6 = arith.constant 6 : index
    %c0_70 = arith.constant 0 : index
    %c0_71 = arith.constant 0 : index
    %72 = vector.load %arg4[%c6, %c0_70, %c0_71] : memref<9x128x128xbf16, #tpu.memory_space<vmem>>, vector<1x128x128xbf16>
    %73 = vector.shape_cast %72 : vector<1x128x128xbf16> to vector<128x128xbf16>
    %cst_72 = arith.constant dense<0.000000e+00> : vector<256x128xf32>
    %74 = tpu.matmul %71, %73, %cst_72 {dimension_numbers = #tpu.dot_dimension_numbers<[1], [0], [0], [1], [0, 0, 1, 1], [], []>} : vector<256x128xbf16>, vector<128x128xbf16>, vector<256x128xf32> -> vector<256x128xf32>
    %c0_73 = arith.constant 0 : index
    %c0_74 = arith.constant 0 : index
    %75 = vector.load %arg8[%c0_73, %c0_74] : memref<256x128xf32, #tpu.memory_space<vmem>>, vector<256x128xf32>
    %76 = arith.addf %75, %74 : vector<256x128xf32>
    %c0_75 = arith.constant 0 : index
    %c0_76 = arith.constant 0 : index
    %77 = vector.load %arg8[%c0_75, %c0_76] : memref<256x128xf32, #tpu.memory_space<vmem>>, vector<256x128xf32>
    tpu.vector_store %arg8[%c0_75, %c0_76], %76 {strides = array<i32>} : memref<256x128xf32, #tpu.memory_space<vmem>>, vector<256x128xf32>,
    %c2_77 = arith.constant 2 : index
    %c8_78 = arith.constant 8 : index
    %c0_79 = arith.constant 0 : index
    %78 = vector.load %arg9[%c2_77, %c8_78, %c0_79] : memref<18x32x128xf32, #tpu.memory_space<vmem>>, vector<16x16x128xf32>
    %79 = vector.shape_cast %78 : vector<16x16x128xf32> to vector<256x128xf32>
    %80 = arith.truncf %79 : vector<256x128xf32> to vector<256x128xbf16>
    %c7_80 = arith.constant 7 : index
    %c0_81 = arith.constant 0 : index
    %c0_82 = arith.constant 0 : index
    %81 = vector.load %arg4[%c7_80, %c0_81, %c0_82] : memref<9x128x128xbf16, #tpu.memory_space<vmem>>, vector<1x128x128xbf16>
    %82 = vector.shape_cast %81 : vector<1x128x128xbf16> to vector<128x128xbf16>
    %cst_83 = arith.constant dense<0.000000e+00> : vector<256x128xf32>
    %83 = tpu.matmul %80, %82, %cst_83 {dimension_numbers = #tpu.dot_dimension_numbers<[1], [0], [0], [1], [0, 0, 1, 1], [], []>} : vector<256x128xbf16>, vector<128x128xbf16>, vector<256x128xf32> -> vector<256x128xf32>
    %c0_84 = arith.constant 0 : index
    %c0_85 = arith.constant 0 : index
    %84 = vector.load %arg8[%c0_84, %c0_85] : memref<256x128xf32, #tpu.memory_space<vmem>>, vector<256x128xf32>
    %85 = arith.addf %84, %83 : vector<256x128xf32>
    %c0_86 = arith.constant 0 : index
    %c0_87 = arith.constant 0 : index
    %86 = vector.load %arg8[%c0_86, %c0_87] : memref<256x128xf32, #tpu.memory_space<vmem>>, vector<256x128xf32>
    tpu.vector_store %arg8[%c0_86, %c0_87], %85 {strides = array<i32>} : memref<256x128xf32, #tpu.memory_space<vmem>>, vector<256x128xf32>,
    %c2_88 = arith.constant 2 : index
    %c9_89 = arith.constant 9 : index
    %c0_90 = arith.constant 0 : index
    %87 = vector.load %arg9[%c2_88, %c9_89, %c0_90] : memref<18x32x128xf32, #tpu.memory_space<vmem>>, vector<16x16x128xf32>
    %88 = vector.shape_cast %87 : vector<16x16x128xf32> to vector<256x128xf32>
    %89 = arith.truncf %88 : vector<256x128xf32> to vector<256x128xbf16>
    %c8_91 = arith.constant 8 : index
    %c0_92 = arith.constant 0 : index
    %c0_93 = arith.constant 0 : index
    %90 = vector.load %arg4[%c8_91, %c0_92, %c0_93] : memref<9x128x128xbf16, #tpu.memory_space<vmem>>, vector<1x128x128xbf16>
    %91 = vector.shape_cast %90 : vector<1x128x128xbf16> to vector<128x128xbf16>
    %cst_94 = arith.constant dense<0.000000e+00> : vector<256x128xf32>
    %92 = tpu.matmul %89, %91, %cst_94 {dimension_numbers = #tpu.dot_dimension_numbers<[1], [0], [0], [1], [0, 0, 1, 1], [], []>} : vector<256x128xbf16>, vector<128x128xbf16>, vector<256x128xf32> -> vector<256x128xf32>
    %c0_95 = arith.constant 0 : index
    %c0_96 = arith.constant 0 : index
    %93 = vector.load %arg8[%c0_95, %c0_96] : memref<256x128xf32, #tpu.memory_space<vmem>>, vector<256x128xf32>
    %94 = arith.addf %93, %92 : vector<256x128xf32>
    %c0_97 = arith.constant 0 : index
    %c0_98 = arith.constant 0 : index
    %95 = vector.load %arg8[%c0_97, %c0_98] : memref<256x128xf32, #tpu.memory_space<vmem>>, vector<256x128xf32>
    tpu.vector_store %arg8[%c0_97, %c0_98], %94 {strides = array<i32>} : memref<256x128xf32, #tpu.memory_space<vmem>>, vector<256x128xf32>,
    %c0_99 = arith.constant 0 : index
    %c0_100 = arith.constant 0 : index
    %96 = vector.load %arg8[%c0_99, %c0_100] : memref<256x128xf32, #tpu.memory_space<vmem>>, vector<256x128xf32>
    %97 = vector.shape_cast %96 : vector<256x128xf32> to vector<16x16x128xf32>
    %98 = arith.truncf %97 : vector<16x16x128xf32> to vector<16x16x128xbf16>
    %c0_101 = arith.constant 0 : index
    %c0_102 = arith.constant 0 : index
    %c0_103 = arith.constant 0 : index
    %c0_104 = arith.constant 0 : index
    %99 = vector.load %arg5[%c0_101, %c0_102, %c0_103, %c0_104] : memref<1x16x16x128xbf16, #tpu.memory_space<vmem>>, vector<1x16x16x128xbf16>
    %100 = vector.shape_cast %99 : vector<1x16x16x128xbf16> to vector<16x16x128xbf16>
    %101 = vector.shape_cast %98 : vector<16x16x128xbf16> to vector<1x16x16x128xbf16>
    tpu.vector_store %arg5[%c0_101, %c0_102, %c0_103, %c0_104], %101 {strides = array<i32>} : memref<1x16x16x128xbf16, #tpu.memory_space<vmem>>, vector<1x16x16x128xbf16>,
    %c0_105 = arith.constant 0 : index
    %c0_106 = arith.constant 0 : index
    %102 = vector.load %arg6[%c0_105, %c0_106] : memref<1x128xf32, #tpu.memory_space<vmem>>, vector<1x128xf32>
    %cst_107 = arith.constant dense<0.000000e+00> : vector<128xf32>
    %103 = vector.multi_reduction <add>, %96, %cst_107 [0] : vector<256x128xf32> to vector<128xf32>
    %104 = vector.shape_cast %103 : vector<128xf32> to vector<1x128xf32>
    %105 = arith.addf %102, %104 : vector<1x128xf32>
    %c0_108 = arith.constant 0 : index
    %c0_109 = arith.constant 0 : index
    %106 = vector.load %arg6[%c0_108, %c0_109] : memref<1x128xf32, #tpu.memory_space<vmem>>, vector<1x128xf32>
    tpu.vector_store %arg6[%c0_108, %c0_109], %105 {strides = array<i32>} : memref<1x128xf32, #tpu.memory_space<vmem>>, vector<1x128xf32>,
    %c0_110 = arith.constant 0 : index
    %c0_111 = arith.constant 0 : index
    %107 = vector.load %arg7[%c0_110, %c0_111] : memref<1x128xf32, #tpu.memory_space<vmem>>, vector<1x128xf32>
    %108 = arith.mulf %96, %96 : vector<256x128xf32>
    %cst_112 = arith.constant dense<0.000000e+00> : vector<128xf32>
    %109 = vector.multi_reduction <add>, %108, %cst_112 [0] : vector<256x128xf32> to vector<128xf32>
    %110 = vector.shape_cast %109 : vector<128xf32> to vector<1x128xf32>
    %111 = arith.addf %107, %110 : vector<1x128xf32>
    %c0_113 = arith.constant 0 : index
    %c0_114 = arith.constant 0 : index
    %112 = vector.load %arg7[%c0_113, %c0_114] : memref<1x128xf32, #tpu.memory_space<vmem>>, vector<1x128xf32>
    tpu.vector_store %arg7[%c0_113, %c0_114], %111 {strides = array<i32>} : memref<1x128xf32, #tpu.memory_space<vmem>>, vector<1x128xf32>,
    return
  }
  func.func @transform_0(%arg0: i32) -> (i32, i32, i32, i32) {
    %c0_i32 = arith.constant 0 : i32
    %c0_i32_0 = arith.constant 0 : i32
    %c0_i32_1 = arith.constant 0 : i32
    %c0_i32_2 = arith.constant 0 : i32
    return %arg0, %c0_i32, %c0_i32_0, %c0_i32_1 : i32, i32, i32, i32
  }
  func.func @transform_1(%arg0: i32) -> (i32, i32) {
    %c0_i32 = arith.constant 0 : i32
    %c0_i32_0 = arith.constant 0 : i32
    %c0_i32_1 = arith.constant 0 : i32
    return %c0_i32, %c0_i32_0 : i32, i32
  }
  func.func @transform_2(%arg0: i32) -> (i32, i32) {
    %c0_i32 = arith.constant 0 : i32
    %c0_i32_0 = arith.constant 0 : i32
    %c0_i32_1 = arith.constant 0 : i32
    return %c0_i32, %c0_i32_0 : i32, i32
  }
  func.func @transform_3(%arg0: i32) -> (i32, i32, i32) {
    %c0_i32 = arith.constant 0 : i32
    %c0_i32_0 = arith.constant 0 : i32
    %c0_i32_1 = arith.constant 0 : i32
    %c0_i32_2 = arith.constant 0 : i32
    return %c0_i32, %c0_i32_0, %c0_i32_1 : i32, i32, i32
  }
  func.func @transform_4(%arg0: i32) -> (i32, i32, i32, i32) {
    %c0_i32 = arith.constant 0 : i32
    %c0_i32_0 = arith.constant 0 : i32
    %c0_i32_1 = arith.constant 0 : i32
    %c0_i32_2 = arith.constant 0 : i32
    return %arg0, %c0_i32, %c0_i32_0, %c0_i32_1 : i32, i32, i32, i32
  }
  func.func @transform_5(%arg0: i32) -> (i32, i32) {
    %c0_i32 = arith.constant 0 : i32
    %c0_i32_0 = arith.constant 0 : i32
    %c0_i32_1 = arith.constant 0 : i32
    return %c0_i32, %c0_i32_0 : i32, i32
  }
  func.func @transform_6(%arg0: i32) -> (i32, i32) {
    %c0_i32 = arith.constant 0 : i32
    %c0_i32_0 = arith.constant 0 : i32
    %c0_i32_1 = arith.constant 0 : i32
    return %c0_i32, %c0_i32_0 : i32, i32
  }
}

module attributes {stable_mosaic.version = 11 : i64} {
  func.func @_bn_relu_kernel(%arg0: i32, %arg1: memref<1x16x16x128xbf16, #tpu.memory_space<vmem>>, %arg2: memref<1x128xf32, #tpu.memory_space<vmem>>, %arg3: memref<1x128xf32, #tpu.memory_space<vmem>>, %arg4: memref<1x16x16x128xf32, #tpu.memory_space<vmem>>) attributes {dimension_semantics = [#tpu.dimension_semantics<parallel>], iteration_bounds = array<i64: 2>, scalar_prefetch = 0 : i64, scratch_operands = 0 : i64, tpu.core_type = #tpu.core_type<tc>, window_params = [{transform_indices = @transform_0, window_bounds = array<i64: 1, 16, 16, 128>}, {pipeline_mode = #tpu.pipeline_mode<synchronous>, transform_indices = @transform_1, window_bounds = array<i64: 1, 128>}, {pipeline_mode = #tpu.pipeline_mode<synchronous>, transform_indices = @transform_2, window_bounds = array<i64: 1, 128>}, {transform_indices = @transform_3, window_bounds = array<i64: 1, 16, 16, 128>}]} {
    %c0 = arith.constant 0 : index
    %c0_0 = arith.constant 0 : index
    %c0_1 = arith.constant 0 : index
    %c0_2 = arith.constant 0 : index
    %0 = vector.load %arg1[%c0, %c0_0, %c0_1, %c0_2] : memref<1x16x16x128xbf16, #tpu.memory_space<vmem>>, vector<1x16x16x128xbf16>
    %1 = vector.shape_cast %0 : vector<1x16x16x128xbf16> to vector<16x16x128xbf16>
    %2 = arith.extf %1 : vector<16x16x128xbf16> to vector<16x16x128xf32>
    %c0_3 = arith.constant 0 : index
    %c0_4 = arith.constant 0 : index
    %3 = vector.load %arg2[%c0_3, %c0_4] : memref<1x128xf32, #tpu.memory_space<vmem>>, vector<1x128xf32>
    %4 = vector.shape_cast %3 : vector<1x128xf32> to vector<1x1x128xf32>
    %5 = vector.broadcast %4 : vector<1x1x128xf32> to vector<16x16x128xf32>
    %6 = arith.mulf %2, %5 : vector<16x16x128xf32>
    %c0_5 = arith.constant 0 : index
    %c0_6 = arith.constant 0 : index
    %7 = vector.load %arg3[%c0_5, %c0_6] : memref<1x128xf32, #tpu.memory_space<vmem>>, vector<1x128xf32>
    %8 = vector.shape_cast %7 : vector<1x128xf32> to vector<1x1x128xf32>
    %9 = vector.broadcast %8 : vector<1x1x128xf32> to vector<16x16x128xf32>
    %10 = arith.addf %6, %9 : vector<16x16x128xf32>
    %cst = arith.constant 0.000000e+00 : f32
    %11 = vector.broadcast %cst : f32 to vector<16x16x128xf32>
    %12 = arith.maximumf %10, %11 : vector<16x16x128xf32>
    %c0_7 = arith.constant 0 : index
    %c0_8 = arith.constant 0 : index
    %c0_9 = arith.constant 0 : index
    %c0_10 = arith.constant 0 : index
    %13 = vector.load %arg4[%c0_7, %c0_8, %c0_9, %c0_10] : memref<1x16x16x128xf32, #tpu.memory_space<vmem>>, vector<1x16x16x128xf32>
    %14 = vector.shape_cast %13 : vector<1x16x16x128xf32> to vector<16x16x128xf32>
    %15 = vector.shape_cast %12 : vector<16x16x128xf32> to vector<1x16x16x128xf32>
    tpu.vector_store %arg4[%c0_7, %c0_8, %c0_9, %c0_10], %15 {strides = array<i32>} : memref<1x16x16x128xf32, #tpu.memory_space<vmem>>, vector<1x16x16x128xf32>,
    return
  }
  func.func @transform_0(%arg0: i32) -> (i32, i32, i32, i32) {
    %c0_i32 = arith.constant 0 : i32
    %c0_i32_0 = arith.constant 0 : i32
    %c0_i32_1 = arith.constant 0 : i32
    %c0_i32_2 = arith.constant 0 : i32
    return %arg0, %c0_i32, %c0_i32_0, %c0_i32_1 : i32, i32, i32, i32
  }
  func.func @transform_1(%arg0: i32) -> (i32, i32) {
    %c0_i32 = arith.constant 0 : i32
    %c0_i32_0 = arith.constant 0 : i32
    %c0_i32_1 = arith.constant 0 : i32
    return %c0_i32, %c0_i32_0 : i32, i32
  }
  func.func @transform_2(%arg0: i32) -> (i32, i32) {
    %c0_i32 = arith.constant 0 : i32
    %c0_i32_0 = arith.constant 0 : i32
    %c0_i32_1 = arith.constant 0 : i32
    return %c0_i32, %c0_i32_0 : i32, i32
  }
  func.func @transform_3(%arg0: i32) -> (i32, i32, i32, i32) {
    %c0_i32 = arith.constant 0 : i32
    %c0_i32_0 = arith.constant 0 : i32
    %c0_i32_1 = arith.constant 0 : i32
    %c0_i32_2 = arith.constant 0 : i32
    return %arg0, %c0_i32, %c0_i32_0, %c0_i32_1 : i32, i32, i32, i32
  }
}

</mosaic_0001>

<bundles_post_ra>
// kernel: vgg_block_forward.5
= control target key start
LH: loop header
LB: loop body
LE: loop exit
PB: predicated region body
PF: predicated region fallthrough
CT: control target
= control target key end

     0   :  { %s556_s12 = smov 0   ;;  %s703_s0 = inlined_call_operand.vmem [shape: bf16[2,16,16,128], index: 0, kind: input, shape index: {}]   ;;  %s704_s1 = inlined_call_operand.vmem [shape: f32[1,128], index: 1, kind: input, shape index: {}]   ;;  %s705_s2 = inlined_call_operand.vmem [shape: f32[1,128], index: 2, kind: input, shape index: {}]   ;;  %s706_s3 = inlined_call_operand.vmem [shape: f32[2,16,16,128], index: 3, kind: output, shape index: {}]  }
   0x1 LB: > { %s426_s13 = sadd.s32 4294967295, %s534_s12   ;;  %p430_p0 = scmp.ge.s32.totalorder %s534_s12, 1  ;;  %s534_s12 = sphi %s556_s12, %s13_s12  }
   0x2   : > { %p137_p1 = scmp.lt.s32.totalorder %s534_s12, 3 }
   0x4   : > { %p138_p2 = pnand %p430_p0, %p137_p1 }
   0x5   : > { %p161_p3 = scmp.lt.s32.totalorder (!%p138_p2), %s426_s13, 1 }
   0x6   : > { %141 = sbr.rel (%p138_p2) target bundleno = 55 (0x37), region = 32 }
   0xb   : > { %s708_s13 = smov (!%p161_p3, %s426_s13), 1  ;;  %v575_v0 = vld [vmem:[%s704_s1] ss:$0 sm:$0xff] }
   0xc   : > { %s437_s14 = sshll.u32 %s708_s13, 7  ;;  %v583_v5 = vld [vmem:[%s705_s2] ss:$0 sm:$0xff]  ;;  %s438_s22 = sshll.u32 %s708_s13, 8 }
   0xd   : > { %s570_s17 = scalar_lea.vmem %s703_s0, %s437_s14  ;;  %s602_s25 = scalar_lea.vmem %s706_s3, %s438_s22 }
   0xe   : > { %v440_v1 = vld [vmem:[%s570_s17] sm:$0xff]   ;;  %v503_v2 = vld [vmem:[%s570_s17 + $0x8] sm:$0xff]   ;;  %v504_v3 = vld [vmem:[%s570_s17 + $0x10] sm:$0xff]  }
   0xf   : > { %v441_v4 = vunpack.c.l.bf16 %v440_v1  ;;  %v442_v6 = vunpack.c.h.bf16 %v440_v1  ;;  %v445_v7 = vunpack.c.l.bf16 %v503_v2  ;;  %v446_v8 = vunpack.c.h.bf16 %v503_v2  ;;  %v505_v9 = vld [vmem:[%s570_s17 + $0x18] sm:$0xff]   ;;  %v506_v30 = vld [vmem:[%s570_s17 + $0x20] sm:$0xff]   ;;  %v507_v31 = vld [vmem:[%s570_s17 + $0x28] sm:$0xff]  }
  0x10   : > { %v449_v10 = vunpack.c.l.bf16 %v504_v3  ;;  %v450_v11 = vunpack.c.h.bf16 %v504_v3  ;;  %v453_v12 = vunpack.c.l.bf16 %v505_v9  ;;  %v454_v13 = vunpack.c.h.bf16 %v505_v9  ;;  %v508_v36 = vld [vmem:[%s570_s17 + $0x30] sm:$0xff]   ;;  %v509_v37 = vld [vmem:[%s570_s17 + $0x38] sm:$0xff]   ;;  %v510_v3 = vld [vmem:[%s570_s17 + $0x40] sm:$0xff]  }
  0x11   : > { %v239_v14 = vmul.f32 %v575_v0, %v441_v4  ;;  %v240_v15 = vmul.f32 %v575_v0, %v442_v6  ;;  %v241_v16 = vmul.f32 %v575_v0, %v445_v7  ;;  %v242_v17 = vmul.f32 %v575_v0, %v446_v8  ;;  %v511_v4 = vld [vmem:[%s570_s17 + $0x48] sm:$0xff]   ;;  %v512_v6 = vld [vmem:[%s570_s17 + $0x50] sm:$0xff]  }
  0x12   : > { %v243_v18 = vmul.f32 %v575_v0, %v449_v10  ;;  %v244_v19 = vmul.f32 %v575_v0, %v450_v11  ;;  %v245_v20 = vmul.f32 %v575_v0, %v453_v12  ;;  %v246_v21 = vmul.f32 %v575_v0, %v454_v13  ;;  %v513_v11 = vld [vmem:[%s570_s17 + $0x58] sm:$0xff]  }
  0x13   : > { %v275_v22 = vadd.f32 %v583_v5, %v239_v14  ;;  %v276_v23 = vadd.f32 %v583_v5, %v240_v15  ;;  %v277_v24 = vadd.f32 %v583_v5, %v241_v16  ;;  %v278_v25 = vadd.f32 %v583_v5, %v242_v17 }
  0x14   : > { %v279_v26 = vadd.f32 %v583_v5, %v243_v18  ;;  %v280_v27 = vadd.f32 %v583_v5, %v244_v19  ;;  %v281_v28 = vadd.f32 %v583_v5, %v245_v20  ;;  %v282_v29 = vadd.f32 %v583_v5, %v246_v21 }
  0x15   : > { %v307_v32 = vmax.f32 %v275_v22, 0.0  ;;  %v308_v33 = vmax.f32 %v276_v23, 0.0  ;;  %v309_v34 = vmax.f32 %v277_v24, 0.0  ;;  %v310_v35 = vmax.f32 %v278_v25, 0.0 }
  0x16   : > { %v311_v38 = vmax.f32 %v279_v26, 0.0  ;;  %v312_v39 = vmax.f32 %v280_v27, 0.0  ;;  %v313_v40 = vmax.f32 %v281_v28, 0.0  ;;  %v314_v41 = vmax.f32 %v282_v29, 0.0 }
  0x17   : > { %339 = vst [vmem:[%s602_s25] sm:$0xff] %v307_v32  ;;  %v457_v42 = vunpack.c.l.bf16 %v506_v30  ;;  %v458_v43 = vunpack.c.h.bf16 %v506_v30  ;;  %v461_v44 = vunpack.c.l.bf16 %v507_v31  ;;  %v462_v45 = vunpack.c.h.bf16 %v507_v31 }
  0x18   : > { %340 = vst [vmem:[%s602_s25 + $0x8] sm:$0xff] %v308_v33  ;;  %v465_v46 = vunpack.c.l.bf16 %v508_v36  ;;  %v466_v47 = vunpack.c.h.bf16 %v508_v36  ;;  %v469_v48 = vunpack.c.l.bf16 %v509_v37  ;;  %v470_v49 = vunpack.c.h.bf16 %v509_v37 }
  0x19   : > { %341 = vst [vmem:[%s602_s25 + $0x10] sm:$0xff] %v309_v34  ;;  %v247_v50 = vmul.f32 %v575_v0, %v457_v42  ;;  %v248_v51 = vmul.f32 %v575_v0, %v458_v43  ;;  %v249_v52 = vmul.f32 %v575_v0, %v461_v44  ;;  %v250_v53 = vmul.f32 %v575_v0, %v462_v45  ;;  %v516_v42 = vld [vmem:[%s570_s17 + $0x70] sm:$0xff]  }
  0x1a   : > { %342 = vst [vmem:[%s602_s25 + $0x18] sm:$0xff] %v310_v35  ;;  %v251_v54 = vmul.f32 %v575_v0, %v465_v46  ;;  %v252_v55 = vmul.f32 %v575_v0, %v466_v47  ;;  %v253_v56 = vmul.f32 %v575_v0, %v469_v48  ;;  %v254_v57 = vmul.f32 %v575_v0, %v470_v49  ;;  %v517_v47 = vld [vmem:[%s570_s17 + $0x78] sm:$0xff]  }
  0x1b   : > { %343 = vst [vmem:[%s602_s25 + $0x20] sm:$0xff] %v311_v38  ;;  %v283_v58 = vadd.f32 %v583_v5, %v247_v50  ;;  %v284_v59 = vadd.f32 %v583_v5, %v248_v51  ;;  %v285_v60 = vadd.f32 %v583_v5, %v249_v52  ;;  %v286_v61 = vadd.f32 %v583_v5, %v250_v53 }
  0x1c   : > { %344 = vst [vmem:[%s602_s25 + $0x28] sm:$0xff] %v312_v39  ;;  %v287_v62 = vadd.f32 %v583_v5, %v251_v54  ;;  %v288_v63 = vadd.f32 %v583_v5, %v252_v55  ;;  %v289_v1 = vadd.f32 %v583_v5, %v253_v56  ;;  %v290_v2 = vadd.f32 %v583_v5, %v254_v57 }
  0x1d   : > { %345 = vst [vmem:[%s602_s25 + $0x30] sm:$0xff] %v313_v40  ;;  %v315_v7 = vmax.f32 %v283_v58, 0.0  ;;  %v316_v8 = vmax.f32 %v284_v59, 0.0  ;;  %v317_v9 = vmax.f32 %v285_v60, 0.0  ;;  %v318_v10 = vmax.f32 %v286_v61, 0.0  ;;  %v514_v40 = vld [vmem:[%s570_s17 + $0x60] sm:$0xff]  }
  0x1e   : > { %346 = vst [vmem:[%s602_s25 + $0x38] sm:$0xff] %v314_v41  ;;  %v319_v12 = vmax.f32 %v287_v62, 0.0  ;;  %v320_v13 = vmax.f32 %v288_v63, 0.0  ;;  %v321_v14 = vmax.f32 %v289_v1, 0.0  ;;  %v322_v15 = vmax.f32 %v290_v2, 0.0  ;;  %v515_v41 = vld [vmem:[%s570_s17 + $0x68] sm:$0xff]  }
  0x1f   : > { %347 = vst [vmem:[%s602_s25 + $0x40] sm:$0xff] %v315_v7  ;;  %v473_v16 = vunpack.c.l.bf16 %v510_v3  ;;  %v474_v17 = vunpack.c.h.bf16 %v510_v3  ;;  %v477_v18 = vunpack.c.l.bf16 %v511_v4  ;;  %v478_v19 = vunpack.c.h.bf16 %v511_v4 }
  0x20   : > { %348 = vst [vmem:[%s602_s25 + $0x48] sm:$0xff] %v316_v8  ;;  %v481_v20 = vunpack.c.l.bf16 %v512_v6  ;;  %v482_v21 = vunpack.c.h.bf16 %v512_v6  ;;  %v485_v22 = vunpack.c.l.bf16 %v513_v11  ;;  %v486_v23 = vunpack.c.h.bf16 %v513_v11 }
  0x21   : > { %349 = vst [vmem:[%s602_s25 + $0x50] sm:$0xff] %v317_v9  ;;  %v255_v24 = vmul.f32 %v575_v0, %v473_v16  ;;  %v256_v25 = vmul.f32 %v575_v0, %v474_v17  ;;  %v257_v26 = vmul.f32 %v575_v0, %v477_v18  ;;  %v258_v27 = vmul.f32 %v575_v0, %v478_v19 }
  0x22   : > { %350 = vst [vmem:[%s602_s25 + $0x58] sm:$0xff] %v318_v10  ;;  %v259_v28 = vmul.f32 %v575_v0, %v481_v20  ;;  %v260_v29 = vmul.f32 %v575_v0, %v482_v21  ;;  %v261_v30 = vmul.f32 %v575_v0, %v485_v22  ;;  %v262_v31 = vmul.f32 %v575_v0, %v486_v23 }
  0x23   : > { %351 = vst [vmem:[%s602_s25 + $0x60] sm:$0xff] %v319_v12  ;;  %v291_v32 = vadd.f32 %v583_v5, %v255_v24  ;;  %v292_v33 = vadd.f32 %v583_v5, %v256_v25  ;;  %v293_v34 = vadd.f32 %v583_v5, %v257_v26  ;;  %v294_v35 = vadd.f32 %v583_v5, %v258_v27 }
  0x24   : > { %352 = vst [vmem:[%s602_s25 + $0x68] sm:$0xff] %v320_v13  ;;  %v295_v36 = vadd.f32 %v583_v5, %v259_v28  ;;  %v296_v37 = vadd.f32 %v583_v5, %v260_v29  ;;  %v297_v38 = vadd.f32 %v583_v5, %v261_v30  ;;  %v298_v39 = vadd.f32 %v583_v5, %v262_v31 }
  0x25   : > { %353 = vst [vmem:[%s602_s25 + $0x70] sm:$0xff] %v321_v14  ;;  %v323_v43 = vmax.f32 %v291_v32, 0.0  ;;  %v324_v44 = vmax.f32 %v292_v33, 0.0  ;;  %v325_v45 = vmax.f32 %v293_v34, 0.0  ;;  %v326_v46 = vmax.f32 %v294_v35, 0.0 }
  0x26   : > { %354 = vst [vmem:[%s602_s25 + $0x78] sm:$0xff] %v322_v15  ;;  %v327_v48 = vmax.f32 %v295_v36, 0.0  ;;  %v328_v49 = vmax.f32 %v296_v37, 0.0  ;;  %v329_v50 = vmax.f32 %v297_v38, 0.0  ;;  %v330_v51 = vmax.f32 %v298_v39, 0.0 }
  0x27   : > { %355 = vst [vmem:[%s602_s25 + $0x80] sm:$0xff] %v323_v43  ;;  %v489_v52 = vunpack.c.l.bf16 %v514_v40  ;;  %v490_v53 = vunpack.c.h.bf16 %v514_v40  ;;  %v493_v54 = vunpack.c.l.bf16 %v515_v41  ;;  %v494_v55 = vunpack.c.h.bf16 %v515_v41 }
  0x28   : > { %356 = vst [vmem:[%s602_s25 + $0x88] sm:$0xff] %v324_v44  ;;  %v497_v56 = vunpack.c.l.bf16 %v516_v42  ;;  %v498_v57 = vunpack.c.h.bf16 %v516_v42  ;;  %v501_v58 = vunpack.c.l.bf16 %v517_v47  ;;  %v502_v59 = vunpack.c.h.bf16 %v517_v47 }
  0x29   : > { %357 = vst [vmem:[%s602_s25 + $0x90] sm:$0xff] %v325_v45  ;;  %v263_v60 = vmul.f32 %v575_v0, %v489_v52  ;;  %v264_v61 = vmul.f32 %v575_v0, %v490_v53  ;;  %v265_v62 = vmul.f32 %v575_v0, %v493_v54  ;;  %v266_v63 = vmul.f32 %v575_v0, %v494_v55 }
  0x2a   : > { %358 = vst [vmem:[%s602_s25 + $0x98] sm:$0xff] %v326_v46  ;;  %v267_v1 = vmul.f32 %v575_v0, %v497_v56  ;;  %v268_v2 = vmul.f32 %v575_v0, %v498_v57  ;;  %v269_v3 = vmul.f32 %v575_v0, %v501_v58  ;;  %v270_v4 = vmul.f32 %v575_v0, %v502_v59 }
  0x2b   : > { %359 = vst [vmem:[%s602_s25 + $0xa0] sm:$0xff] %v327_v48  ;;  %v299_v6 = vadd.f32 %v583_v5, %v263_v60  ;;  %v300_v7 = vadd.f32 %v583_v5, %v264_v61  ;;  %v301_v8 = vadd.f32 %v583_v5, %v265_v62  ;;  %v302_v9 = vadd.f32 %v583_v5, %v266_v63 }
  0x2c   : > { %360 = vst [vmem:[%s602_s25 + $0xa8] sm:$0xff] %v328_v49  ;;  %v303_v10 = vadd.f32 %v583_v5, %v267_v1  ;;  %v304_v11 = vadd.f32 %v583_v5, %v268_v2  ;;  %v305_v14 = vadd.f32 %v583_v5, %v269_v3  ;;  %v306_v16 = vadd.f32 %v583_v5, %v270_v4 }
  0x2d   : > { %361 = vst [vmem:[%s602_s25 + $0xb0] sm:$0xff] %v329_v50  ;;  %v331_v0 = vmax.f32 %v299_v6, 0.0  ;;  %v332_v12 = vmax.f32 %v300_v7, 0.0  ;;  %v333_v13 = vmax.f32 %v301_v8, 0.0  ;;  %v334_v15 = vmax.f32 %v302_v9, 0.0 }
  0x2e   : > { %362 = vst [vmem:[%s602_s25 + $0xb8] sm:$0xff] %v330_v51  ;;  %v335_v17 = vmax.f32 %v303_v10, 0.0  ;;  %v336_v18 = vmax.f32 %v304_v11, 0.0  ;;  %v337_v19 = vmax.f32 %v305_v14, 0.0  ;;  %v338_v20 = vmax.f32 %v306_v16, 0.0 }
  0x2f   : > { %363 = vst [vmem:[%s602_s25 + $0xc0] sm:$0xff] %v331_v0 }
  0x30   : > { %364 = vst [vmem:[%s602_s25 + $0xc8] sm:$0xff] %v332_v12 }
  0x31   : > { %365 = vst [vmem:[%s602_s25 + $0xd0] sm:$0xff] %v333_v13 }
  0x32   : > { %366 = vst [vmem:[%s602_s25 + $0xd8] sm:$0xff] %v334_v15 }
  0x33   : > { %367 = vst [vmem:[%s602_s25 + $0xe0] sm:$0xff] %v335_v17 }
  0x34   : > { %368 = vst [vmem:[%s602_s25 + $0xe8] sm:$0xff] %v336_v18 }
  0x35   : > { %369 = vst [vmem:[%s602_s25 + $0xf0] sm:$0xff] %v337_v19 }
  0x36   : > { %370 = vst [vmem:[%s602_s25 + $0xf8] sm:$0xff] %v338_v20 }
  0x37 PF: > { %s13_s12 = sadd.s32 1, %s534_s12  }
  0x38   : > { %p10_p4 = scmp.ge.s32.totalorder %s13_s12, 4  }
  0x3a   :  { %12 = sbr.rel (!%p10_p4) target bundleno = 1 (0x1), region = 62 }

// kernel: vgg_block_forward.3
= control target key start
LH: loop header
LB: loop body
LE: loop exit
PB: predicated region body
PF: predicated region fallthrough
CT: control target
= control target key end

     0   :  { %s4144_s21 = smov 0   ;;  %s4964_s0 = inlined_call_operand.vmem [shape: bf16[2,16,16,128], index: 0, kind: input, shape index: {}]   ;;  %s4965_s1 = inlined_call_operand.vmem [shape: f32[1,128], index: 1, kind: input, shape index: {}]   ;;  %s4966_s2 = inlined_call_operand.vmem [shape: f32[1,128], index: 2, kind: input, shape index: {}]   ;;  %s4967_s3 = inlined_call_operand.vmem [shape: bf16[9,128,128], index: 3, kind: input, shape index: {}]   ;;  %s4968_s4 = inlined_call_operand.vmem [shape: bf16[2,16,16,128], index: 4, kind: output, shape index: {0}]   ;;  %s4969_s5 = inlined_call_operand.vmem [shape: f32[1,128], index: 5, kind: output, shape index: {1}]   ;;  %s4970_s6 = inlined_call_operand.vmem [shape: f32[1,128], index: 6, kind: output, shape index: {2}]  }
   0x1 LB: > { %s3387_s22 = sadd.s32 4294967295, %s4106_s21   ;;  %p3391_p0 = scmp.ge.s32.totalorder %s4106_s21, 1  ;;  %s4106_s21 = sphi %s4144_s21, %s17_s21  }
   0x2   : > { %p207_p1 = scmp.lt.s32.totalorder %s4106_s21, 3 }
   0x4   : > { %p208_p2 = pnand %p3391_p0, %p207_p1 }
   0x6   : > { %211 = sbr.rel (%p208_p2) target bundleno = 851 (0x353), region = 36 }
   0xb   : > { %p237_p3 = scmp.lt.s32.totalorder %s3387_s22, 1  ;;  %p3396_p4 = scmp.ne.s32.totalorder %s3387_s22, 0 }
   0xd   : > { %s238_s23 = scalar_select %p237_p3, %s3387_s22, 1 }
   0xe   : > { %250 = sbr.rel (%p3396_p4) target bundleno = 94 (0x5e), region = 40 }
   0xf   : > { %s3815_s24 = sshll.u32 %s238_s23, 7 }
  0x10   : > { %s4155_s27 = scalar_lea.vmem %s4964_s0, %s3815_s24  ;;  %s4160_s30 = scalar_lea.vmem %s4968_s4, %s3815_s24 }
  0x13   : > { %v4108_v0 = vmov 0.0  }
  0x14   : > { %251 = vst [vmem:[#allocation3] sm:$0xff] %v4108_v0 }
  0x15   : > { %252 = vst [vmem:[#allocation3 + $0x8] sm:$0xff] %v4108_v0 }
  0x16   : > { %253 = vst [vmem:[#allocation3 + $0x10] sm:$0xff] %v4108_v0 }
  0x17   : > { %254 = vst [vmem:[#allocation3 + $0x18] sm:$0xff] %v4108_v0 }
  0x18   : > { %255 = vst [vmem:[#allocation3 + $0x20] sm:$0xff] %v4108_v0 }
  0x19   : > { %256 = vst [vmem:[#allocation3 + $0x28] sm:$0xff] %v4108_v0 }
  0x1a   : > { %257 = vst [vmem:[#allocation3 + $0x30] sm:$0xff] %v4108_v0 }
  0x1b   : > { %258 = vst [vmem:[#allocation3 + $0x38] sm:$0xff] %v4108_v0 }
  0x1c   : > { %259 = vst [vmem:[#allocation3 + $0x40] sm:$0xff] %v4108_v0 }
  0x1d   : > { %260 = vst [vmem:[#allocation3 + $0x48] sm:$0xff] %v4108_v0 }
  0x1e   : > { %261 = vst [vmem:[#allocation3 + $0x50] sm:$0xff] %v4108_v0 }
  0x1f   : > { %262 = vst [vmem:[#allocation3 + $0x58] sm:$0xff] %v4108_v0 }
  0x20   : > { %263 = vst [vmem:[#allocation3 + $0x60] sm:$0xff] %v4108_v0 }
  0x21   : > { %264 = vst [vmem:[#allocation3 + $0x68] sm:$0xff] %v4108_v0 }
  0x22   : > { %265 = vst [vmem:[#allocation3 + $0x70] sm:$0xff] %v4108_v0 }
  0x23   : > { %266 = vst [vmem:[#allocation3 + $0x78] sm:$0xff] %v4108_v0 }
  0x24   : > { %267 = vst [vmem:[#allocation3 + $0x80] sm:$0xff] %v4108_v0 }
  0x25   : > { %268 = vst [vmem:[#allocation3 + $0x88] sm:$0xff] %v4108_v0 }
  0x26   : > { %269 = vst [vmem:[#allocation3 + $0x90] sm:$0xff] %v4108_v0 }
  0x27   : > { %270 = vst [vmem:[#allocation3 + $0x98] sm:$0xff] %v4108_v0 }
  0x28   : > { %271 = vst [vmem:[#allocation3 + $0xa0] sm:$0xff] %v4108_v0 }
  0x29   : > { %272 = vst [vmem:[#allocation3 + $0xa8] sm:$0xff] %v4108_v0 }
  0x2a   : > { %273 = vst [vmem:[#allocation3 + $0xb0] sm:$0xff] %v4108_v0 }
  0x2b   : > { %274 = vst [vmem:[#allocation3 + $0xb8] sm:$0xff] %v4108_v0 }
  0x2c   : > { %275 = vst [vmem:[#allocation3 + $0xc0] sm:$0xff] %v4108_v0 }
  0x2d   : > { %276 = vst [vmem:[#allocation3 + $0xc8] sm:$0xff] %v4108_v0 }
  0x2e   : > { %277 = vst [vmem:[#allocation3 + $0xd0] sm:$0xff] %v4108_v0 }
  0x2f   : > { %278 = vst [vmem:[#allocation3 + $0xd8] sm:$0xff] %v4108_v0 }
  0x30   : > { %279 = vst [vmem:[#allocation3 + $0xe0] sm:$0xff] %v4108_v0 }
  0x31   : > { %280 = vst [vmem:[#allocation3 + $0xe8] sm:$0xff] %v4108_v0 }
  0x32   : > { %281 = vst [vmem:[#allocation3 + $0xf0] sm:$0xff] %v4108_v0 }
  0x33   : > { %282 = vst [vmem:[#allocation3 + $0xf8] sm:$0xff] %v4108_v0 }
  0x34   : > { %283 = vst [vmem:[#allocation3 + $0x100] sm:$0xff] %v4108_v0 }
  0x35   : > { %284 = vst [vmem:[#allocation3 + $0x108] sm:$0xff] %v4108_v0 }
  0x36   : > { %285 = vst [vmem:[#allocation3 + $0x110] sm:$0xff] %v4108_v0 }
  0x37   : > { %286 = vst [vmem:[#allocation3 + $0x118] sm:$0xff] %v4108_v0 }
  0x38   : > { %287 = vst [vmem:[#allocation3 + $0x120] sm:$0xff] %v4108_v0 }
  0x39   : > { %288 = vst [vmem:[#allocation3 + $0x128] sm:$0xff] %v4108_v0 }
  0x3a   : > { %289 = vst [vmem:[#allocation3 + $0x130] sm:$0xff] %v4108_v0 }
  0x3b   : > { %290 = vst [vmem:[#allocation3 + $0x138] sm:$0xff] %v4108_v0 }
  0x3c   : > { %291 = vst [vmem:[#allocation3 + $0x140] sm:$0xff] %v4108_v0 }
  0x3d   : > { %292 = vst [vmem:[#allocation3 + $0x148] sm:$0xff] %v4108_v0 }
  0x3e   : > { %293 = vst [vmem:[#allocation3 + $0x150] sm:$0xff] %v4108_v0 }
  0x3f   : > { %294 = vst [vmem:[#allocation3 + $0x158] sm:$0xff] %v4108_v0 }
  0x40   : > { %295 = vst [vmem:[#allocation3 + $0x160] sm:$0xff] %v4108_v0 }
  0x41   : > { %296 = vst [vmem:[#allocation3 + $0x168] sm:$0xff] %v4108_v0 }
  0x42   : > { %297 = vst [vmem:[#allocation3 + $0x170] sm:$0xff] %v4108_v0 }
  0x43   : > { %298 = vst [vmem:[#allocation3 + $0x178] sm:$0xff] %v4108_v0 }
  0x44   : > { %299 = vst [vmem:[#allocation3 + $0x180] sm:$0xff] %v4108_v0 }
  0x45   : > { %300 = vst [vmem:[#allocation3 + $0x188] sm:$0xff] %v4108_v0 }
  0x46   : > { %301 = vst [vmem:[#allocation3 + $0x190] sm:$0xff] %v4108_v0 }
  0x47   : > { %302 = vst [vmem:[#allocation3 + $0x198] sm:$0xff] %v4108_v0 }
  0x48   : > { %303 = vst [vmem:[#allocation3 + $0x1a0] sm:$0xff] %v4108_v0 }
  0x49   : > { %304 = vst [vmem:[#allocation3 + $0x1a8] sm:$0xff] %v4108_v0 }
  0x4a   : > { %305 = vst [vmem:[#allocation3 + $0x1b0] sm:$0xff] %v4108_v0 }
  0x4b   : > { %306 = vst [vmem:[#allocation3 + $0x1b8] sm:$0xff] %v4108_v0 }
  0x4c   : > { %307 = vst [vmem:[#allocation3 + $0x1c0] sm:$0xff] %v4108_v0 }
  0x4d   : > { %308 = vst [vmem:[#allocation3 + $0x1c8] sm:$0xff] %v4108_v0 }
  0x4e   : > { %309 = vst [vmem:[#allocation3 + $0x1d0] sm:$0xff] %v4108_v0 }
  0x4f   : > { %310 = vst [vmem:[#allocation3 + $0x1d8] sm:$0xff] %v4108_v0 }
  0x50   : > { %311 = vst [vmem:[#allocation3 + $0x1e0] sm:$0xff] %v4108_v0 }
  0x51   : > { %312 = vst [vmem:[#allocation3 + $0x1e8] sm:$0xff] %v4108_v0 }
  0x52   : > { %313 = vst [vmem:[#allocation3 + $0x1f0] sm:$0xff] %v4108_v0 }
  0x53   : > { %314 = vst [vmem:[#allocation3 + $0x1f8] sm:$0xff] %v4108_v0 }
  0x54   : > { %315 = vst [vmem:[#allocation3 + $0x200] sm:$0xff] %v4108_v0 }
  0x55   : > { %316 = vst [vmem:[#allocation3 + $0x208] sm:$0xff] %v4108_v0 }
  0x56   : > { %317 = vst [vmem:[#allocation3 + $0x210] sm:$0xff] %v4108_v0 }
  0x57   : > { %318 = vst [vmem:[#allocation3 + $0x218] sm:$0xff] %v4108_v0 }
  0x58   : > { %319 = vst [vmem:[#allocation3 + $0x220] sm:$0xff] %v4108_v0 }
  0x59   : > { %320 = vst [vmem:[#allocation3 + $0x228] sm:$0xff] %v4108_v0 }
  0x5a   : > { %321 = vst [vmem:[#allocation3 + $0x230] sm:$0xff] %v4108_v0 }
  0x5b   : > { %322 = vst [vmem:[#allocation3 + $0x238] sm:$0xff] %v4108_v0 }
  0x5c   : > { %323 = vst [vmem:[%s4969_s5] sm:$0x1] %v4108_v0 }
  0x5d   : > { %324 = vst [vmem:[%s4970_s6] sm:$0x1] %v4108_v0 }
  0x5e PF: > { %v3824_v1 = vld [vmem:[%s4967_s3 + $0x38] sm:$0xff]  ;;  %v3823_v2 = vld [vmem:[%s4967_s3 + $0x30] sm:$0xff]  ;;  %v4252_v6 = vld [vmem:[%s4965_s1] ss:$0 sm:$0xff] }
  0x5f   : > { %4063 = vmatpush.bf16.msra.mxu1 %v3824_v1  ;;  %4064 = vmatpush.bf16.msra.mxu2 %v3824_v1  ;;  %v4035_v3 = vld [vmem:[%s4155_s27 + $0x18] sm:$0xff]   ;;  %v4257_v7 = vld [vmem:[%s4966_s2] ss:$0 sm:$0xff]  ;;  %v3822_v14 = vld [vmem:[%s4967_s3 + $0x28] sm:$0xff] }
  0x60   : > { %4065 = vmatpush.bf16.msra.mxu3 %v3824_v1  ;;  %606 = vmatpush.bf16.msra.mxu0 %v3824_v1  ;;  %v3903_v4 = vunpack.c.l.bf16 %v4035_v3  ;;  %v3904_v5 = vunpack.c.h.bf16 %v4035_v3  ;;  %v4039_v8 = vld [vmem:[%s4155_s27 + $0x38] sm:$0xff]   ;;  %v4036_v23 = vld [vmem:[%s4155_s27 + $0x20] sm:$0xff]   ;;  %v4037_v56 = vld [vmem:[%s4155_s27 + $0x28] sm:$0xff]  }
  0x61   : > { %v4043_v9 = vld [vmem:[%s4155_s27 + $0x58] sm:$0xff]   ;;  %v3919_v12 = vunpack.c.l.bf16 %v4039_v8  ;;  %v3920_v13 = vunpack.c.h.bf16 %v4039_v8  ;;  %v4040_v24 = vld [vmem:[%s4155_s27 + $0x40] sm:$0xff]   ;;  %v3907_v27 = vunpack.c.l.bf16 %v4036_v23  ;;  %v3908_v28 = vunpack.c.h.bf16 %v4036_v23  ;;  %v4041_v57 = vld [vmem:[%s4155_s27 + $0x48] sm:$0xff]  }
  0x62   : > { %v399_v10 = vmul.f32 %v4252_v6, %v3903_v4  ;;  %v400_v11 = vmul.f32 %v4252_v6, %v3904_v5  ;;  %v3935_v15 = vunpack.c.l.bf16 %v4043_v9  ;;  %v3936_v16 = vunpack.c.h.bf16 %v4043_v9  ;;  %v4044_v25 = vld [vmem:[%s4155_s27 + $0x60] sm:$0xff]   ;;  %v3820_v47 = vld [vmem:[%s4967_s3 + $0x18] sm:$0xff]  ;;  %v3819_v58 = vld [vmem:[%s4967_s3 + $0x10] sm:$0xff] }
  0x63   : > { %4066 = vmatpush.bf16.msra.mxu1 %v3823_v2  ;;  %4067 = vmatpush.bf16.msra.mxu2 %v3823_v2  ;;  %v407_v19 = vmul.f32 %v4252_v6, %v3919_v12  ;;  %v408_v20 = vmul.f32 %v4252_v6, %v3920_v13  ;;  %v3923_v29 = vunpack.c.l.bf16 %v4040_v24  ;;  %v3890_v30 = vld [vmem:[%s4155_s27] sm:$0xff]   ;;  %v401_v35 = vmul.f32 %v4252_v6, %v3907_v27  ;;  %v3818_v4 = vld [vmem:[%s4967_s3 + $0x8] sm:$0xff] }
  0x64   : > { %4068 = vmatpush.bf16.msra.mxu3 %v3823_v2  ;;  %607 = vmatpush.bf16.msra.mxu0 %v3823_v2  ;;  %v4267_v17 = vadd.f32 %v4257_v7, %v399_v10  ;;  %v4270_v18 = vadd.f32 %v4257_v7, %v400_v11  ;;  %v415_v21 = vmul.f32 %v4252_v6, %v3935_v15  ;;  %v3821_v31 = vld [vmem:[%s4967_s3 + $0x20] sm:$0xff]  ;;  %v3924_v37 = vunpack.c.h.bf16 %v4040_v24  ;;  %v4045_v9 = vld [vmem:[%s4155_s27 + $0x68] sm:$0xff]  }
  0x65   : > { %v416_v22 = vmul.f32 %v4252_v6, %v3936_v16  ;;  %v443_v26 = vadd.f32 %v4257_v7, %v407_v19  ;;  %v444_v32 = vadd.f32 %v4257_v7, %v408_v20  ;;  %v402_v36 = vmul.f32 %v4252_v6, %v3908_v28  ;;  %v4033_v10 = vld [vmem:[%s4155_s27 + $0x8] sm:$0xff]   ;;  %v3817_v19 = vld [vmem:[%s4967_s3] sm:$0xff] }
  0x66   : > { %468 = vst [vmem:[#allocation3 + $0x88] sm:$0xff] %v4267_v17  ;;  %v451_v33 = vadd.f32 %v4257_v7, %v415_v21  ;;  %v3939_v38 = vunpack.c.l.bf16 %v4044_v25  ;;  %v409_v39 = vmul.f32 %v4252_v6, %v3923_v29  ;;  %v3940_v40 = vunpack.c.h.bf16 %v4044_v25  ;;  %v494_v21 = vld [vmem:[#allocation3 + $0x7] sm:$0xff] }
  0x67   : > { %4069 = vmatpush.bf16.msra.mxu1 %v3822_v14  ;;  %4070 = vmatpush.bf16.msra.mxu2 %v3822_v14  ;;  %469 = vst [vmem:[#allocation3 + $0x90] sm:$0xff] %v4270_v18  ;;  %v452_v34 = vadd.f32 %v4257_v7, %v416_v22  ;;  %v3891_v41 = vunpack.c.l.bf16 %v3890_v30  ;;  %v3892_v42 = vunpack.c.h.bf16 %v3890_v30  ;;  %v4293_v43 = vadd.f32 %v4257_v7, %v401_v35  ;;  %v3848_v35 = vld [vmem:[%s4967_s3 + $0xf8] sm:$0xff] }
  0x68   : > { %4071 = vmatpush.bf16.msra.mxu3 %v3822_v14  ;;  %608 = vmatpush.bf16.msra.mxu0 %v3822_v14  ;;  %476 = vst [vmem:[#allocation3 + $0x108] sm:$0xff] %v443_v26  ;;  %v4296_v44 = vadd.f32 %v4257_v7, %v402_v36  ;;  %v410_v45 = vmul.f32 %v4252_v6, %v3924_v37  ;;  %v3911_v60 = vunpack.c.l.bf16 %v4037_v56  ;;  %v3912_v61 = vunpack.c.h.bf16 %v4037_v56 }
  0x69   : > { %477 = vst [vmem:[#allocation3 + $0x110] sm:$0xff] %v444_v32  ;;  %v417_v46 = vmul.f32 %v4252_v6, %v3939_v38  ;;  %v4304_v48 = vadd.f32 %v4257_v7, %v409_v39  ;;  %v418_v49 = vmul.f32 %v4252_v6, %v3940_v40  ;;  %v393_v50 = vmul.f32 %v4252_v6, %v3891_v41 }
  0x6a   : > { %484 = vst [vmem:[#allocation3 + $0x188] sm:$0xff] %v451_v33  ;;  %v4310_v51 = vadd.f32 %v4257_v7, %v410_v45  ;;  %v394_v53 = vmul.f32 %v4252_v6, %v3892_v42  ;;  %v3927_v62 = vunpack.c.l.bf16 %v4041_v57  ;;  %v3928_v63 = vunpack.c.h.bf16 %v4041_v57  ;;  %v3832_v42 = vld [vmem:[%s4967_s3 + $0x78] sm:$0xff]  ;;  %v3831_v57 = vld [vmem:[%s4967_s3 + $0x70] sm:$0xff] }
  0x6b   : > { %4072 = vmatpush.bf16.msra.mxu1 %v3821_v31  ;;  %4073 = vmatpush.bf16.msra.mxu2 %v3821_v31  ;;  %485 = vst [vmem:[#allocation3 + $0x190] sm:$0xff] %v452_v34  ;;  %v453_v52 = vadd.f32 %v4257_v7, %v417_v46  ;;  %v454_v54 = vadd.f32 %v4257_v7, %v418_v49  ;;  %v3943_v13 = vunpack.c.l.bf16 %v4045_v9  ;;  %v3944_v14 = vunpack.c.h.bf16 %v4045_v9  ;;  %v3840_v34 = vld [vmem:[%s4967_s3 + $0xb8] sm:$0xff]  ;;  %v3839_v46 = vld [vmem:[%s4967_s3 + $0xb0] sm:$0xff] }
  0x6c   : > { %4074 = vmatpush.bf16.msra.mxu3 %v3821_v31  ;;  %609 = vmatpush.bf16.msra.mxu0 %v3821_v31  ;;  %470 = vst [vmem:[#allocation3 + $0xa8] sm:$0xff] %v4293_v43  ;;  %v4318_v55 = vadd.f32 %v4257_v7, %v393_v50  ;;  %v4327_v59 = vadd.f32 %v4257_v7, %v394_v53  ;;  %v3895_v15 = vunpack.c.l.bf16 %v4033_v10  ;;  %v3896_v16 = vunpack.c.h.bf16 %v4033_v10  ;;  %v495_v31 = vld [vmem:[#allocation3 + $0xf] sm:$0xff]  ;;  %v3856_v45 = vld [vmem:[%s4967_s3 + $0x138] sm:$0xff] }
  0x6d   : > { %471 = vst [vmem:[#allocation3 + $0xb0] sm:$0xff] %v4296_v44  ;;  %v403_v0 = vmul.f32 %v4252_v6, %v3911_v60  ;;  %v404_v1 = vmul.f32 %v4252_v6, %v3912_v61  ;;  %v411_v2 = vmul.f32 %v4252_v6, %v3927_v62  ;;  %v412_v3 = vmul.f32 %v4252_v6, %v3928_v63  ;;  %v502_v20 = vld [vmem:[#allocation3 + $0x87] sm:$0xff]  ;;  %v4038_v49 = vld [vmem:[%s4155_s27 + $0x30] sm:$0xff]  }
  0x6e   : > { %478 = vst [vmem:[#allocation3 + $0x128] sm:$0xff] %v4304_v48  ;;  %v419_v22 = vmul.f32 %v4252_v6, %v3943_v13  ;;  %v420_v23 = vmul.f32 %v4252_v6, %v3944_v14  ;;  %v503_v24 = vld [vmem:[#allocation3 + $0x8f] sm:$0xff]  ;;  %v395_v27 = vmul.f32 %v4252_v6, %v3895_v15  ;;  %v396_v28 = vmul.f32 %v4252_v6, %v3896_v16 }
  0x6f   : > { %4075 = vmatpush.bf16.msra.mxu1 %v3820_v47  ;;  %4076 = vmatpush.bf16.msra.mxu2 %v3820_v47  ;;  %479 = vst [vmem:[#allocation3 + $0x130] sm:$0xff] %v4310_v51  ;;  %v4339_v5 = vadd.f32 %v4257_v7, %v403_v0  ;;  %v4342_v8 = vadd.f32 %v4257_v7, %v404_v1  ;;  %v510_v25 = vld [vmem:[#allocation3 + $0x107] sm:$0xff]  ;;  %v4042_v50 = vld [vmem:[%s4155_s27 + $0x50] sm:$0xff]   ;;  %v3916_v53 = vunpack.c.h.bf16 %v4038_v49 }
  0x70   : > { %4077 = vmatpush.bf16.msra.mxu3 %v3820_v47  ;;  %610 = vmatpush.bf16.msra.mxu0 %v3820_v47  ;;  %486 = vst [vmem:[#allocation3 + $0x1a8] sm:$0xff] %v453_v52  ;;  %v4347_v11 = vadd.f32 %v4257_v7, %v411_v2  ;;  %v4350_v12 = vadd.f32 %v4257_v7, %v412_v3  ;;  %v511_v26 = vld [vmem:[#allocation3 + $0x10f] sm:$0xff]  ;;  %v3915_v52 = vunpack.c.l.bf16 %v4038_v49  ;;  %v3932_v56 = vunpack.c.h.bf16 %v4042_v50 }
  0x71   : > { %487 = vst [vmem:[#allocation3 + $0x1b0] sm:$0xff] %v454_v54  ;;  %v518_v29 = vld [vmem:[#allocation3 + $0x187] sm:$0xff]  ;;  %v455_v32 = vadd.f32 %v4257_v7, %v419_v22  ;;  %v456_v33 = vadd.f32 %v4257_v7, %v420_v23  ;;  %v4372_v36 = vadd.f32 %v4257_v7, %v395_v27  ;;  %v4375_v37 = vadd.f32 %v4257_v7, %v396_v28  ;;  %v3847_v47 = vld [vmem:[%s4967_s3 + $0xf0] sm:$0xff] }
  0x72   : > { %462 = vst [vmem:[#allocation3 + $0x28] sm:$0xff] %v4318_v55  ;;  %v519_v30 = vld [vmem:[#allocation3 + $0x18f] sm:$0xff]  ;;  %v4377_v38 = vpack.c.bf16 %v503_v24, %v502_v20  ;;  %v534_v39 = vpack.c.bf16 %v511_v26, %v510_v25  ;;  %v526_v41 = vpack.c.bf16 %v495_v31, %v494_v21  ;;  %v3931_v54 = vunpack.c.l.bf16 %v4042_v50  ;;  %v3837_v21 = vld [vmem:[%s4967_s3 + $0xa0] sm:$0xff] }
  0x73   : > { %4078 = vmatpush.bf16.msra.mxu1 %v3819_v58  ;;  %4079 = vmatpush.bf16.msra.mxu2 %v3819_v58  ;;  %463 = vst [vmem:[#allocation3 + $0x30] sm:$0xff] %v4327_v59  ;;  %v538_v40 = vpack.c.bf16 %v519_v30, %v518_v29  ;;  %v3838_v60 = vld [vmem:[%s4967_s3 + $0xa8] sm:$0xff]  ;;  %v405_v62 = vmul.f32 %v4252_v6, %v3915_v52  ;;  %v4046_v2 = vld [vmem:[%s4155_s27 + $0x70] sm:$0xff]   ;;  %v3845_v22 = vld [vmem:[%s4967_s3 + $0xe0] sm:$0xff] }
  0x74   : > { %4080 = vmatpush.bf16.msra.mxu3 %v3819_v58  ;;  %611 = vmatpush.bf16.msra.mxu0 %v3819_v58  ;;  %472 = vst [vmem:[#allocation3 + $0xc8] sm:$0xff] %v4339_v5  ;;  %v3855_v58 = vld [vmem:[%s4967_s3 + $0x130] sm:$0xff]  ;;  %v3846_v61 = vld [vmem:[%s4967_s3 + $0xe8] sm:$0xff]  ;;  %v406_v63 = vmul.f32 %v4252_v6, %v3916_v53  ;;  %v413_v0 = vmul.f32 %v4252_v6, %v3931_v54  ;;  %v3947_v16 = vunpack.c.l.bf16 %v4046_v2  ;;  %v3829_v27 = vld [vmem:[%s4967_s3 + $0x60] sm:$0xff] }
  0x75   : > { %473 = vst [vmem:[#allocation3 + $0xd0] sm:$0xff] %v4342_v8  ;;  %v414_v1 = vmul.f32 %v4252_v6, %v3932_v56  ;;  %v4414_v3 = vadd.f32 %v4257_v7, %v405_v62  ;;  %v4034_v10 = vld [vmem:[%s4155_s27 + $0x10] sm:$0xff]   ;;  %v3830_v13 = vld [vmem:[%s4967_s3 + $0x68] sm:$0xff]  ;;  %v3828_v54 = vld [vmem:[%s4967_s3 + $0x58] sm:$0xff] }
  0x76   : > { %480 = vst [vmem:[#allocation3 + $0x148] sm:$0xff] %v4347_v11  ;;  %v4420_v9 = vadd.f32 %v4257_v7, %v413_v0  ;;  %v3854_v14 = vld [vmem:[%s4967_s3 + $0x128] sm:$0xff]  ;;  %v3899_v20 = vunpack.c.l.bf16 %v4034_v10  ;;  %v3900_v23 = vunpack.c.h.bf16 %v4034_v10  ;;  %v421_v28 = vmul.f32 %v4252_v6, %v3947_v16  ;;  %v3835_v56 = vld [vmem:[%s4967_s3 + $0x90] sm:$0xff]  ;;  %v3841_v10 = vld [vmem:[%s4967_s3 + $0xc0] sm:$0xff] }
  0x77   : > { %4081 = vmatpush.bf16.msra.mxu1 %v3818_v4  ;;  %4082 = vmatpush.bf16.msra.mxu2 %v3818_v4  ;;  %481 = vst [vmem:[#allocation3 + $0x150] sm:$0xff] %v4350_v12  ;;  %v4430_v15 = vadd.f32 %v4257_v7, %v414_v1  ;;  %v504_v24 = vld [vmem:[#allocation3 + $0xa7] sm:$0xff]  ;;  %v505_v25 = vld [vmem:[#allocation3 + $0xaf] sm:$0xff] }
  0x78   : > { %4083 = vmatpush.bf16.msra.mxu3 %v3818_v4  ;;  %612 = vmatpush.bf16.msra.mxu0 %v3818_v4  ;;  %488 = vst [vmem:[#allocation3 + $0x1c8] sm:$0xff] %v455_v32  ;;  %v4417_v4 = vadd.f32 %v4257_v7, %v406_v63  ;;  %v512_v26 = vld [vmem:[#allocation3 + $0x127] sm:$0xff]  ;;  %v397_v30 = vmul.f32 %v4252_v6, %v3899_v20  ;;  %v513_v31 = vld [vmem:[#allocation3 + $0x12f] sm:$0xff] }
  0x79   : > { %489 = vst [vmem:[#allocation3 + $0x1d0] sm:$0xff] %v456_v33  ;;  %v520_v32 = vld [vmem:[#allocation3 + $0x1a7] sm:$0xff]  ;;  %v521_v33 = vld [vmem:[#allocation3 + $0x1af] sm:$0xff]  ;;  %v4466_v49 = vpack.c.bf16 %v505_v25, %v504_v24  ;;  %v4468_v50 = vpack.c.bf16 %v513_v31, %v512_v26  ;;  %v3880_v31 = vld [vmem:[%s4967_s3 + $0x1f8] sm:$0xff] }
  0x7a   : > { %464 = vst [vmem:[#allocation3 + $0x48] sm:$0xff] %v4372_v36  ;;  %v539_v52 = vpack.c.bf16 %v521_v33, %v520_v32  ;;  %v3842_v62 = vld [vmem:[%s4967_s3 + $0xc8] sm:$0xff]  ;;  %v3849_v24 = vld [vmem:[%s4967_s3 + $0x100] sm:$0xff]  ;;  %v3864_v32 = vld [vmem:[%s4967_s3 + $0x178] sm:$0xff] }
  0x7b   : > { %4084 = vmatpush.bf16.msra.mxu1 %v3817_v19  ;;  %4085 = vmatpush.bf16.msra.mxu2 %v3817_v19  ;;  %465 = vst [vmem:[#allocation3 + $0x50] sm:$0xff] %v4375_v37  ;;  %v3826_v63 = vld [vmem:[%s4967_s3 + $0x48] sm:$0xff]  ;;  %v3888_v33 = vld [vmem:[%s4967_s3 + $0x238] sm:$0xff] }
  0x7c   : > { %4086 = vmatpush.bf16.msra.mxu3 %v3817_v19  ;;  %613 = vmatpush.bf16.msra.mxu0 %v3817_v19  ;;  %v3948_v19 = vunpack.c.h.bf16 %v4046_v2  ;;  %474 = vst [vmem:[#allocation3 + $0xe8] sm:$0xff] %v4414_v3  ;;  %v3850_v0 = vld [vmem:[%s4967_s3 + $0x108] sm:$0xff]  ;;  %v3833_v2 = vld [vmem:[%s4967_s3 + $0x80] sm:$0xff] }
  0x7d   : > { %475 = vst [vmem:[#allocation3 + $0xf0] sm:$0xff] %v4417_v4  ;;  %v506_v1 = vld [vmem:[#allocation3 + $0xc7] sm:$0xff] }
  0x7e   : > { %634 = vmatmul.bf16.vlgmr.msra.gmra.mxu1 %v4377_v38  ;;  %654 = vmatmul.bf16.vlgmr.msra.gmra.mxu2 %v534_v39  ;;  %v422_v29 = vmul.f32 %v4252_v6, %v3948_v19  ;;  %482 = vst [vmem:[#allocation3 + $0x168] sm:$0xff] %v4420_v9  ;;  %v497_v39 = vld [vmem:[#allocation3 + $0x2f] sm:$0xff] }
  0x7f   : > { %1138 = vmatpush.bf16.msrb.mxu2 %v3840_v34  ;;  %674 = vmatmul.bf16.vlgmr.msra.gmra.mxu3 %v538_v40  ;;  %v398_v34 = vmul.f32 %v4252_v6, %v3900_v23  ;;  %v3853_v40 = vld [vmem:[%s4967_s3 + $0x120] sm:$0xff]  ;;  %483 = vst [vmem:[#allocation3 + $0x170] sm:$0xff] %v4430_v15  ;;  %v3836_v6 = vld [vmem:[%s4967_s3 + $0x98] sm:$0xff]  ;;  %v515_v16 = vld [vmem:[#allocation3 + $0x14f] sm:$0xff] }
  0x80   : > { %1436 = vmatpush.bf16.msrb.mxu3 %v3848_v35  ;;  %614 = vmatmul.bf16.vlgmr.msra.gmra.mxu0 %v526_v41  ;;  %v496_v35 = vld [vmem:[#allocation3 + $0x27] sm:$0xff]  ;;  %v457_v41 = vadd.f32 %v4257_v7, %v421_v28  ;;  %v523_v20 = vld [vmem:[#allocation3 + $0x1cf] sm:$0xff] }
  0x81   : > { %840 = vmatpush.bf16.msrb.mxu1 %v3832_v42  ;;  %1734 = vmatpush.bf16.msrb.mxu0 %v3856_v45  ;;  %v458_v42 = vadd.f32 %v4257_v7, %v422_v29  ;;  %v4455_v45 = vadd.f32 %v4257_v7, %v397_v30  ;;  %v4470_v53 = vpack.c.bf16 %v497_v39, %v496_v35  ;;  %v522_v19 = vld [vmem:[#allocation3 + $0x1c7] sm:$0xff]  ;;  %v3872_v29 = vld [vmem:[%s4967_s3 + $0x1b8] sm:$0xff] }
  0x82   : > { %490 = vst [vmem:[#allocation3 + $0x1e8] sm:$0xff] %v457_v41  ;;  %v3825_v23 = vld [vmem:[%s4967_s3 + $0x40] sm:$0xff]  ;;  %v1653_v30 = vpack.c.bf16 %v4327_v59, %v4318_v55 }
  0x83   : > { %1139 = vmatpush.bf16.msrb.mxu2 %v3839_v46  ;;  %v3844_v46 = vld [vmem:[%s4967_s3 + $0xd8] sm:$0xff]  ;;  %491 = vst [vmem:[#allocation3 + $0x1f0] sm:$0xff] %v458_v42 }
  0x84   : > { %1437 = vmatpush.bf16.msrb.mxu3 %v3847_v47  ;;  %v4464_v47 = vadd.f32 %v4257_v7, %v398_v34  ;;  %v3852_v7 = vld [vmem:[%s4967_s3 + $0x118] sm:$0xff]  ;;  %466 = vst [vmem:[#allocation3 + $0x68] sm:$0xff] %v4455_v45  ;;  %v508_v34 = vld [vmem:[#allocation3 + $0xe7] sm:$0xff]  ;;  %v509_v35 = vld [vmem:[#allocation3 + $0xef] sm:$0xff] }
  0x85   : > { %841 = vmatpush.bf16.msrb.mxu1 %v3831_v57  ;;  %1735 = vmatpush.bf16.msrb.mxu0 %v3855_v58  ;;  %v3843_v57 = vld [vmem:[%s4967_s3 + $0xd0] sm:$0xff]  ;;  %v516_v39 = vld [vmem:[#allocation3 + $0x167] sm:$0xff] }
  0x86   : > { %467 = vst [vmem:[#allocation3 + $0x70] sm:$0xff] %v4464_v47  ;;  %v3827_v58 = vld [vmem:[%s4967_s3 + $0x50] sm:$0xff] }
  0x87   : > { %1140 = vmatpush.bf16.msrb.mxu2 %v3838_v60  ;;  %v3851_v60 = vld [vmem:[%s4967_s3 + $0x110] sm:$0xff] }
  0x88   : > { %1438 = vmatpush.bf16.msrb.mxu3 %v3846_v61  ;;  %v3834_v61 = vld [vmem:[%s4967_s3 + $0x88] sm:$0xff] }
  0x89   : > { %842 = vmatpush.bf16.msrb.mxu1 %v3830_v13  ;;  %1736 = vmatpush.bf16.msrb.mxu0 %v3854_v14  ;;  %v507_v13 = vld [vmem:[#allocation3 + $0xcf] sm:$0xff]  ;;  %v514_v14 = vld [vmem:[#allocation3 + $0x147] sm:$0xff] }
  0x8a   : > { %v4519_v25 = vpack.c.bf16 %v507_v13, %v506_v1  ;;  %v4521_v26 = vpack.c.bf16 %v515_v16, %v514_v14  ;;  %v517_v55 = vld [vmem:[#allocation3 + $0x16f] sm:$0xff]  ;;  %v524_v59 = vld [vmem:[#allocation3 + $0x1e7] sm:$0xff] }
  0x8b   : > { %1141 = vmatpush.bf16.msrb.mxu2 %v3837_v21  ;;  %v498_v21 = vld [vmem:[#allocation3 + $0x47] sm:$0xff] }
  0x8c   : > { %1439 = vmatpush.bf16.msrb.mxu3 %v3845_v22  ;;  %v499_v22 = vld [vmem:[#allocation3 + $0x4f] sm:$0xff]  ;;  %v500_v41 = vld [vmem:[#allocation3 + $0x67] sm:$0xff] }
  0x8d   : > { %843 = vmatpush.bf16.msrb.mxu1 %v3829_v27  ;;  %1737 = vmatpush.bf16.msrb.mxu0 %v3853_v40  ;;  %v540_v27 = vpack.c.bf16 %v523_v20, %v522_v19  ;;  %v528_v28 = vpack.c.bf16 %v499_v22, %v498_v21  ;;  %v525_v40 = vld [vmem:[#allocation3 + $0x1ef] sm:$0xff] }
  0x8e   : > { %639 = vmatmul.bf16.gmra.mxu1 %v4466_v49  ;;  %659 = vmatmul.bf16.gmra.mxu2 %v4468_v50  ;;  %v501_v42 = vld [vmem:[#allocation3 + $0x6f] sm:$0xff] }
  0x8f   : > { %1142 = vmatpush.bf16.msrb.mxu2 %v3836_v6  ;;  %679 = vmatmul.bf16.gmra.mxu3 %v539_v52  ;;  %v4539_v6 = vpack.c.bf16 %v509_v35, %v508_v34  ;;  %v541_v52 = vpack.c.bf16 %v525_v40, %v524_v59  ;;  %v1027_v1 = vld [vmem:[#allocation3 + $0x29] sm:$0xff]  ;;  %v1032_v22 = vld [vmem:[#allocation3 + $0x71] sm:$0xff]  ;;  %v3885_v34 = vld [vmem:[%s4967_s3 + $0x220] sm:$0xff] }
  0x90   : > { %1440 = vmatpush.bf16.msrb.mxu3 %v3844_v46  ;;  %619 = vmatmul.bf16.gmra.mxu0 %v4470_v53  ;;  %v4541_v46 = vpack.c.bf16 %v517_v55, %v516_v39  ;;  %v3870_v14 = vld [vmem:[%s4967_s3 + $0x1a8] sm:$0xff]  ;;  %v1036_v39 = vld [vmem:[#allocation3 + $0xb1] sm:$0xff] }
  0x91   : > { %844 = vmatpush.bf16.msrb.mxu1 %v3828_v54  ;;  %1738 = vmatpush.bf16.msrb.mxu0 %v3852_v7  ;;  %v529_v54 = vpack.c.bf16 %v501_v42, %v500_v41  ;;  %v1654_v7 = vpack.c.bf16 %v4375_v37, %v4372_v36  ;;  %v3879_v36 = vld [vmem:[%s4967_s3 + $0x1f0] sm:$0xff]  ;;  %v3878_v16 = vld [vmem:[%s4967_s3 + $0x1e8] sm:$0xff]  ;;  %v1658_v42 = vpack.c.bf16 %v4342_v8, %v4339_v5 }
  0x92   : > { %v3863_v37 = vld [vmem:[%s4967_s3 + $0x170] sm:$0xff]  ;;  %v3862_v19 = vld [vmem:[%s4967_s3 + $0x168] sm:$0xff] }
  0x93   : > { %1143 = vmatpush.bf16.msrb.mxu2 %v3835_v56  ;;  %v727_v56 = vld [vmem:[#allocation3 + $0x8] sm:$0xff] }
  0x94   : > { %1441 = vmatpush.bf16.msrb.mxu3 %v3843_v57  ;;  %v728_v57 = vld [vmem:[#allocation3 + $0x10] sm:$0xff]  ;;  %v3886_v20 = vld [vmem:[%s4967_s3 + $0x228] sm:$0xff] }
  0x95   : > { %845 = vmatpush.bf16.msrb.mxu1 %v3827_v58  ;;  %1739 = vmatpush.bf16.msrb.mxu0 %v3851_v60  ;;  %v1025_v58 = vld [vmem:[#allocation3 + $0x9] sm:$0xff]  ;;  %v1026_v60 = vld [vmem:[#allocation3 + $0x11] sm:$0xff] }
  0x96   : > { %v1031_v21 = vld [vmem:[#allocation3 + $0x69] sm:$0xff] }
  0x97   : > { %1144 = vmatpush.bf16.msrb.mxu2 %v3834_v61  ;;  %v759_v61 = vpack.c.bf16 %v728_v57, %v727_v56  ;;  %v1035_v35 = vld [vmem:[#allocation3 + $0xa9] sm:$0xff] }
  0x98   : > { %1442 = vmatpush.bf16.msrb.mxu3 %v3842_v62  ;;  %v1057_v62 = vpack.c.bf16 %v1026_v60, %v1025_v58  ;;  %v4620_v40 = vpack.c.bf16 %v1036_v39, %v1035_v35  ;;  %v1037_v58 = vld [vmem:[#allocation3 + $0xc9] sm:$0xff]  ;;  %v1038_v60 = vld [vmem:[#allocation3 + $0xd1] sm:$0xff] }
  0x99   : > { %846 = vmatpush.bf16.msrb.mxu1 %v3826_v63  ;;  %1740 = vmatpush.bf16.msrb.mxu0 %v3850_v0  ;;  %v3871_v63 = vld [vmem:[%s4967_s3 + $0x1b0] sm:$0xff]  ;;  %v1655_v0 = vpack.c.bf16 %v4464_v47, %v4455_v45  ;;  %v4642_v8 = vpack.c.bf16 %v1038_v60, %v1037_v58 }
  0x9a   : > { %v1029_v45 = vld [vmem:[#allocation3 + $0x49] sm:$0xff]  ;;  %v1030_v47 = vld [vmem:[#allocation3 + $0x51] sm:$0xff] }
  0x9b   : > { %1145 = vmatpush.bf16.msrb.mxu2 %v3833_v2  ;;  %v1028_v2 = vld [vmem:[#allocation3 + $0x31] sm:$0xff]  ;;  %v4565_v13 = vpack.c.bf16 %v1030_v47, %v1029_v45  ;;  %v1337_v47 = vld [vmem:[#allocation3 + $0x107] sm:$0xff] }
  0x9c   : > { %1443 = vmatpush.bf16.msrb.mxu3 %v3841_v10  ;;  %v4562_v10 = vpack.c.bf16 %v1028_v2, %v1027_v1  ;;  %v3884_v1 = vld [vmem:[%s4967_s3 + $0x218] sm:$0xff]  ;;  %v1039_v2 = vld [vmem:[#allocation3 + $0xe9] sm:$0xff] }
  0x9d   : > { %847 = vmatpush.bf16.msrb.mxu1 %v3825_v23  ;;  %1741 = vmatpush.bf16.msrb.mxu0 %v3849_v24  ;;  %v4580_v23 = vpack.c.bf16 %v1032_v22, %v1031_v21  ;;  %v1656_v24 = vpack.c.bf16 %v4270_v18, %v4267_v17  ;;  %v3869_v17 = vld [vmem:[%s4967_s3 + $0x1a0] sm:$0xff]  ;;  %v1040_v45 = vld [vmem:[#allocation3 + $0xf1] sm:$0xff]  ;;  %v1041_v35 = vld [vmem:[#allocation3 + $0x109] sm:$0xff] }
  0x9e   : > { %644 = vmatmul.bf16.gmra.mxu1 %v4519_v25  ;;  %664 = vmatmul.bf16.gmra.mxu2 %v4521_v26  ;;  %v3877_v18 = vld [vmem:[%s4967_s3 + $0x1e0] sm:$0xff]  ;;  %v4676_v22 = vpack.c.bf16 %v1040_v45, %v1039_v2  ;;  %v1042_v39 = vld [vmem:[#allocation3 + $0x111] sm:$0xff] }
  0x9f   : > { %684 = vmatmul.bf16.gmra.mxu3 %v540_v27  ;;  %2331 = vmatpush.bf16.msra.mxu2 %v3872_v29  ;;  %v1033_v27 = vld [vmem:[#allocation3 + $0x89] sm:$0xff]  ;;  %v4695_v60 = vpack.c.bf16 %v1042_v39, %v1041_v35  ;;  %v1044_v35 = vld [vmem:[#allocation3 + $0x131] sm:$0xff] }
  0xa0   : > { %624 = vmatmul.bf16.gmra.mxu0 %v528_v28  ;;  %2629 = vmatpush.bf16.msra.mxu3 %v3880_v31  ;;  %v1657_v31 = vpack.c.bf16 %v4296_v44, %v4293_v43  ;;  %v3861_v44 = vld [vmem:[%s4967_s3 + $0x160] sm:$0xff]  ;;  %v3875_v2 = vld [vmem:[%s4967_s3 + $0x1d0] sm:$0xff] }
  0xa1   : > { %2032 = vmatpush.bf16.msra.mxu1 %v3864_v32  ;;  %2927 = vmatpush.bf16.msra.mxu0 %v3888_v33 }
  0xa3   : > { %2332 = vmatpush.bf16.msra.mxu2 %v3871_v63 }
  0xa4   : > { %2630 = vmatpush.bf16.msra.mxu3 %v3879_v36  ;;  %v3876_v36 = vld [vmem:[%s4967_s3 + $0x1d8] sm:$0xff] }
  0xa5   : > { %2033 = vmatpush.bf16.msra.mxu1 %v3863_v37 }
  0xa7   : > { %2333 = vmatpush.bf16.msra.mxu2 %v3870_v14  ;;  %v1338_v14 = vld [vmem:[#allocation3 + $0x10f] sm:$0xff] }
  0xa8   : > { %2631 = vmatpush.bf16.msra.mxu3 %v3878_v16  ;;  %v1635_v16 = vld [vmem:[#allocation3 + $0x108] sm:$0xff] }
  0xa9   : > { %2034 = vmatpush.bf16.msra.mxu1 %v3862_v19  ;;  %v1636_v19 = vld [vmem:[#allocation3 + $0x110] sm:$0xff] }
  0xab   : > { %2334 = vmatpush.bf16.msra.mxu2 %v3869_v17 }
  0xac   : > { %2632 = vmatpush.bf16.msra.mxu3 %v3877_v18 }
  0xad   : > { %2035 = vmatpush.bf16.msra.mxu1 %v3861_v44 }
  0xae   : > { %649 = vmatmul.bf16.gmra.mxu1 %v4539_v6  ;;  %669 = vmatmul.bf16.gmra.mxu2 %v4541_v46 }
  0xaf   : > { %689 = vmatmul.bf16.gmra.mxu3 %v541_v52 }
  0xb0   : > { %629 = vmatmul.bf16.gmra.mxu0 %v529_v54  ;;  %2633 = vmatpush.bf16.msra.mxu3 %v3876_v36 }
  0xb4   : > { %2634 = vmatpush.bf16.msra.mxu3 %v3875_v2  ;;  %v1662_v2 = vpack.c.bf16 %v4350_v12, %v4347_v11 }
  0xbe   : > { %848 = vmatmul.bf16.vlgmr.msrb.gmra.mxu1 %v759_v61  ;;  %1146 = vmatmul.bf16.vlgmr.msrb.gmra.mxu2 %v1057_v62 }
  0xbf   : > { %1444 = vmatmul.bf16.vlgmr.msrb.gmra.mxu3 %v4470_v53  ;;  %v3887_v53 = vld [vmem:[%s4967_s3 + $0x230] sm:$0xff] }
  0xc0   : > { %1742 = vmatmul.bf16.vlgmr.msrb.gmra.mxu0 %v1653_v30 }
  0xc1   : > { %2928 = vmatpush.bf16.msra.mxu0 %v3887_v53 }
  0xc5   : > { %2929 = vmatpush.bf16.msra.mxu0 %v3886_v20 }
  0xc9   : > { %2930 = vmatpush.bf16.msra.mxu0 %v3885_v34 }
  0xcd   : > { %2931 = vmatpush.bf16.msra.mxu0 %v3884_v1  ;;  %v3867_v1 = vld [vmem:[%s4967_s3 + $0x190] sm:$0xff] }
  0xce   : > { %853 = vmatmul.bf16.gmra.mxu1 %v1653_v30  ;;  %1151 = vmatmul.bf16.gmra.mxu2 %v4562_v10 }
  0xcf   : > { %1449 = vmatmul.bf16.gmra.mxu3 %v528_v28  ;;  %v1034_v28 = vld [vmem:[#allocation3 + $0x91] sm:$0xff] }
  0xd0   : > { %1747 = vmatmul.bf16.gmra.mxu0 %v1654_v7  ;;  %v4586_v29 = vpack.c.bf16 %v1034_v28, %v1033_v27  ;;  %v1362_v27 = vpack.c.bf16 %v1338_v14, %v1337_v47  ;;  %v1660_v28 = vpack.c.bf16 %v1636_v19, %v1635_v16  ;;  %v3883_v19 = vld [vmem:[%s4967_s3 + $0x210] sm:$0xff] }
  0xd1   : > { %2932 = vmatpush.bf16.msra.mxu0 %v3883_v19 }
  0xde   : > { %858 = vmatmul.bf16.gmra.mxu1 %v1654_v7  ;;  %1156 = vmatmul.bf16.gmra.mxu2 %v4565_v13 }
  0xdf   : > { %1454 = vmatmul.bf16.gmra.mxu3 %v529_v54 }
  0xe0   : > { %1752 = vmatmul.bf16.gmra.mxu0 %v1655_v0 }
  0xee   : > { %863 = vmatmul.bf16.gmra.mxu1 %v1655_v0  ;;  %1161 = vmatmul.bf16.gmra.mxu2 %v4580_v23  ;;  %v3868_v0 = vld [vmem:[%s4967_s3 + $0x198] sm:$0xff] }
  0xef   : > { %1459 = vmatmul.bf16.gmra.mxu3 %v4377_v38  ;;  %2335 = vmatpush.bf16.msra.mxu2 %v3868_v0  ;;  %v1661_v0 = vpack.c.bf16 %v4310_v51, %v4304_v48 }
  0xf0   : > { %1757 = vmatmul.bf16.gmra.mxu0 %v1656_v24 }
  0xf3   : > { %2336 = vmatpush.bf16.msra.mxu2 %v3867_v1 }
  0xfb   : > { %v4588_v30 = vpop.f32.mrf.mxu1 }
  0xfd   : > { %v4592_v32 = vpop.f32.mrf.mxu0 }
  0xfe   : > { %868 = vmatmul.bf16.gmra.mxu1 %v1656_v24  ;;  %1166 = vmatmul.bf16.gmra.mxu2 %v4586_v29 }
  0xff   : > { %1464 = vmatmul.bf16.gmra.mxu3 %v4466_v49 }
 0x100   : > { %1762 = vmatmul.bf16.gmra.mxu0 %v1657_v31 }
 0x101   : > { %v4602_v38 = vpop.f32.mrf.mxu2 }
 0x102   : > { %v4604_v43 = vpop.f32.mrf.mxu3 }
 0x103   : > { %v4609_v49 = vpop.f32.mrf.mxu1 }
 0x105   : > { %v4611_v33 = vpop.f32.mrf.mxu0 }
 0x109   : > { %v4616_v55 = vpop.f32.mrf.mxu2 }
 0x10a   : > { %v4618_v59 = vpop.f32.mrf.mxu3 }
 0x10b   : > { %v4622_v41 = vpop.f32.mrf.mxu1 }
 0x10d   : > { %v4626_v52 = vpop.f32.mrf.mxu0 }
 0x10e   : > { %873 = vmatmul.bf16.gmra.mxu1 %v1657_v31  ;;  %1171 = vmatmul.bf16.gmra.mxu2 %v4620_v40 }
 0x10f   : > { %1469 = vmatmul.bf16.gmra.mxu3 %v4519_v25  ;;  %v1659_v25 = vpack.c.bf16 %v4417_v4, %v4414_v3 }
 0x110   : > { %1767 = vmatmul.bf16.gmra.mxu0 %v1658_v42 }
 0x111   : > { %v4630_v54 = vpop.f32.mrf.mxu2 }
 0x112   : > { %v4632_v7 = vpop.f32.mrf.mxu3 }
 0x113   : > { %v4634_v56 = vpop.f32.mrf.mxu1 }
 0x115   : > { %v4636_v57 = vpop.f32.mrf.mxu0 }
 0x119   : > { %v4638_v61 = vpop.f32.mrf.mxu2 }
 0x11a   : > { %v4640_v5 = vpop.f32.mrf.mxu3 }
 0x11b   : > { %v4644_v62 = vpop.f32.mrf.mxu1 }
 0x11d   : > { %v4648_v63 = vpop.f32.mrf.mxu0 }
 0x11e   : > { %878 = vmatmul.bf16.gmra.mxu1 %v1658_v42  ;;  %1176 = vmatmul.bf16.gmra.mxu2 %v4642_v8 }
 0x11f   : > { %1474 = vmatmul.bf16.gmra.mxu3 %v4539_v6  ;;  %v3860_v6 = vld [vmem:[%s4967_s3 + $0x158] sm:$0xff] }
 0x120   : > { %1772 = vmatmul.bf16.gmra.mxu0 %v1659_v25  ;;  %2036 = vmatpush.bf16.msra.mxu1 %v3860_v6 }
 0x121   : > { %v4658_v37 = vpop.f32.mrf.mxu2 }
 0x122   : > { %v4660_v3 = vpop.f32.mrf.mxu3 }
 0x123   : > { %v4662_v4 = vpop.f32.mrf.mxu1 }
 0x125   : > { %v4664_v53 = vpop.f32.mrf.mxu0 }
 0x129   : > { %v4672_v20 = vpop.f32.mrf.mxu2 }
 0x12a   : > { %v4674_v21 = vpop.f32.mrf.mxu3 }
 0x12b   : > { %v4678_v24 = vpop.f32.mrf.mxu1 }
 0x12d   : > { %v4680_v31 = vpop.f32.mrf.mxu0 }
 0x12e   : > { %883 = vmatmul.bf16.gmra.mxu1 %v1659_v25  ;;  %1181 = vmatmul.bf16.gmra.mxu2 %v4676_v22 }
 0x12f   : > { %1479 = vmatmul.bf16.gmra.mxu3 %v1362_v27 }
 0x130   : > { %1777 = vmatmul.bf16.gmra.mxu0 %v1660_v28 }
 0x131   : > { %v4683_v17 = vpop.f32.mrf.mxu2 }
 0x132   : > { %v4685_v18 = vpop.f32.mrf.mxu3 }
 0x133   : > { %v4687_v44 = vpop.f32.mrf.mxu1 }
 0x135   : > { %v4689_v34 = vpop.f32.mrf.mxu0 }
 0x139   : > { %v4691_v42 = vpop.f32.mrf.mxu2 }
 0x13a   : > { %v4693_v58 = vpop.f32.mrf.mxu3 }
 0x13b   : > { %v849_v25 = vpop.f32.mrf.mxu1 }
 0x13c   : > { %v961_v36 = vadd.f32 %v849_v25, %v4592_v32 }
 0x13d   : > { %v1743_v6 = vpop.f32.mrf.mxu0 }
 0x13e   : > { %888 = vmatmul.bf16.gmra.mxu1 %v1660_v28  ;;  %1186 = vmatmul.bf16.gmra.mxu2 %v4695_v60  ;;  %v1043_v28 = vld [vmem:[#allocation3 + $0x129] sm:$0xff] }
 0x13f   : > { %1484 = vmatmul.bf16.gmra.mxu3 %v4468_v50  ;;  %v3859_v50 = vld [vmem:[%s4967_s3 + $0x150] sm:$0xff]  ;;  %v4717_v1 = vpack.c.bf16 %v1044_v35, %v1043_v28 }
 0x140   : > { %1782 = vmatmul.bf16.gmra.mxu0 %v1661_v0  ;;  %2037 = vmatpush.bf16.msra.mxu1 %v3859_v50  ;;  %v1046_v35 = vld [vmem:[#allocation3 + $0x151] sm:$0xff] }
 0x141   : > { %v1147_v45 = vpop.f32.mrf.mxu2 }
 0x142   : > { %v1259_v48 = vadd.f32 %v1147_v45, %v961_v36  ;;  %v1445_v51 = vpop.f32.mrf.mxu3 }
 0x143   : > { %v851_v32 = vpop.f32.mrf.mxu1 }
 0x144   : > { %v1557_v47 = vadd.f32 %v1445_v51, %v1259_v48  ;;  %v962_v14 = vadd.f32 %v851_v32, %v4611_v33 }
 0x145   : > { %v1745_v16 = vpop.f32.mrf.mxu0 }
 0x146   : > { %v4715_v27 = vadd.f32 %v1743_v6, %v1557_v47 }
 0x149   : > { %v1149_v39 = vpop.f32.mrf.mxu2 }
 0x14a   : > { %v1260_v25 = vadd.f32 %v1149_v39, %v962_v14  ;;  %v1447_v36 = vpop.f32.mrf.mxu3 }
 0x14b   : > { %v854_v33 = vpop.f32.mrf.mxu1 }
 0x14c   : > { %v1558_v45 = vadd.f32 %v1447_v36, %v1260_v25  ;;  %v963_v48 = vadd.f32 %v854_v33, %v4626_v52  ;;  %v1045_v52 = vld [vmem:[#allocation3 + $0x149] sm:$0xff] }
 0x14d   : > { %v1748_v51 = vpop.f32.mrf.mxu0 }
 0x14e   : > { %893 = vmatmul.bf16.gmra.mxu1 %v1661_v0  ;;  %1191 = vmatmul.bf16.gmra.mxu2 %v4717_v1  ;;  %v4723_v6 = vadd.f32 %v1745_v16, %v1558_v45  ;;  %v4729_v16 = vpack.c.bf16 %v1046_v35, %v1045_v52  ;;  %v1048_v52 = vld [vmem:[#allocation3 + $0x171] sm:$0xff]  ;;  %v1345_v35 = vld [vmem:[#allocation3 + $0x187] sm:$0xff] }
 0x14f   : > { %1489 = vmatmul.bf16.gmra.mxu3 %v4521_v26  ;;  %v1663_v26 = vpack.c.bf16 %v4430_v15, %v4420_v9  ;;  %v3874_v9 = vld [vmem:[%s4967_s3 + $0x1c8] sm:$0xff] }
 0x150   : > { %1787 = vmatmul.bf16.gmra.mxu0 %v1662_v2  ;;  %2635 = vmatpush.bf16.msra.mxu3 %v3874_v9 }
 0x151   : > { %v1152_v32 = vpop.f32.mrf.mxu2 }
 0x152   : > { %v1261_v47 = vadd.f32 %v1152_v32, %v963_v48  ;;  %v1450_v14 = vpop.f32.mrf.mxu3 }
 0x153   : > { %v856_v50 = vpop.f32.mrf.mxu1 }
 0x154   : > { %v1559_v19 = vadd.f32 %v1450_v14, %v1261_v47  ;;  %v964_v28 = vadd.f32 %v856_v50, %v4636_v57 }
 0x155   : > { %v1750_v11 = vpop.f32.mrf.mxu0 }
 0x156   : > { %v4727_v12 = vadd.f32 %v1748_v51, %v1559_v19  ;;  %v3866_v51 = vld [vmem:[%s4967_s3 + $0x188] sm:$0xff] }
 0x157   : > { %2337 = vmatpush.bf16.msra.mxu2 %v3866_v51  ;;  %v3882_v19 = vld [vmem:[%s4967_s3 + $0x208] sm:$0xff] }
 0x158   : > { %2933 = vmatpush.bf16.msra.mxu0 %v3882_v19 }
 0x159   : > { %v1154_v0 = vpop.f32.mrf.mxu2 }
 0x15a   : > { %v1262_v39 = vadd.f32 %v1154_v0, %v964_v28  ;;  %v1452_v25 = vpop.f32.mrf.mxu3  ;;  %v1346_v0 = vld [vmem:[#allocation3 + $0x18f] sm:$0xff] }
 0x15b   : > { %v859_v36 = vpop.f32.mrf.mxu1  ;;  %v4755_v9 = vpack.c.bf16 %v1346_v0, %v1345_v35 }
 0x15c   : > { %v1560_v33 = vadd.f32 %v1452_v25, %v1262_v39  ;;  %v965_v45 = vadd.f32 %v859_v36, %v4648_v63  ;;  %v1643_v39 = vld [vmem:[#allocation3 + $0x188] sm:$0xff]  ;;  %v1644_v25 = vld [vmem:[#allocation3 + $0x190] sm:$0xff] }
 0x15d   : > { %v1753_v48 = vpop.f32.mrf.mxu0 }
 0x15e   : > { %898 = vmatmul.bf16.gmra.mxu1 %v1662_v2  ;;  %1196 = vmatmul.bf16.gmra.mxu2 %v4729_v16  ;;  %v4735_v57 = vadd.f32 %v1750_v11, %v1560_v33  ;;  %v1047_v11 = vld [vmem:[#allocation3 + $0x169] sm:$0xff] }
 0x15f   : > { %1494 = vmatmul.bf16.gmra.mxu3 %v4541_v46  ;;  %v3858_v46 = vld [vmem:[%s4967_s3 + $0x148] sm:$0xff] }
 0x160   : > { %1792 = vmatmul.bf16.gmra.mxu0 %v1663_v26  ;;  %2038 = vmatpush.bf16.msra.mxu1 %v3858_v46 }
 0x161   : > { %v1157_v15 = vpop.f32.mrf.mxu2 }
 0x162   : > { %v1263_v63 = vadd.f32 %v1157_v15, %v965_v45  ;;  %v1455_v2 = vpop.f32.mrf.mxu3  ;;  %v4753_v45 = vpack.c.bf16 %v1048_v52, %v1047_v11  ;;  %v4757_v15 = vpack.c.bf16 %v1644_v25, %v1643_v39  ;;  %v1347_v39 = vld [vmem:[#allocation3 + $0x1a7] sm:$0xff] }
 0x163   : > { %v861_v32 = vpop.f32.mrf.mxu1  ;;  %v1645_v25 = vld [vmem:[#allocation3 + $0x1a8] sm:$0xff] }
 0x164   : > { %v1561_v47 = vadd.f32 %v1455_v2, %v1263_v63  ;;  %v966_v14 = vadd.f32 %v861_v32, %v4664_v53 }
 0x165   : > { %v1755_v50 = vpop.f32.mrf.mxu0 }
 0x166   : > { %v4751_v28 = vadd.f32 %v1753_v48, %v1561_v47 }
 0x168   : > { %4972 = vst [vmem:[#allocation4_spill] sm:$0xff] %v4751_v28 }
 0x169   : > { %v1159_v53 = vpop.f32.mrf.mxu2 }
 0x16a   : > { %v1264_v36 = vadd.f32 %v1159_v53, %v966_v14  ;;  %v1457_v33 = vpop.f32.mrf.mxu3  ;;  %v1646_v53 = vld [vmem:[#allocation3 + $0x1b0] sm:$0xff] }
 0x16b   : > { %v864_v51 = vpop.f32.mrf.mxu1 }
 0x16c   : > { %v1562_v63 = vadd.f32 %v1457_v33, %v1264_v36  ;;  %v967_v48 = vadd.f32 %v864_v51, %v4680_v31  ;;  %v1049_v31 = vld [vmem:[#allocation3 + $0x189] sm:$0xff] }
 0x16d   : > { %v1758_v2 = vpop.f32.mrf.mxu0 }
 0x16e   : > { %903 = vmatmul.bf16.gmra.mxu1 %v1663_v26  ;;  %1201 = vmatmul.bf16.gmra.mxu2 %v4753_v45  ;;  %v4761_v32 = vadd.f32 %v1755_v50, %v1562_v63  ;;  %v1050_v26 = vld [vmem:[#allocation3 + $0x191] sm:$0xff] }
 0x16f   : > { %1499 = vmatmul.bf16.gmra.mxu3 %v4755_v9  ;;  %v1348_v50 = vld [vmem:[#allocation3 + $0x1af] sm:$0xff]  ;;  %v4768_v63 = vpack.c.bf16 %v1050_v26, %v1049_v31 }
 0x170   : > { %4973 = vst [vmem:[#allocation5_spill] sm:$0xff] %v4761_v32  ;;  %1797 = vmatmul.bf16.gmra.mxu0 %v4757_v15 }
 0x171   : > { %v1162_v47 = vpop.f32.mrf.mxu2  ;;  %4975 = vst [vmem:[#allocation7_spill] sm:$0xff] %v4768_v63 }
 0x172   : > { %v1265_v14 = vadd.f32 %v1162_v47, %v967_v48  ;;  %v1460_v46 = vpop.f32.mrf.mxu3  ;;  %v1367_v47 = vpack.c.bf16 %v1348_v50, %v1347_v39 }
 0x173   : > { %v866_v19 = vpop.f32.mrf.mxu1 }
 0x174   : > { %v1563_v11 = vadd.f32 %v1460_v46, %v1265_v14  ;;  %v968_v52 = vadd.f32 %v866_v19, %v4689_v34  ;;  %v1665_v14 = vpack.c.bf16 %v1646_v53, %v1645_v25 }
 0x175   : > { %v1760_v35 = vpop.f32.mrf.mxu0 }
 0x176   : > { %v4766_v0 = vadd.f32 %v1758_v2, %v1563_v11  ;;  %v4047_v2 = vld [vmem:[%s4155_s27 + $0x78] sm:$0xff]   ;;  %v3865_v11 = vld [vmem:[%s4967_s3 + $0x180] sm:$0xff] }
 0x177   : > { %v3951_v31 = vunpack.c.l.bf16 %v4047_v2  ;;  %v3952_v26 = vunpack.c.h.bf16 %v4047_v2  ;;  %2338 = vmatpush.bf16.msra.mxu2 %v3865_v11  ;;  %v3857_v11 = vld [vmem:[%s4967_s3 + $0x140] sm:$0xff] }
 0x178   : > { %4974 = vst [vmem:[#allocation6_spill] sm:$0xff] %v4766_v0  ;;  %2039 = vmatpush.bf16.msra.mxu1 %v3857_v11 }
 0x179   : > { %v1164_v36 = vpop.f32.mrf.mxu2 }
 0x17a   : > { %v1266_v33 = vadd.f32 %v1164_v36, %v968_v52  ;;  %v1462_v51 = vpop.f32.mrf.mxu3  ;;  %v3873_v52 = vld [vmem:[%s4967_s3 + $0x1c0] sm:$0xff] }
 0x17b   : > { %v869_v48 = vpop.f32.mrf.mxu1  ;;  %2636 = vmatpush.bf16.msra.mxu3 %v3873_v52  ;;  %v3881_v52 = vld [vmem:[%s4967_s3 + $0x200] sm:$0xff] }
 0x17c   : > { %v1564_v46 = vadd.f32 %v1462_v51, %v1266_v33  ;;  %v969_v39 = vadd.f32 %v869_v48, %v4588_v30  ;;  %2934 = vmatpush.bf16.msra.mxu0 %v3881_v52 }
 0x17d   : > { %v1763_v34 = vpop.f32.mrf.mxu0 }
 0x17e   : > { %908 = vmatmul.bf16.gmra.mxu1 %v4757_v15  ;;  %1206 = vmatmul.bf16.gmra.mxu2 %v4768_v63  ;;  %v4773_v19 = vadd.f32 %v1760_v35, %v1564_v46  ;;  %v4098_v35 = vld [vmem:[%s4965_s1] ss:$0 sm:$0xff] }
 0x17f   : > { %1504 = vmatmul.bf16.gmra.mxu3 %v1367_v47  ;;  %v423_v25 = vmul.f32 %v4098_v35, %v3951_v31  ;;  %v424_v53 = vmul.f32 %v4098_v35, %v3952_v26  ;;  %v4099_v47 = vld [vmem:[%s4966_s2] ss:$0 sm:$0xff]  ;;  %v1051_v26 = vld [vmem:[#allocation3 + $0x1a9] sm:$0xff] }
 0x180   : > { %4976 = vst [vmem:[#allocation8_spill] sm:$0xff] %v4773_v19  ;;  %1802 = vmatmul.bf16.gmra.mxu0 %v1665_v14 }
 0x181   : > { %v1167_v50 = vpop.f32.mrf.mxu2  ;;  %v4788_v46 = vadd.f32 %v4099_v47, %v423_v25  ;;  %v4790_v2 = vadd.f32 %v4099_v47, %v424_v53  ;;  %v1350_v25 = vld [vmem:[#allocation3 + $0x1cf] sm:$0xff] }
 0x182   : > { %v1267_v36 = vadd.f32 %v1167_v50, %v969_v39  ;;  %v1465_v33 = vpop.f32.mrf.mxu3  ;;  %v1052_v39 = vld [vmem:[#allocation3 + $0x1b1] sm:$0xff]  ;;  %v1349_v50 = vld [vmem:[#allocation3 + $0x1c7] sm:$0xff] }
 0x183   : > { %v871_v51 = vpop.f32.mrf.mxu1  ;;  %492 = vst [vmem:[#allocation3 + $0x208] sm:$0xff] %v4788_v46  ;;  %v1647_v53 = vld [vmem:[#allocation3 + $0x1c8] sm:$0xff]  ;;  %v4803_v0 = vpack.c.bf16 %v1052_v39, %v1051_v26  ;;  %v1368_v11 = vpack.c.bf16 %v1350_v25, %v1349_v50 }
 0x184   : > { %v1565_v30 = vadd.f32 %v1465_v33, %v1267_v36  ;;  %493 = vst [vmem:[#allocation3 + $0x210] sm:$0xff] %v4790_v2  ;;  %v970_v35 = vadd.f32 %v871_v51, %v4609_v49  ;;  %v1648_v36 = vld [vmem:[#allocation3 + $0x1d0] sm:$0xff]  ;;  %v1351_v25 = vld [vmem:[#allocation3 + $0x1e7] sm:$0xff] }
 0x185   : > { %v1765_v48 = vpop.f32.mrf.mxu0  ;;  %v1666_v52 = vpack.c.bf16 %v1648_v36, %v1647_v53  ;;  %v1053_v50 = vld [vmem:[#allocation3 + $0x1c9] sm:$0xff] }
 0x186   : > { %v4800_v31 = vadd.f32 %v1763_v34, %v1565_v30  ;;  %v1352_v53 = vld [vmem:[#allocation3 + $0x1ef] sm:$0xff] }
 0x188   : > { %4977 = vst [vmem:[#allocation9_spill] sm:$0xff] %v4800_v31 }
 0x189   : > { %v1169_v33 = vpop.f32.mrf.mxu2 }
 0x18a   : > { %v1268_v47 = vadd.f32 %v1169_v33, %v970_v35  ;;  %v1467_v19 = vpop.f32.mrf.mxu3 }
 0x18b   : > { %v874_v32 = vpop.f32.mrf.mxu1 }
 0x18c   : > { %v1566_v28 = vadd.f32 %v1467_v19, %v1268_v47  ;;  %v971_v49 = vadd.f32 %v874_v32, %v4622_v41  ;;  %v1054_v19 = vld [vmem:[#allocation3 + $0x1d1] sm:$0xff] }
 0x18d   : > { %v1768_v63 = vpop.f32.mrf.mxu0  ;;  %v4812_v41 = vpack.c.bf16 %v1054_v19, %v1053_v50 }
 0x18e   : > { %913 = vmatmul.bf16.gmra.mxu1 %v1665_v14  ;;  %1211 = vmatmul.bf16.gmra.mxu2 %v4803_v0  ;;  %v4806_v34 = vadd.f32 %v1765_v48, %v1566_v28  ;;  %v1649_v28 = vld [vmem:[#allocation3 + $0x1e8] sm:$0xff]  ;;  %v1650_v48 = vld [vmem:[#allocation3 + $0x1f0] sm:$0xff] }
 0x18f   : > { %1509 = vmatmul.bf16.gmra.mxu3 %v1368_v11 }
 0x190   : > { %1807 = vmatmul.bf16.gmra.mxu0 %v1666_v52 }
 0x191   : > { %v1172_v51 = vpop.f32.mrf.mxu2 }
 0x192   : > { %v1269_v30 = vadd.f32 %v1172_v51, %v971_v49  ;;  %v1470_v35 = vpop.f32.mrf.mxu3  ;;  %v1369_v49 = vpack.c.bf16 %v1352_v53, %v1351_v25  ;;  %v1667_v51 = vpack.c.bf16 %v1650_v48, %v1649_v28  ;;  %v1055_v25 = vld [vmem:[#allocation3 + $0x1e9] sm:$0xff]  ;;  %v1056_v53 = vld [vmem:[#allocation3 + $0x1f1] sm:$0xff] }
 0x193   : > { %v876_v33 = vpop.f32.mrf.mxu1  ;;  %v1353_v28 = vld [vmem:[#allocation3 + $0x207] sm:$0xff]  ;;  %v1354_v48 = vld [vmem:[#allocation3 + $0x20f] sm:$0xff] }
 0x194   : > { %v1567_v26 = vadd.f32 %v1470_v35, %v1269_v30  ;;  %v972_v14 = vadd.f32 %v876_v33, %v4634_v56 }
 0x195   : > { %v1770_v39 = vpop.f32.mrf.mxu0 }
 0x196   : > { %v4809_v31 = vadd.f32 %v1768_v63, %v1567_v26 }
 0x198   : > { %4978 = vst [vmem:[#allocation10_spill] sm:$0xff] %v4809_v31 }
 0x199   : > { %v1174_v36 = vpop.f32.mrf.mxu2 }
 0x19a   : > { %v1270_v47 = vadd.f32 %v1174_v36, %v972_v14  ;;  %v1472_v11 = vpop.f32.mrf.mxu3 }
 0x19b   : > { %v879_v32 = vpop.f32.mrf.mxu1 }
 0x19c   : > { %v1568_v30 = vadd.f32 %v1472_v11, %v1270_v47  ;;  %v973_v56 = vadd.f32 %v879_v32, %v4644_v62  ;;  %v1370_v32 = vpack.c.bf16 %v1354_v48, %v1353_v28  ;;  %v2516_v28 = vld [vmem:[#allocation3 + $0x48] sm:$0xff]  ;;  %v2517_v48 = vld [vmem:[#allocation3 + $0x50] sm:$0xff] }
 0x19d   : > { %v1773_v35 = vpop.f32.mrf.mxu0 }
 0x19e   : > { %918 = vmatmul.bf16.gmra.mxu1 %v1666_v52  ;;  %1216 = vmatmul.bf16.gmra.mxu2 %v4812_v41  ;;  %v4815_v63 = vadd.f32 %v1770_v39, %v1568_v30  ;;  %v1668_v30 = vpack.c.bf16 %v4790_v2, %v4788_v46  ;;  %v2218_v46 = vld [vmem:[#allocation3 + $0x47] sm:$0xff]  ;;  %v2219_v2 = vld [vmem:[#allocation3 + $0x4f] sm:$0xff] }
 0x19f   : > { %1514 = vmatmul.bf16.gmra.mxu3 %v1369_v49  ;;  %v4821_v49 = vpack.c.bf16 %v1056_v53, %v1055_v25 }
 0x1a0   : > { %1812 = vmatmul.bf16.gmra.mxu0 %v1667_v51 }
 0x1a1   : > { %v1177_v33 = vpop.f32.mrf.mxu2 }
 0x1a2   : > { %v1271_v26 = vadd.f32 %v1177_v33, %v973_v56  ;;  %v1475_v14 = vpop.f32.mrf.mxu3 }
 0x1a3   : > { %v881_v36 = vpop.f32.mrf.mxu1 }
 0x1a4   : > { %v1569_v50 = vadd.f32 %v1475_v14, %v1271_v26  ;;  %v974_v52 = vadd.f32 %v881_v36, %v4662_v4 }
 0x1a5   : > { %v1775_v19 = vpop.f32.mrf.mxu0 }
 0x1a6   : > { %v4818_v31 = vadd.f32 %v1773_v35, %v1569_v50 }
 0x1a9   : > { %v1179_v39 = vpop.f32.mrf.mxu2 }
 0x1aa   : > { %v1272_v47 = vadd.f32 %v1179_v39, %v974_v52  ;;  %v1477_v11 = vpop.f32.mrf.mxu3 }
 0x1ab   : > { %v884_v62 = vpop.f32.mrf.mxu1 }
 0x1ac   : > { %v1570_v56 = vadd.f32 %v1477_v11, %v1272_v47  ;;  %v975_v4 = vadd.f32 %v884_v62, %v4678_v24  ;;  %v2250_v11 = vpack.c.bf16 %v2219_v2, %v2218_v46  ;;  %v2548_v24 = vpack.c.bf16 %v2517_v48, %v2516_v28  ;;  %v1922_v2 = vld [vmem:[#allocation3 + $0x51] sm:$0xff]  ;;  %v2518_v28 = vld [vmem:[#allocation3 + $0x68] sm:$0xff] }
 0x1ad   : > { %v1778_v33 = vpop.f32.mrf.mxu0  ;;  %v2519_v48 = vld [vmem:[#allocation3 + $0x70] sm:$0xff] }
 0x1ae   : > { %923 = vmatmul.bf16.gmra.mxu1 %v1667_v51  ;;  %1221 = vmatmul.bf16.gmra.mxu2 %v4821_v49  ;;  %v4826_v35 = vadd.f32 %v1775_v19, %v1570_v56 }
 0x1af   : > { %1519 = vmatmul.bf16.gmra.mxu3 %v1370_v32 }
 0x1b0   : > { %1817 = vmatmul.bf16.gmra.mxu0 %v1668_v30 }
 0x1b1   : > { %v1182_v26 = vpop.f32.mrf.mxu2 }
 0x1b2   : > { %v1273_v14 = vadd.f32 %v1182_v26, %v975_v4  ;;  %v1480_v36 = vpop.f32.mrf.mxu3 }
 0x1b3   : > { %v886_v50 = vpop.f32.mrf.mxu1 }
 0x1b4   : > { %v1571_v25 = vadd.f32 %v1480_v36, %v1273_v14  ;;  %v976_v51 = vadd.f32 %v886_v50, %v4687_v44 }
 0x1b5   : > { %v1780_v53 = vpop.f32.mrf.mxu0 }
 0x1b6   : > { %v4829_v52 = vadd.f32 %v1778_v33, %v1571_v25  ;;  %v1921_v25 = vld [vmem:[#allocation3 + $0x49] sm:$0xff] }
 0x1b9   : > { %v1184_v19 = vpop.f32.mrf.mxu2 }
 0x1ba   : > { %v1274_v39 = vadd.f32 %v1184_v19, %v976_v51  ;;  %v1482_v47 = vpop.f32.mrf.mxu3  ;;  %v2220_v51 = vld [vmem:[#allocation3 + $0x67] sm:$0xff] }
 0x1bb   : > { %v889_v32 = vpop.f32.mrf.mxu1 }
 0x1bc   : > { %v1572_v62 = vadd.f32 %v1482_v47, %v1274_v39  ;;  %v977_v44 = vadd.f32 %v889_v32, %v4602_v38  ;;  %v1952_v38 = vpack.c.bf16 %v1922_v2, %v1921_v25  ;;  %v2549_v32 = vpack.c.bf16 %v2519_v48, %v2518_v28  ;;  %v1923_v25 = vld [vmem:[#allocation3 + $0x69] sm:$0xff] }
 0x1bd   : > { %v1783_v30 = vpop.f32.mrf.mxu0  ;;  %v2520_v28 = vld [vmem:[#allocation3 + $0x88] sm:$0xff]  ;;  %v2521_v48 = vld [vmem:[#allocation3 + $0x90] sm:$0xff] }
 0x1be   : > { %2040 = vmatmul.bf16.vlgmr.msra.gmra.mxu1 %v4562_v10  ;;  %2339 = vmatmul.bf16.vlgmr.msra.gmra.mxu2 %v2250_v11  ;;  %v4833_v56 = vadd.f32 %v1780_v53, %v1572_v62  ;;  %v2221_v10 = vld [vmem:[#allocation3 + $0x6f] sm:$0xff] }
 0x1bf   : > { %2637 = vmatmul.bf16.vlgmr.msra.gmra.mxu3 %v2548_v24  ;;  %v2251_v47 = vpack.c.bf16 %v2221_v10, %v2220_v51  ;;  %v1924_v51 = vld [vmem:[#allocation3 + $0x71] sm:$0xff]  ;;  %v2222_v10 = vld [vmem:[#allocation3 + $0x87] sm:$0xff] }
 0x1c0   : > { %2935 = vmatmul.bf16.vlgmr.msra.gmra.mxu0 %v4565_v13 }
 0x1c1   : > { %v1187_v33 = vpop.f32.mrf.mxu2 }
 0x1c2   : > { %v1275_v4 = vadd.f32 %v1187_v33, %v977_v44  ;;  %v1485_v26 = vpop.f32.mrf.mxu3 }
 0x1c3   : > { %v891_v14 = vpop.f32.mrf.mxu1 }
 0x1c4   : > { %v1573_v36 = vadd.f32 %v1485_v26, %v1275_v4  ;;  %v978_v53 = vadd.f32 %v891_v14, %v4616_v55 }
 0x1c5   : > { %v1785_v50 = vpop.f32.mrf.mxu0 }
 0x1c6   : > { %v4837_v46 = vadd.f32 %v1783_v30, %v1573_v36 }
 0x1c9   : > { %v1189_v19 = vpop.f32.mrf.mxu2 }
 0x1ca   : > { %v1276_v13 = vadd.f32 %v1189_v19, %v978_v53  ;;  %v1487_v39 = vpop.f32.mrf.mxu3  ;;  %v2223_v53 = vld [vmem:[#allocation3 + $0x8f] sm:$0xff] }
 0x1cb   : > { %v894_v11 = vpop.f32.mrf.mxu1 }
 0x1cc   : > { %v1574_v24 = vadd.f32 %v1487_v39, %v1276_v13  ;;  %v979_v55 = vadd.f32 %v894_v11, %v4630_v54  ;;  %v1953_v54 = vpack.c.bf16 %v1924_v51, %v1923_v25  ;;  %v2252_v39 = vpack.c.bf16 %v2223_v53, %v2222_v10  ;;  %v1926_v51 = vld [vmem:[#allocation3 + $0x91] sm:$0xff]  ;;  %v2224_v10 = vld [vmem:[#allocation3 + $0xa7] sm:$0xff] }
 0x1cd   : > { %v1788_v62 = vpop.f32.mrf.mxu0  ;;  %v2225_v53 = vld [vmem:[#allocation3 + $0xaf] sm:$0xff] }
 0x1ce   : > { %2045 = vmatmul.bf16.gmra.mxu1 %v1952_v38  ;;  %2344 = vmatmul.bf16.gmra.mxu2 %v2251_v47  ;;  %v4840_v30 = vadd.f32 %v1785_v50, %v1574_v24  ;;  %v2550_v47 = vpack.c.bf16 %v2521_v48, %v2520_v28  ;;  %v2523_v28 = vld [vmem:[#allocation3 + $0xb0] sm:$0xff] }
 0x1cf   : > { %2642 = vmatmul.bf16.gmra.mxu3 %v2549_v32 }
 0x1d0   : > { %2940 = vmatmul.bf16.gmra.mxu0 %v4580_v23 }
 0x1d1   : > { %v1192_v44 = vpop.f32.mrf.mxu2 }
 0x1d2   : > { %v1277_v33 = vadd.f32 %v1192_v44, %v979_v55  ;;  %v1490_v4 = vpop.f32.mrf.mxu3 }
 0x1d3   : > { %v896_v26 = vpop.f32.mrf.mxu1 }
 0x1d4   : > { %v1575_v14 = vadd.f32 %v1490_v4, %v1277_v33  ;;  %v980_v50 = vadd.f32 %v896_v26, %v4638_v61 }
 0x1d5   : > { %v1790_v36 = vpop.f32.mrf.mxu0 }
 0x1d6   : > { %v4844_v2 = vadd.f32 %v1788_v62, %v1575_v14  ;;  %v1925_v14 = vld [vmem:[#allocation3 + $0x89] sm:$0xff] }
 0x1d9   : > { %v1194_v19 = vpop.f32.mrf.mxu2 }
 0x1da   : > { %v1278_v23 = vadd.f32 %v1194_v19, %v980_v50  ;;  %v1492_v13 = vpop.f32.mrf.mxu3  ;;  %v2522_v50 = vld [vmem:[#allocation3 + $0xa8] sm:$0xff] }
 0x1db   : > { %v899_v38 = vpop.f32.mrf.mxu1 }
 0x1dc   : > { %v1576_v11 = vadd.f32 %v1492_v13, %v1278_v23  ;;  %v981_v61 = vadd.f32 %v899_v38, %v4658_v37  ;;  %v1954_v37 = vpack.c.bf16 %v1926_v51, %v1925_v14  ;;  %v2253_v23 = vpack.c.bf16 %v2225_v53, %v2224_v10  ;;  %v1928_v14 = vld [vmem:[#allocation3 + $0xb1] sm:$0xff]  ;;  %v2226_v51 = vld [vmem:[#allocation3 + $0xc7] sm:$0xff] }
 0x1dd   : > { %v1793_v32 = vpop.f32.mrf.mxu0  ;;  %v2227_v10 = vld [vmem:[#allocation3 + $0xcf] sm:$0xff] }
 0x1de   : > { %2050 = vmatmul.bf16.gmra.mxu1 %v1953_v54  ;;  %2349 = vmatmul.bf16.gmra.mxu2 %v2252_v39  ;;  %v4847_v24 = vadd.f32 %v1790_v36, %v1576_v11  ;;  %v2551_v54 = vpack.c.bf16 %v2523_v28, %v2522_v50  ;;  %v2524_v53 = vld [vmem:[#allocation3 + $0xc8] sm:$0xff] }
 0x1df   : > { %2647 = vmatmul.bf16.gmra.mxu3 %v2550_v47 }
 0x1e0   : > { %2945 = vmatmul.bf16.gmra.mxu0 %v4586_v29 }
 0x1e1   : > { %v1197_v62 = vpop.f32.mrf.mxu2 }
 0x1e2   : > { %v1279_v55 = vadd.f32 %v1197_v62, %v981_v61  ;;  %v1495_v44 = vpop.f32.mrf.mxu3 }
 0x1e3   : > { %v901_v33 = vpop.f32.mrf.mxu1 }
 0x1e4   : > { %v1577_v4 = vadd.f32 %v1495_v44, %v1279_v55  ;;  %v982_v36 = vadd.f32 %v901_v33, %v4672_v20  ;;  %v1927_v33 = vld [vmem:[#allocation3 + $0xa9] sm:$0xff] }
 0x1e5   : > { %v1795_v26 = vpop.f32.mrf.mxu0 }
 0x1e6   : > { %v4851_v25 = vadd.f32 %v1793_v32, %v1577_v4 }
 0x1e9   : > { %v1199_v48 = vpop.f32.mrf.mxu2 }
 0x1ea   : > { %v1280_v29 = vadd.f32 %v1199_v48, %v982_v36  ;;  %v1497_v19 = vpop.f32.mrf.mxu3  ;;  %v2525_v36 = vld [vmem:[#allocation3 + $0xd0] sm:$0xff]  ;;  %v2254_v48 = vpack.c.bf16 %v2227_v10, %v2226_v51  ;;  %v2526_v51 = vld [vmem:[#allocation3 + $0xe8] sm:$0xff] }
 0x1eb   : > { %v904_v13 = vpop.f32.mrf.mxu1  ;;  %v2527_v10 = vld [vmem:[#allocation3 + $0xf0] sm:$0xff] }
 0x1ec   : > { %v1578_v39 = vadd.f32 %v1497_v19, %v1280_v29  ;;  %v983_v20 = vadd.f32 %v904_v13, %v4683_v17  ;;  %v1955_v17 = vpack.c.bf16 %v1928_v14, %v1927_v33  ;;  %v2552_v19 = vpack.c.bf16 %v2525_v36, %v2524_v53  ;;  %v2228_v33 = vld [vmem:[#allocation3 + $0xe7] sm:$0xff]  ;;  %v2229_v14 = vld [vmem:[#allocation3 + $0xef] sm:$0xff] }
 0x1ed   : > { %v1798_v38 = vpop.f32.mrf.mxu0  ;;  %v2255_v36 = vpack.c.bf16 %v2229_v14, %v2228_v33  ;;  %v2529_v33 = vld [vmem:[#allocation3 + $0x110] sm:$0xff] }
 0x1ee   : > { %2055 = vmatmul.bf16.gmra.mxu1 %v1954_v37  ;;  %2354 = vmatmul.bf16.gmra.mxu2 %v2253_v23  ;;  %v4854_v47 = vadd.f32 %v1795_v26, %v1578_v39 }
 0x1ef   : > { %2652 = vmatmul.bf16.gmra.mxu3 %v2551_v54 }
 0x1f0   : > { %2950 = vmatmul.bf16.gmra.mxu0 %v4620_v40 }
 0x1f1   : > { %v1202_v11 = vpop.f32.mrf.mxu2 }
 0x1f2   : > { %v1281_v32 = vadd.f32 %v1202_v11, %v983_v20  ;;  %v1500_v61 = vpop.f32.mrf.mxu3 }
 0x1f3   : > { %v906_v62 = vpop.f32.mrf.mxu1 }
 0x1f4   : > { %v1579_v55 = vadd.f32 %v1500_v61, %v1281_v32  ;;  %v984_v26 = vadd.f32 %v906_v62, %v4691_v42  ;;  %v1929_v61 = vld [vmem:[#allocation3 + $0xc9] sm:$0xff] }
 0x1f5   : > { %v1800_v44 = vpop.f32.mrf.mxu0 }
 0x1f6   : > { %v4858_v4 = vadd.f32 %v1798_v38, %v1579_v55  ;;  %v1930_v55 = vld [vmem:[#allocation3 + $0xd1] sm:$0xff] }
 0x1f9   : > { %v1204_v50 = vpop.f32.mrf.mxu2 }
 0x1fa   : > { %v1282_v40 = vadd.f32 %v1204_v50, %v984_v26  ;;  %v1502_v28 = vpop.f32.mrf.mxu3 }
 0x1fb   : > { %v909_v29 = vpop.f32.mrf.mxu1 }
 0x1fc   : > { %v1580_v37 = vadd.f32 %v1502_v28, %v1282_v40  ;;  %v985_v42 = vadd.f32 %v909_v29, %v4604_v43  ;;  %v1956_v43 = vpack.c.bf16 %v1930_v55, %v1929_v61  ;;  %v2553_v40 = vpack.c.bf16 %v2527_v10, %v2526_v51  ;;  %v2231_v61 = vld [vmem:[#allocation3 + $0x10f] sm:$0xff] }
 0x1fd   : > { %v1803_v23 = vpop.f32.mrf.mxu0  ;;  %v2528_v55 = vld [vmem:[#allocation3 + $0x108] sm:$0xff] }
 0x1fe   : > { %2060 = vmatmul.bf16.gmra.mxu1 %v1955_v17  ;;  %2359 = vmatmul.bf16.gmra.mxu2 %v2254_v48  ;;  %v4861_v13 = vadd.f32 %v1800_v44, %v1580_v37 }
 0x1ff   : > { %2657 = vmatmul.bf16.gmra.mxu3 %v2552_v19 }
 0x200   : > { %2955 = vmatmul.bf16.gmra.mxu0 %v4642_v8 }
 0x201   : > { %v1207_v54 = vpop.f32.mrf.mxu2 }
 0x202   : > { %v1283_v39 = vadd.f32 %v1207_v54, %v985_v42  ;;  %v1505_v38 = vpop.f32.mrf.mxu3 }
 0x203   : > { %v911_v20 = vpop.f32.mrf.mxu1 }
 0x204   : > { %v1581_v11 = vadd.f32 %v1505_v38, %v1283_v39  ;;  %v986_v44 = vadd.f32 %v911_v20, %v4618_v59  ;;  %v1931_v39 = vld [vmem:[#allocation3 + $0xe9] sm:$0xff]  ;;  %v1932_v20 = vld [vmem:[#allocation3 + $0xf1] sm:$0xff] }
 0x205   : > { %v1805_v32 = vpop.f32.mrf.mxu0 }
 0x206   : > { %v4865_v62 = vadd.f32 %v1803_v23, %v1581_v11  ;;  %v2230_v11 = vld [vmem:[#allocation3 + $0x107] sm:$0xff] }
 0x207   : > { %v2256_v51 = vpack.c.bf16 %v2231_v61, %v2230_v11 }
 0x209   : > { %v1209_v26 = vpop.f32.mrf.mxu2 }
 0x20a   : > { %v1284_v8 = vadd.f32 %v1209_v26, %v986_v44  ;;  %v1507_v53 = vpop.f32.mrf.mxu3  ;;  %v2554_v26 = vpack.c.bf16 %v2529_v33, %v2528_v55 }
 0x20b   : > { %v914_v50 = vpop.f32.mrf.mxu1 }
 0x20c   : > { %v1582_v28 = vadd.f32 %v1507_v53, %v1284_v8  ;;  %v987_v59 = vadd.f32 %v914_v50, %v4632_v7  ;;  %v1957_v7 = vpack.c.bf16 %v1932_v20, %v1931_v39  ;;  %v2530_v39 = vld [vmem:[#allocation3 + $0x128] sm:$0xff]  ;;  %v2531_v20 = vld [vmem:[#allocation3 + $0x130] sm:$0xff] }
 0x20d   : > { %v1808_v17 = vpop.f32.mrf.mxu0  ;;  %v2555_v33 = vpack.c.bf16 %v2531_v20, %v2530_v39 }
 0x20e   : > { %2065 = vmatmul.bf16.gmra.mxu1 %v1956_v43  ;;  %2364 = vmatmul.bf16.gmra.mxu2 %v2255_v36  ;;  %v4868_v48 = vadd.f32 %v1805_v32, %v1582_v28 }
 0x20f   : > { %2662 = vmatmul.bf16.gmra.mxu3 %v2553_v40 }
 0x210   : > { %2960 = vmatmul.bf16.gmra.mxu0 %v4676_v22 }
 0x211   : > { %v1212_v29 = vpop.f32.mrf.mxu2 }
 0x212   : > { %v1285_v19 = vadd.f32 %v1212_v29, %v987_v59  ;;  %v1510_v37 = vpop.f32.mrf.mxu3  ;;  %v1933_v29 = vld [vmem:[#allocation3 + $0x109] sm:$0xff] }
 0x213   : > { %v916_v23 = vpop.f32.mrf.mxu1 }
 0x214   : > { %v1583_v42 = vadd.f32 %v1510_v37, %v1285_v19  ;;  %v988_v32 = vadd.f32 %v916_v23, %v4640_v5  ;;  %v1934_v37 = vld [vmem:[#allocation3 + $0x111] sm:$0xff]  ;;  %v2232_v23 = vld [vmem:[#allocation3 + $0x127] sm:$0xff] }
 0x215   : > { %v1810_v54 = vpop.f32.mrf.mxu0 }
 0x216   : > { %v4872_v38 = vadd.f32 %v1808_v17, %v1583_v42  ;;  %v2233_v42 = vld [vmem:[#allocation3 + $0x12f] sm:$0xff] }
 0x219   : > { %v1214_v14 = vpop.f32.mrf.mxu2 }
 0x21a   : > { %v1286_v22 = vadd.f32 %v1214_v14, %v988_v32  ;;  %v1512_v44 = vpop.f32.mrf.mxu3  ;;  %v2257_v32 = vpack.c.bf16 %v2233_v42, %v2232_v23 }
 0x21b   : > { %v919_v10 = vpop.f32.mrf.mxu1 }
 0x21c   : > { %v1584_v8 = vadd.f32 %v1512_v44, %v1286_v22  ;;  %v989_v5 = vadd.f32 %v919_v10, %v4660_v3  ;;  %v1958_v3 = vpack.c.bf16 %v1934_v37, %v1933_v29 }
 0x21d   : > { %v1813_v53 = vpop.f32.mrf.mxu0 }
 0x21e   : > { %2070 = vmatmul.bf16.gmra.mxu1 %v1957_v7  ;;  %2369 = vmatmul.bf16.gmra.mxu2 %v2256_v51  ;;  %v4875_v43 = vadd.f32 %v1810_v54, %v1584_v8 }
 0x21f   : > { %2667 = vmatmul.bf16.gmra.mxu3 %v2554_v26 }
 0x220   : > { %2965 = vmatmul.bf16.gmra.mxu0 %v4695_v60 }
 0x221   : > { %v1217_v36 = vpop.f32.mrf.mxu2 }
 0x222   : > { %v1287_v50 = vadd.f32 %v1217_v36, %v989_v5  ;;  %v1515_v40 = vpop.f32.mrf.mxu3  ;;  %v2234_v36 = vld [vmem:[#allocation3 + $0x147] sm:$0xff] }
 0x223   : > { %v921_v28 = vpop.f32.mrf.mxu1 }
 0x224   : > { %v1585_v17 = vadd.f32 %v1515_v40, %v1287_v50  ;;  %v990_v54 = vadd.f32 %v921_v28, %v4674_v21  ;;  %v2235_v50 = vld [vmem:[#allocation3 + $0x14f] sm:$0xff] }
 0x225   : > { %v1815_v59 = vpop.f32.mrf.mxu0  ;;  %v2532_v28 = vld [vmem:[#allocation3 + $0x148] sm:$0xff]  ;;  %v2258_v23 = vpack.c.bf16 %v2235_v50, %v2234_v36 }
 0x226   : > { %v4879_v19 = vadd.f32 %v1813_v53, %v1585_v17  ;;  %v2533_v17 = vld [vmem:[#allocation3 + $0x150] sm:$0xff] }
 0x229   : > { %v1219_v11 = vpop.f32.mrf.mxu2 }
 0x22a   : > { %v1288_v60 = vadd.f32 %v1219_v11, %v990_v54  ;;  %v1517_v61 = vpop.f32.mrf.mxu3 }
 0x22b   : > { %v924_v55 = vpop.f32.mrf.mxu1 }
 0x22c   : > { %v1586_v14 = vadd.f32 %v1517_v61, %v1288_v60  ;;  %v991_v21 = vadd.f32 %v924_v55, %v4685_v18  ;;  %v2556_v18 = vpack.c.bf16 %v2533_v17, %v2532_v28  ;;  %v1937_v55 = vld [vmem:[#allocation3 + $0x149] sm:$0xff] }
 0x22d   : > { %v1818_v22 = vpop.f32.mrf.mxu0 }
 0x22e   : > { %2075 = vmatmul.bf16.gmra.mxu1 %v1958_v3  ;;  %2374 = vmatmul.bf16.gmra.mxu2 %v2257_v32  ;;  %v4882_v44 = vadd.f32 %v1815_v59, %v1586_v14  ;;  %v1938_v14 = vld [vmem:[#allocation3 + $0x151] sm:$0xff] }
 0x22f   : > { %2672 = vmatmul.bf16.gmra.mxu3 %v2555_v33 }
 0x230   : > { %2970 = vmatmul.bf16.gmra.mxu0 %v4717_v1 }
 0x231   : > { %v1222_v7 = vpop.f32.mrf.mxu2 }
 0x232   : > { %v1289_v51 = vadd.f32 %v1222_v7, %v991_v21  ;;  %v1520_v10 = vpop.f32.mrf.mxu3  ;;  %v2237_v21 = vld [vmem:[#allocation3 + $0x16f] sm:$0xff] }
 0x233   : > { %v926_v26 = vpop.f32.mrf.mxu1  ;;  %v2534_v7 = vld [vmem:[#allocation3 + $0x168] sm:$0xff] }
 0x234   : > { %v1587_v8 = vadd.f32 %v1520_v10, %v1289_v51  ;;  %v992_v40 = vadd.f32 %v926_v26, %v4693_v58  ;;  %v2535_v51 = vld [vmem:[#allocation3 + $0x170] sm:$0xff] }
 0x235   : > { %v1820_v53 = vpop.f32.mrf.mxu0  ;;  %v2557_v50 = vpack.c.bf16 %v2535_v51, %v2534_v7 }
 0x236   : > { %v4886_v5 = vadd.f32 %v1818_v22, %v1587_v8  ;;  %v2236_v22 = vld [vmem:[#allocation3 + $0x167] sm:$0xff] }
 0x239   : > { %v1224_v59 = vpop.f32.mrf.mxu2 }
 0x23a   : > { %v1290_v29 = vadd.f32 %v1224_v59, %v992_v40  ;;  %v1522_v37 = vpop.f32.mrf.mxu3 }
 0x23b   : > { %v2041_v42 = vpop.f32.mrf.mxu1 }
 0x23c   : > { %v1588_v54 = vadd.f32 %v1522_v37, %v1290_v29  ;;  %v2153_v58 = vadd.f32 %v2041_v42, %v4715_v27 }
 0x23d   : > { %v2936_v39 = vpop.f32.mrf.mxu0 }
 0x23e   : > { %2080 = vmatmul.bf16.gmra.mxu1 %v4717_v1  ;;  %2379 = vmatmul.bf16.gmra.mxu2 %v2258_v23  ;;  %v4890_v20 = vadd.f32 %v1820_v53, %v1588_v54  ;;  %v2259_v53 = vpack.c.bf16 %v2237_v21, %v2236_v22 }
 0x23f   : > { %2677 = vmatmul.bf16.gmra.mxu3 %v2556_v18 }
 0x240   : > { %2975 = vmatmul.bf16.gmra.mxu0 %v4729_v16  ;;  %v1960_v16 = vpack.c.bf16 %v1938_v14, %v1937_v55 }
 0x241   : > { %v2340_v11 = vpop.f32.mrf.mxu2 }
 0x242   : > { %v2638_v60 = vpop.f32.mrf.mxu3  ;;  %v2452_v61 = vadd.f32 %v2340_v11, %v2153_v58 }
 0x243   : > { %v2043_v3 = vpop.f32.mrf.mxu1 }
 0x244   : > { %v2750_v33 = vadd.f32 %v2638_v60, %v2452_v61  ;;  %v2154_v1 = vadd.f32 %v2043_v3, %v4723_v6 }
 0x245   : > { %v2938_v32 = vpop.f32.mrf.mxu0 }
 0x246   : > { %v3048_v27 = vadd.f32 %v2936_v39, %v2750_v33 }
 0x248   : > { %v3249_v59 = vmul.f32 %v3048_v27, %v3048_v27 }
 0x249   : > { %v2342_v10 = vpop.f32.mrf.mxu2 }
 0x24a   : > { %v2453_v26 = vadd.f32 %v2342_v10, %v2154_v1  ;;  %v2640_v8 = vpop.f32.mrf.mxu3  ;;  %v4979_v10 = vld [vmem:[#allocation7_spill] sm:$0xff] }
 0x24b   : > { %v2046_v36 = vpop.f32.mrf.mxu1 }
 0x24c   : > { %v2751_v40 = vadd.f32 %v2640_v8, %v2453_v26  ;;  %v2155_v23 = vadd.f32 %v2046_v36, %v4727_v12 }
 0x24d   : > { %v2941_v28 = vpop.f32.mrf.mxu0 }
 0x24e   : > { %v3049_v17 = vadd.f32 %v2938_v32, %v2751_v40  ;;  %2085 = vmatmul.bf16.gmra.mxu1 %v1960_v16  ;;  %2384 = vmatmul.bf16.gmra.mxu2 %v2259_v53  ;;  %v4980_v16 = vld [vmem:[#allocation4_spill] sm:$0xff] }
 0x24f   : > { %2682 = vmatmul.bf16.gmra.mxu3 %v2557_v50 }
 0x250   : > { %2980 = vmatmul.bf16.gmra.mxu0 %v4753_v45  ;;  %v3956_v6 = vpack.c.bf16 %v3049_v17, %v3048_v27  ;;  %v3209_v29 = vadd.f32 %v3049_v17, %v3048_v27  ;;  %v3250_v37 = vmul.f32 %v3049_v17, %v3049_v17 }
 0x251   : > { %v2345_v42 = vpop.f32.mrf.mxu2 }
 0x252   : > { %3957 = vst [vmem:[%s4160_s30] sm:$0xff] %v3956_v6   ;;  %v3281_v18 = vadd.f32 %v3250_v37, %v3249_v59  ;;  %v2454_v54 = vadd.f32 %v2345_v42, %v2155_v23  ;;  %v2643_v39 = vpop.f32.mrf.mxu3  ;;  %v1941_v6 = vld [vmem:[#allocation3 + $0x189] sm:$0xff] }
 0x253   : > { %v2048_v58 = vpop.f32.mrf.mxu1  ;;  %v4981_v42 = vld [vmem:[#allocation5_spill] sm:$0xff] }
 0x254   : > { %v2752_v11 = vadd.f32 %v2643_v39, %v2454_v54  ;;  %v2156_v55 = vadd.f32 %v2048_v58, %v4735_v57  ;;  %v2538_v54 = vld [vmem:[#allocation3 + $0x1a8] sm:$0xff]  ;;  %v2539_v39 = vld [vmem:[#allocation3 + $0x1b0] sm:$0xff] }
 0x255   : > { %v2943_v60 = vpop.f32.mrf.mxu0 }
 0x256   : > { %v3050_v61 = vadd.f32 %v2941_v28, %v2752_v11 }
 0x258   : > { %v3210_v3 = vadd.f32 %v3209_v29, %v3050_v61  ;;  %v3251_v32 = vmul.f32 %v3050_v61, %v3050_v61  ;;  %v2240_v29 = vld [vmem:[#allocation3 + $0x1a7] sm:$0xff] }
 0x259   : > { %v2347_v33 = vpop.f32.mrf.mxu2 }
 0x25a   : > { %v3282_v14 = vadd.f32 %v3281_v18, %v3251_v32  ;;  %v2455_v22 = vadd.f32 %v2347_v33, %v2156_v55  ;;  %v2645_v21 = vpop.f32.mrf.mxu3  ;;  %v2559_v33 = vpack.c.bf16 %v2539_v39, %v2538_v54 }
 0x25b   : > { %v2051_v1 = vpop.f32.mrf.mxu1 }
 0x25c   : > { %v2753_v12 = vadd.f32 %v2645_v21, %v2455_v22  ;;  %v2157_v53 = vadd.f32 %v2051_v1, %v4980_v16 }
 0x25d   : > { %v2946_v7 = vpop.f32.mrf.mxu0 }
 0x25e   : > { %v3051_v51 = vadd.f32 %v2943_v60, %v2753_v12  ;;  %2090 = vmatmul.bf16.gmra.mxu1 %v4753_v45  ;;  %2389 = vmatmul.bf16.gmra.mxu2 %v4755_v9  ;;  %v1942_v9 = vld [vmem:[#allocation3 + $0x191] sm:$0xff] }
 0x25f   : > { %2687 = vmatmul.bf16.gmra.mxu3 %v4757_v15  ;;  %v2241_v15 = vld [vmem:[#allocation3 + $0x1af] sm:$0xff] }
 0x260   : > { %2985 = vmatmul.bf16.gmra.mxu0 %v4979_v10  ;;  %v3961_v26 = vpack.c.bf16 %v3051_v51, %v3050_v61  ;;  %v3211_v8 = vadd.f32 %v3210_v3, %v3051_v51  ;;  %v3252_v57 = vmul.f32 %v3051_v51, %v3051_v51  ;;  %v1962_v3 = vpack.c.bf16 %v1942_v9, %v1941_v6  ;;  %v4982_v51 = vld [vmem:[#allocation6_spill] sm:$0xff] }
 0x261   : > { %v2350_v27 = vpop.f32.mrf.mxu2  ;;  %v2261_v32 = vpack.c.bf16 %v2241_v15, %v2240_v29  ;;  %v2540_v29 = vld [vmem:[#allocation3 + $0x1c8] sm:$0xff]  ;;  %v2541_v15 = vld [vmem:[#allocation3 + $0x1d0] sm:$0xff] }
 0x262   : > { %4048 = vst [vmem:[%s4160_s30 + $0x8] sm:$0xff] %v3961_v26   ;;  %v3283_v36 = vadd.f32 %v3282_v14, %v3252_v57  ;;  %v2456_v50 = vadd.f32 %v2350_v27, %v2157_v53  ;;  %v2648_v40 = vpop.f32.mrf.mxu3 }
 0x263   : > { %v2053_v28 = vpop.f32.mrf.mxu1 }
 0x264   : > { %v2754_v17 = vadd.f32 %v2648_v40, %v2456_v50  ;;  %v2158_v18 = vadd.f32 %v2053_v28, %v4981_v42  ;;  %v1943_v40 = vld [vmem:[#allocation3 + $0x1a9] sm:$0xff]  ;;  %v1944_v28 = vld [vmem:[#allocation3 + $0x1b1] sm:$0xff] }
 0x265   : > { %v2948_v59 = vpop.f32.mrf.mxu0  ;;  %v1963_v54 = vpack.c.bf16 %v1944_v28, %v1943_v40  ;;  %v2542_v40 = vld [vmem:[#allocation3 + $0x1e8] sm:$0xff]  ;;  %v2543_v28 = vld [vmem:[#allocation3 + $0x1f0] sm:$0xff] }
 0x266   : > { %v3052_v45 = vadd.f32 %v2946_v7, %v2754_v17  ;;  %v2242_v17 = vld [vmem:[#allocation3 + $0x1c7] sm:$0xff] }
 0x268   : > { %v3212_v37 = vadd.f32 %v3211_v8, %v3052_v45  ;;  %v3253_v23 = vmul.f32 %v3052_v45, %v3052_v45 }
 0x269   : > { %v2352_v58 = vpop.f32.mrf.mxu2 }
 0x26a   : > { %v3284_v11 = vadd.f32 %v3283_v36, %v3253_v23  ;;  %v2457_v60 = vadd.f32 %v2352_v58, %v2158_v18  ;;  %v2650_v61 = vpop.f32.mrf.mxu3 }
 0x26b   : > { %v2056_v55 = vpop.f32.mrf.mxu1 }
 0x26c   : > { %v2755_v14 = vadd.f32 %v2650_v61, %v2457_v60  ;;  %v2159_v10 = vadd.f32 %v2056_v55, %v4982_v51 }
 0x26d   : > { %v2951_v22 = vpop.f32.mrf.mxu0 }
 0x26e   : > { %v3053_v21 = vadd.f32 %v2948_v59, %v2755_v14  ;;  %2095 = vmatmul.bf16.gmra.mxu1 %v1962_v3  ;;  %2394 = vmatmul.bf16.gmra.mxu2 %v2261_v32  ;;  %v2243_v59 = vld [vmem:[#allocation3 + $0x1cf] sm:$0xff] }
 0x26f   : > { %2692 = vmatmul.bf16.gmra.mxu3 %v2559_v33  ;;  %v2262_v39 = vpack.c.bf16 %v2243_v59, %v2242_v17  ;;  %v4984_v14 = vld [vmem:[#allocation9_spill] sm:$0xff] }
 0x270   : > { %2990 = vmatmul.bf16.gmra.mxu0 %v4803_v0  ;;  %v3966_v1 = vpack.c.bf16 %v3053_v21, %v3052_v45  ;;  %v3213_v12 = vadd.f32 %v3212_v37, %v3053_v21  ;;  %v3254_v7 = vmul.f32 %v3053_v21, %v3053_v21  ;;  %v4983_v45 = vld [vmem:[#allocation8_spill] sm:$0xff] }
 0x271   : > { %v2355_v26 = vpop.f32.mrf.mxu2 }
 0x272   : > { %4049 = vst [vmem:[%s4160_s30 + $0x10] sm:$0xff] %v3966_v1   ;;  %v3285_v8 = vadd.f32 %v3284_v11, %v3254_v7  ;;  %v2458_v57 = vadd.f32 %v2355_v26, %v2159_v10  ;;  %v2653_v16 = vpop.f32.mrf.mxu3  ;;  %v2560_v11 = vpack.c.bf16 %v2541_v15, %v2540_v29  ;;  %v2561_v15 = vpack.c.bf16 %v2543_v28, %v2542_v40 }
 0x273   : > { %v2058_v53 = vpop.f32.mrf.mxu1 }
 0x274   : > { %v2756_v27 = vadd.f32 %v2653_v16, %v2458_v57  ;;  %v2160_v9 = vadd.f32 %v2058_v53, %v4983_v45  ;;  %v1945_v57 = vld [vmem:[#allocation3 + $0x1c9] sm:$0xff]  ;;  %v1946_v16 = vld [vmem:[#allocation3 + $0x1d1] sm:$0xff] }
 0x275   : > { %v2953_v36 = vpop.f32.mrf.mxu0  ;;  %v2244_v53 = vld [vmem:[#allocation3 + $0x1e7] sm:$0xff]  ;;  %v1964_v45 = vpack.c.bf16 %v1946_v16, %v1945_v57  ;;  %v2843_v57 = vld [vmem:[#allocation3 + $0x211] sm:$0xff] }
 0x276   : > { %v3054_v50 = vadd.f32 %v2951_v22, %v2756_v27  ;;  %v2245_v27 = vld [vmem:[#allocation3 + $0x1ef] sm:$0xff] }
 0x278   : > { %v3214_v6 = vadd.f32 %v3213_v12, %v3054_v50  ;;  %v3255_v0 = vmul.f32 %v3054_v50, %v3054_v50 }
 0x279   : > { %v2357_v37 = vpop.f32.mrf.mxu2 }
 0x27a   : > { %v3286_v23 = vadd.f32 %v3285_v8, %v3255_v0  ;;  %v2459_v42 = vadd.f32 %v2357_v37, %v2160_v9  ;;  %v2655_v18 = vpop.f32.mrf.mxu3  ;;  %v2263_v9 = vpack.c.bf16 %v2245_v27, %v2244_v53 }
 0x27b   : > { %v2061_v58 = vpop.f32.mrf.mxu1 }
 0x27c   : > { %v2757_v60 = vadd.f32 %v2655_v18, %v2459_v42  ;;  %v2161_v22 = vadd.f32 %v2061_v58, %v4984_v14 }
 0x27d   : > { %v2956_v61 = vpop.f32.mrf.mxu0 }
 0x27e   : > { %v3055_v3 = vadd.f32 %v2953_v36, %v2757_v60  ;;  %2100 = vmatmul.bf16.gmra.mxu1 %v1963_v54  ;;  %2399 = vmatmul.bf16.gmra.mxu2 %v2262_v39  ;;  %v4985_v39 = vld [vmem:[#allocation10_spill] sm:$0xff] }
 0x27f   : > { %2697 = vmatmul.bf16.gmra.mxu3 %v2560_v11 }
 0x280   : > { %2995 = vmatmul.bf16.gmra.mxu0 %v4812_v41  ;;  %v3971_v32 = vpack.c.bf16 %v3055_v3, %v3054_v50  ;;  %v3215_v55 = vadd.f32 %v3214_v6, %v3055_v3  ;;  %v3256_v33 = vmul.f32 %v3055_v3, %v3055_v3 }
 0x281   : > { %v2360_v21 = vpop.f32.mrf.mxu2 }
 0x282   : > { %4050 = vst [vmem:[%s4160_s30 + $0x18] sm:$0xff] %v3971_v32   ;;  %v3287_v1 = vadd.f32 %v3286_v23, %v3256_v33  ;;  %v2460_v12 = vadd.f32 %v2360_v21, %v2161_v22  ;;  %v2658_v7 = vpop.f32.mrf.mxu3  ;;  %v1947_v22 = vld [vmem:[#allocation3 + $0x1e9] sm:$0xff]  ;;  %v1948_v21 = vld [vmem:[#allocation3 + $0x1f1] sm:$0xff] }
 0x283   : > { %v2063_v51 = vpop.f32.mrf.mxu1 }
 0x284   : > { %v2758_v10 = vadd.f32 %v2658_v7, %v2460_v12  ;;  %v2162_v50 = vadd.f32 %v2063_v51, %v4806_v34  ;;  %v2247_v12 = vld [vmem:[#allocation3 + $0x20f] sm:$0xff] }
 0x285   : > { %v2958_v26 = vpop.f32.mrf.mxu0  ;;  %v2544_v7 = vld [vmem:[#allocation3 + $0x208] sm:$0xff] }
 0x286   : > { %v3056_v8 = vadd.f32 %v2956_v61, %v2758_v10 }
 0x288   : > { %v3216_v36 = vadd.f32 %v3215_v55, %v3056_v8  ;;  %v3257_v41 = vmul.f32 %v3056_v8, %v3056_v8 }
 0x289   : > { %v2362_v17 = vpop.f32.mrf.mxu2 }
 0x28a   : > { %v3288_v59 = vadd.f32 %v3287_v1, %v3257_v41  ;;  %v2461_v6 = vadd.f32 %v2362_v17, %v2162_v50  ;;  %v2660_v0 = vpop.f32.mrf.mxu3  ;;  %v2246_v1 = vld [vmem:[#allocation3 + $0x207] sm:$0xff]  ;;  %v1965_v41 = vpack.c.bf16 %v1948_v21, %v1947_v22 }
 0x28b   : > { %v2066_v29 = vpop.f32.mrf.mxu1  ;;  %v2264_v50 = vpack.c.bf16 %v2247_v12, %v2246_v1 }
 0x28c   : > { %v2759_v37 = vadd.f32 %v2660_v0, %v2461_v6  ;;  %v2163_v58 = vadd.f32 %v2066_v29, %v4985_v39 }
 0x28d   : > { %v2961_v23 = vpop.f32.mrf.mxu0 }
 0x28e   : > { %v3057_v42 = vadd.f32 %v2958_v26, %v2759_v37  ;;  %2105 = vmatmul.bf16.gmra.mxu1 %v1964_v45  ;;  %2404 = vmatmul.bf16.gmra.mxu2 %v2263_v9  ;;  %v2545_v26 = vld [vmem:[#allocation3 + $0x210] sm:$0xff] }
 0x28f   : > { %2702 = vmatmul.bf16.gmra.mxu3 %v2561_v15  ;;  %v2562_v28 = vpack.c.bf16 %v2545_v26, %v2544_v7 }
 0x290   : > { %3000 = vmatmul.bf16.gmra.mxu0 %v4821_v49  ;;  %v3976_v34 = vpack.c.bf16 %v3057_v42, %v3056_v8  ;;  %v3217_v18 = vadd.f32 %v3216_v36, %v3057_v42  ;;  %v3258_v54 = vmul.f32 %v3057_v42, %v3057_v42  ;;  %v2842_v8 = vld [vmem:[#allocation3 + $0x209] sm:$0xff] }
 0x291   : > { %v2365_v11 = vpop.f32.mrf.mxu2  ;;  %v2860_v17 = vpack.c.bf16 %v2843_v57, %v2842_v8 }
 0x292   : > { %4051 = vst [vmem:[%s4160_s30 + $0x20] sm:$0xff] %v3976_v34   ;;  %v3289_v60 = vadd.f32 %v3288_v59, %v3258_v54  ;;  %v2462_v61 = vadd.f32 %v2365_v11, %v2163_v58  ;;  %v2663_v3 = vpop.f32.mrf.mxu3  ;;  %v2248_v58 = vld [vmem:[#allocation3 + $0x227] sm:$0xff]  ;;  %v2249_v11 = vld [vmem:[#allocation3 + $0x22f] sm:$0xff] }
 0x293   : > { %v2068_v32 = vpop.f32.mrf.mxu1  ;;  %v2265_v12 = vpack.c.bf16 %v2249_v11, %v2248_v58 }
 0x294   : > { %v2760_v55 = vadd.f32 %v2663_v3, %v2462_v61  ;;  %v2164_v10 = vadd.f32 %v2068_v32, %v4815_v63 }
 0x295   : > { %v2963_v33 = vpop.f32.mrf.mxu0 }
 0x296   : > { %v3058_v14 = vadd.f32 %v2961_v23, %v2760_v55  ;;  %v2547_v55 = vld [vmem:[#allocation3 + $0x230] sm:$0xff] }
 0x298   : > { %v3218_v49 = vadd.f32 %v3217_v18, %v3058_v14  ;;  %v3259_v51 = vmul.f32 %v3058_v14, %v3058_v14 }
 0x299   : > { %v2367_v16 = vpop.f32.mrf.mxu2 }
 0x29a   : > { %v3290_v53 = vadd.f32 %v3289_v60, %v3259_v51  ;;  %v2463_v27 = vadd.f32 %v2367_v16, %v2164_v10  ;;  %v2665_v36 = vpop.f32.mrf.mxu3  ;;  %v2546_v60 = vld [vmem:[#allocation3 + $0x228] sm:$0xff] }
 0x29b   : > { %v2071_v40 = vpop.f32.mrf.mxu1 }
 0x29c   : > { %v2761_v59 = vadd.f32 %v2665_v36, %v2463_v27  ;;  %v2165_v29 = vadd.f32 %v2071_v40, %v4818_v31 }
 0x29d   : > { %v2966_v6 = vpop.f32.mrf.mxu0 }
 0x29e   : > { %v3059_v0 = vadd.f32 %v2963_v33, %v2761_v59  ;;  %2110 = vmatmul.bf16.gmra.mxu1 %v1965_v41  ;;  %2409 = vmatmul.bf16.gmra.mxu2 %v2264_v50  ;;  %v2844_v33 = vld [vmem:[#allocation3 + $0x229] sm:$0xff] }
 0x29f   : > { %2707 = vmatmul.bf16.gmra.mxu3 %v2562_v28 }
 0x2a0   : > { %3005 = vmatmul.bf16.gmra.mxu0 %v2860_v17  ;;  %v3981_v63 = vpack.c.bf16 %v3059_v0, %v3058_v14  ;;  %v3219_v45 = vadd.f32 %v3218_v49, %v3059_v0  ;;  %v3260_v9 = vmul.f32 %v3059_v0, %v3059_v0  ;;  %v2845_v14 = vld [vmem:[#allocation3 + $0x231] sm:$0xff]  ;;  %v2563_v49 = vpack.c.bf16 %v2547_v55, %v2546_v60 }
 0x2a1   : > { %v2370_v15 = vpop.f32.mrf.mxu2  ;;  %v2861_v51 = vpack.c.bf16 %v2845_v14, %v2844_v33 }
 0x2a2   : > { %4052 = vst [vmem:[%s4160_s30 + $0x28] sm:$0xff] %v3981_v63   ;;  %v3291_v37 = vadd.f32 %v3290_v53, %v3260_v9  ;;  %v2464_v23 = vadd.f32 %v2370_v15, %v2165_v29  ;;  %v2668_v42 = vpop.f32.mrf.mxu3 }
 0x2a3   : > { %v2073_v34 = vpop.f32.mrf.mxu1 }
 0x2a4   : > { %v2762_v18 = vadd.f32 %v2668_v42, %v2464_v23  ;;  %v2166_v32 = vadd.f32 %v2073_v34, %v4826_v35 }
 0x2a5   : > { %v2968_v54 = vpop.f32.mrf.mxu0 }
 0x2a6   : > { %v3060_v39 = vadd.f32 %v2966_v6, %v2762_v18 }
 0x2a8   : > { %v3220_v61 = vadd.f32 %v3219_v45, %v3060_v39  ;;  %v3261_v3 = vmul.f32 %v3060_v39, %v3060_v39 }
 0x2a9   : > { %v2372_v31 = vpop.f32.mrf.mxu2 }
 0x2aa   : > { %v3292_v22 = vadd.f32 %v3291_v37, %v3261_v3  ;;  %v2465_v21 = vadd.f32 %v2372_v31, %v2166_v32  ;;  %v2670_v1 = vpop.f32.mrf.mxu3 }
 0x2ab   : > { %v2076_v7 = vpop.f32.mrf.mxu1 }
 0x2ac   : > { %v2763_v10 = vadd.f32 %v2670_v1, %v2465_v21  ;;  %v2167_v53 = vadd.f32 %v2076_v7, %v4829_v52 }
 0x2ad   : > { %v2971_v26 = vpop.f32.mrf.mxu0 }
 0x2ae   : > { %v3061_v8 = vadd.f32 %v2968_v54, %v2763_v10  ;;  %2115 = vmatmul.bf16.gmra.mxu1 %v2860_v17  ;;  %2414 = vmatmul.bf16.gmra.mxu2 %v2265_v12 }
 0x2af   : > { %2712 = vmatmul.bf16.gmra.mxu3 %v2563_v49 }
 0x2b0   : > { %3010 = vmatmul.bf16.gmra.mxu0 %v2861_v51  ;;  %v3986_v35 = vpack.c.bf16 %v3061_v8, %v3060_v39  ;;  %v3221_v57 = vadd.f32 %v3220_v61, %v3061_v8  ;;  %v3262_v16 = vmul.f32 %v3061_v8, %v3061_v8 }
 0x2b1   : > { %v2375_v27 = vpop.f32.mrf.mxu2 }
 0x2b2   : > { %4053 = vst [vmem:[%s4160_s30 + $0x30] sm:$0xff] %v3986_v35   ;;  %v3293_v36 = vadd.f32 %v3292_v22, %v3262_v16  ;;  %v2466_v41 = vadd.f32 %v2375_v27, %v2167_v53  ;;  %v2673_v50 = vpop.f32.mrf.mxu3 }
 0x2b3   : > { %v2078_v40 = vpop.f32.mrf.mxu1 }
 0x2b4   : > { %v2764_v28 = vadd.f32 %v2673_v50, %v2466_v41  ;;  %v2168_v63 = vadd.f32 %v2078_v40, %v4833_v56 }
 0x2b5   : > { %v2973_v59 = vpop.f32.mrf.mxu0 }
 0x2b6   : > { %v3062_v6 = vadd.f32 %v2971_v26, %v2764_v28 }
 0x2b8   : > { %v3222_v0 = vadd.f32 %v3221_v57, %v3062_v6  ;;  %v3263_v17 = vmul.f32 %v3062_v6, %v3062_v6 }
 0x2b9   : > { %v2377_v45 = vpop.f32.mrf.mxu2 }
 0x2ba   : > { %v3294_v9 = vadd.f32 %v3293_v36, %v3263_v17  ;;  %v2467_v29 = vadd.f32 %v2377_v45, %v2168_v63  ;;  %v2675_v15 = vpop.f32.mrf.mxu3 }
 0x2bb   : > { %v2081_v37 = vpop.f32.mrf.mxu1 }
 0x2bc   : > { %v2765_v52 = vadd.f32 %v2675_v15, %v2467_v29  ;;  %v2169_v39 = vadd.f32 %v2081_v37, %v4837_v46 }
 0x2bd   : > { %v2976_v23 = vpop.f32.mrf.mxu0 }
 0x2be   : > { %v3063_v42 = vadd.f32 %v2973_v59, %v2765_v52 }
 0x2c0   : > { %v3991_v34 = vpack.c.bf16 %v3063_v42, %v3062_v6  ;;  %v3223_v18 = vadd.f32 %v3222_v0, %v3063_v42  ;;  %v3264_v54 = vmul.f32 %v3063_v42, %v3063_v42 }
 0x2c1   : > { %v2380_v58 = vpop.f32.mrf.mxu2 }
 0x2c2   : > { %4054 = vst [vmem:[%s4160_s30 + $0x38] sm:$0xff] %v3991_v34   ;;  %v3295_v11 = vadd.f32 %v3294_v9, %v3264_v54  ;;  %v2468_v60 = vadd.f32 %v2380_v58, %v2169_v39  ;;  %v2678_v61 = vpop.f32.mrf.mxu3 }
 0x2c3   : > { %v2083_v3 = vpop.f32.mrf.mxu1 }
 0x2c4   : > { %v2766_v56 = vadd.f32 %v2678_v61, %v2468_v60  ;;  %v2170_v31 = vadd.f32 %v2083_v3, %v4840_v30 }
 0x2c5   : > { %v2978_v32 = vpop.f32.mrf.mxu0 }
 0x2c6   : > { %v3064_v55 = vadd.f32 %v2976_v23, %v2766_v56 }
 0x2c8   : > { %v3224_v33 = vadd.f32 %v3223_v18, %v3064_v55  ;;  %v3265_v14 = vmul.f32 %v3064_v55, %v3064_v55 }
 0x2c9   : > { %v2382_v22 = vpop.f32.mrf.mxu2 }
 0x2ca   : > { %v3296_v21 = vadd.f32 %v3295_v11, %v3265_v14  ;;  %v2469_v1 = vadd.f32 %v2382_v22, %v2170_v31  ;;  %v2680_v12 = vpop.f32.mrf.mxu3 }
 0x2cb   : > { %v2086_v7 = vpop.f32.mrf.mxu1 }
 0x2cc   : > { %v2767_v46 = vadd.f32 %v2680_v12, %v2469_v1  ;;  %v2171_v35 = vadd.f32 %v2086_v7, %v4844_v2 }
 0x2cd   : > { %v2981_v49 = vpop.f32.mrf.mxu0 }
 0x2ce   : > { %v3065_v51 = vadd.f32 %v2978_v32, %v2767_v46 }
 0x2d0   : > { %v3996_v10 = vpack.c.bf16 %v3065_v51, %v3064_v55  ;;  %v3225_v26 = vadd.f32 %v3224_v33, %v3065_v51  ;;  %v3266_v8 = vmul.f32 %v3065_v51, %v3065_v51 }
 0x2d1   : > { %v2385_v57 = vpop.f32.mrf.mxu2 }
 0x2d2   : > { %4055 = vst [vmem:[%s4160_s30 + $0x40] sm:$0xff] %v3996_v10   ;;  %v3297_v16 = vadd.f32 %v3296_v21, %v3266_v8  ;;  %v2470_v53 = vadd.f32 %v2385_v57, %v2171_v35  ;;  %v2683_v27 = vpop.f32.mrf.mxu3 }
 0x2d3   : > { %v2088_v36 = vpop.f32.mrf.mxu1 }
 0x2d4   : > { %v2768_v30 = vadd.f32 %v2683_v27, %v2470_v53  ;;  %v2172_v59 = vadd.f32 %v2088_v36, %v4847_v24 }
 0x2d5   : > { %v2983_v41 = vpop.f32.mrf.mxu0 }
 0x2d6   : > { %v3066_v50 = vadd.f32 %v2981_v49, %v2768_v30 }
 0x2d8   : > { %v3226_v40 = vadd.f32 %v3225_v26, %v3066_v50  ;;  %v3267_v28 = vmul.f32 %v3066_v50, %v3066_v50 }
 0x2d9   : > { %v2387_v6 = vpop.f32.mrf.mxu2 }
 0x2da   : > { %v3298_v0 = vadd.f32 %v3297_v16, %v3267_v28  ;;  %v2471_v17 = vadd.f32 %v2387_v6, %v2172_v59  ;;  %v2685_v63 = vpop.f32.mrf.mxu3 }
 0x2db   : > { %v2091_v45 = vpop.f32.mrf.mxu1 }
 0x2dc   : > { %v2769_v2 = vadd.f32 %v2685_v63, %v2471_v17  ;;  %v2173_v23 = vadd.f32 %v2091_v45, %v4851_v25 }
 0x2dd   : > { %v2986_v9 = vpop.f32.mrf.mxu0 }
 0x2de   : > { %v3067_v29 = vadd.f32 %v2983_v41, %v2769_v2 }
 0x2e0   : > { %v4001_v15 = vpack.c.bf16 %v3067_v29, %v3066_v50  ;;  %v3227_v37 = vadd.f32 %v3226_v40, %v3067_v29  ;;  %v3268_v52 = vmul.f32 %v3067_v29, %v3067_v29 }
 0x2e1   : > { %v2390_v42 = vpop.f32.mrf.mxu2 }
 0x2e2   : > { %4056 = vst [vmem:[%s4160_s30 + $0x48] sm:$0xff] %v4001_v15   ;;  %v3299_v34 = vadd.f32 %v3298_v0, %v3268_v52  ;;  %v2472_v18 = vadd.f32 %v2390_v42, %v2173_v23  ;;  %v2688_v54 = vpop.f32.mrf.mxu3 }
 0x2e3   : > { %v2093_v39 = vpop.f32.mrf.mxu1 }
 0x2e4   : > { %v2770_v24 = vadd.f32 %v2688_v54, %v2472_v18  ;;  %v2174_v3 = vadd.f32 %v2093_v39, %v4854_v47 }
 0x2e5   : > { %v2988_v58 = vpop.f32.mrf.mxu0 }
 0x2e6   : > { %v3068_v11 = vadd.f32 %v2986_v9, %v2770_v24 }
 0x2e8   : > { %v3228_v60 = vadd.f32 %v3227_v37, %v3068_v11  ;;  %v3269_v61 = vmul.f32 %v3068_v11, %v3068_v11 }
 0x2e9   : > { %v2392_v56 = vpop.f32.mrf.mxu2 }
 0x2ea   : > { %v3300_v32 = vadd.f32 %v3299_v34, %v3269_v61  ;;  %v2473_v55 = vadd.f32 %v2392_v56, %v2174_v3  ;;  %v2690_v33 = vpop.f32.mrf.mxu3 }
 0x2eb   : > { %v2096_v14 = vpop.f32.mrf.mxu1 }
 0x2ec   : > { %v2771_v25 = vadd.f32 %v2690_v33, %v2473_v55  ;;  %v2175_v7 = vadd.f32 %v2096_v14, %v4858_v4 }
 0x2ed   : > { %v2991_v31 = vpop.f32.mrf.mxu0 }
 0x2ee   : > { %v3069_v22 = vadd.f32 %v2988_v58, %v2771_v25 }
 0x2f0   : > { %v4006_v21 = vpack.c.bf16 %v3069_v22, %v3068_v11  ;;  %v3229_v1 = vadd.f32 %v3228_v60, %v3069_v22  ;;  %v3270_v12 = vmul.f32 %v3069_v22, %v3069_v22 }
 0x2f1   : > { %v2395_v46 = vpop.f32.mrf.mxu2 }
 0x2f2   : > { %4057 = vst [vmem:[%s4160_s30 + $0x50] sm:$0xff] %v4006_v21   ;;  %v3301_v49 = vadd.f32 %v3300_v32, %v3270_v12  ;;  %v2474_v51 = vadd.f32 %v2395_v46, %v2175_v7  ;;  %v2693_v10 = vpop.f32.mrf.mxu3 }
 0x2f3   : > { %v2098_v26 = vpop.f32.mrf.mxu1 }
 0x2f4   : > { %v2772_v47 = vadd.f32 %v2693_v10, %v2474_v51  ;;  %v2176_v53 = vadd.f32 %v2098_v26, %v4861_v13 }
 0x2f5   : > { %v2993_v8 = vpop.f32.mrf.mxu0 }
 0x2f6   : > { %v3070_v35 = vadd.f32 %v2991_v31, %v2772_v47 }
 0x2f8   : > { %v3230_v57 = vadd.f32 %v3229_v1, %v3070_v35  ;;  %v3271_v16 = vmul.f32 %v3070_v35, %v3070_v35 }
 0x2f9   : > { %v2397_v27 = vpop.f32.mrf.mxu2 }
 0x2fa   : > { %v3302_v36 = vadd.f32 %v3301_v49, %v3271_v16  ;;  %v2475_v30 = vadd.f32 %v2397_v27, %v2176_v53  ;;  %v2695_v41 = vpop.f32.mrf.mxu3 }
 0x2fb   : > { %v2101_v50 = vpop.f32.mrf.mxu1 }
 0x2fc   : > { %v2773_v4 = vadd.f32 %v2695_v41, %v2475_v30  ;;  %v2177_v17 = vadd.f32 %v2101_v50, %v4865_v62 }
 0x2fd   : > { %v2996_v40 = vpop.f32.mrf.mxu0 }
 0x2fe   : > { %v3071_v28 = vadd.f32 %v2993_v8, %v2773_v4 }
 0x300   : > { %v4011_v59 = vpack.c.bf16 %v3071_v28, %v3070_v35  ;;  %v3231_v6 = vadd.f32 %v3230_v57, %v3071_v28  ;;  %v3272_v0 = vmul.f32 %v3071_v28, %v3071_v28 }
 0x301   : > { %v2400_v63 = vpop.f32.mrf.mxu2 }
 0x302   : > { %4058 = vst [vmem:[%s4160_s30 + $0x58] sm:$0xff] %v4011_v59   ;;  %v3303_v45 = vadd.f32 %v3302_v36, %v3272_v0  ;;  %v2476_v2 = vadd.f32 %v2400_v63, %v2177_v17  ;;  %v2698_v9 = vpop.f32.mrf.mxu3 }
 0x303   : > { %v2103_v29 = vpop.f32.mrf.mxu1 }
 0x304   : > { %v2774_v13 = vadd.f32 %v2698_v9, %v2476_v2  ;;  %v2178_v42 = vadd.f32 %v2103_v29, %v4868_v48 }
 0x305   : > { %v2998_v15 = vpop.f32.mrf.mxu0 }
 0x306   : > { %v3072_v37 = vadd.f32 %v2996_v40, %v2774_v13 }
 0x308   : > { %v3232_v52 = vadd.f32 %v3231_v6, %v3072_v37  ;;  %v3273_v23 = vmul.f32 %v3072_v37, %v3072_v37 }
 0x309   : > { %v2402_v34 = vpop.f32.mrf.mxu2 }
 0x30a   : > { %v3304_v18 = vadd.f32 %v3303_v45, %v3273_v23  ;;  %v2477_v54 = vadd.f32 %v2402_v34, %v2178_v42  ;;  %v2700_v39 = vpop.f32.mrf.mxu3 }
 0x30b   : > { %v2106_v24 = vpop.f32.mrf.mxu1 }
 0x30c   : > { %v2775_v62 = vadd.f32 %v2700_v39, %v2477_v54  ;;  %v2179_v56 = vadd.f32 %v2106_v24, %v4872_v38 }
 0x30d   : > { %v3001_v58 = vpop.f32.mrf.mxu0 }
 0x30e   : > { %v3073_v11 = vadd.f32 %v2998_v15, %v2775_v62 }
 0x310   : > { %v4016_v60 = vpack.c.bf16 %v3073_v11, %v3072_v37  ;;  %v3233_v61 = vadd.f32 %v3232_v52, %v3073_v11  ;;  %v3274_v3 = vmul.f32 %v3073_v11, %v3073_v11 }
 0x311   : > { %v2405_v32 = vpop.f32.mrf.mxu2 }
 0x312   : > { %4059 = vst [vmem:[%s4160_s30 + $0x60] sm:$0xff] %v4016_v60   ;;  %v3305_v55 = vadd.f32 %v3304_v18, %v3274_v3  ;;  %v2478_v33 = vadd.f32 %v2405_v32, %v2179_v56  ;;  %v2703_v14 = vpop.f32.mrf.mxu3 }
 0x313   : > { %v2108_v25 = vpop.f32.mrf.mxu1 }
 0x314   : > { %v2776_v48 = vadd.f32 %v2703_v14, %v2478_v33  ;;  %v2180_v12 = vadd.f32 %v2108_v25, %v4875_v43 }
 0x315   : > { %v3003_v31 = vpop.f32.mrf.mxu0 }
 0x316   : > { %v3074_v22 = vadd.f32 %v3001_v58, %v2776_v48 }
 0x318   : > { %v3234_v21 = vadd.f32 %v3233_v61, %v3074_v22  ;;  %v3275_v1 = vmul.f32 %v3074_v22, %v3074_v22 }
 0x319   : > { %v2407_v7 = vpop.f32.mrf.mxu2 }
 0x31a   : > { %v3306_v46 = vadd.f32 %v3305_v55, %v3275_v1  ;;  %v2479_v49 = vadd.f32 %v2407_v7, %v2180_v12  ;;  %v2705_v51 = vpop.f32.mrf.mxu3 }
 0x31b   : > { %v2111_v10 = vpop.f32.mrf.mxu1 }
 0x31c   : > { %v2777_v38 = vadd.f32 %v2705_v51, %v2479_v49  ;;  %v2181_v16 = vadd.f32 %v2111_v10, %v4879_v19  ;;  %v3248_v10 = vld [vmem:[%s4970_s6] sm:$0x1] }
 0x31d   : > { %v3006_v47 = vpop.f32.mrf.mxu0 }
 0x31e   : > { %v3075_v26 = vadd.f32 %v3003_v31, %v2777_v38 }
 0x320   : > { %v4021_v8 = vpack.c.bf16 %v3075_v26, %v3074_v22  ;;  %v3235_v35 = vadd.f32 %v3234_v21, %v3075_v26  ;;  %v3276_v57 = vmul.f32 %v3075_v26, %v3075_v26 }
 0x321   : > { %v2410_v53 = vpop.f32.mrf.mxu2 }
 0x322   : > { %4060 = vst [vmem:[%s4160_s30 + $0x68] sm:$0xff] %v4021_v8   ;;  %v3307_v27 = vadd.f32 %v3306_v46, %v3276_v57  ;;  %v2480_v36 = vadd.f32 %v2410_v53, %v2181_v16  ;;  %v2708_v30 = vpop.f32.mrf.mxu3  ;;  %v3208_v46 = vld [vmem:[%s4969_s5] sm:$0x1] }
 0x323   : > { %v2113_v41 = vpop.f32.mrf.mxu1 }
 0x324   : > { %v2778_v43 = vadd.f32 %v2708_v30, %v2480_v36  ;;  %v2182_v28 = vadd.f32 %v2113_v41, %v4882_v44 }
 0x325   : > { %v3008_v59 = vpop.f32.mrf.mxu0 }
 0x326   : > { %v3076_v50 = vadd.f32 %v3006_v47, %v2778_v43 }
 0x328   : > { %v3236_v4 = vadd.f32 %v3235_v35, %v3076_v50  ;;  %v3277_v40 = vmul.f32 %v3076_v50, %v3076_v50 }
 0x329   : > { %v2412_v6 = vpop.f32.mrf.mxu2 }
 0x32a   : > { %v3308_v0 = vadd.f32 %v3307_v27, %v3277_v40  ;;  %v2481_v17 = vadd.f32 %v2412_v6, %v2182_v28  ;;  %v2710_v63 = vpop.f32.mrf.mxu3 }
 0x32b   : > { %v2116_v45 = vpop.f32.mrf.mxu1 }
 0x32c   : > { %v2779_v19 = vadd.f32 %v2710_v63, %v2481_v17  ;;  %v2183_v15 = vadd.f32 %v2116_v45, %v4886_v5 }
 0x32d   : > { %v3011_v34 = vpop.f32.mrf.mxu0 }
 0x32e   : > { %v3077_v2 = vadd.f32 %v3008_v59, %v2779_v19 }
 0x330   : > { %v4026_v9 = vpack.c.bf16 %v3077_v2, %v3076_v50  ;;  %v3237_v29 = vadd.f32 %v3236_v4, %v3077_v2  ;;  %v3278_v13 = vmul.f32 %v3077_v2, %v3077_v2 }
 0x331   : > { %v2415_v37 = vpop.f32.mrf.mxu2 }
 0x332   : > { %4061 = vst [vmem:[%s4160_s30 + $0x70] sm:$0xff] %v4026_v9   ;;  %v3309_v52 = vadd.f32 %v3308_v0, %v3278_v13  ;;  %v2482_v23 = vadd.f32 %v2415_v37, %v2183_v15  ;;  %v2713_v42 = vpop.f32.mrf.mxu3 }
 0x333   : > { %v2118_v18 = vpop.f32.mrf.mxu1 }
 0x334   : > { %v2780_v44 = vadd.f32 %v2713_v42, %v2482_v23  ;;  %v2184_v62 = vadd.f32 %v2118_v18, %v4890_v20 }
 0x335   : > { %v3013_v5 = vpop.f32.mrf.mxu0 }
 0x336   : > { %v3078_v54 = vadd.f32 %v3011_v34, %v2780_v44 }
 0x338   : > { %v3238_v39 = vadd.f32 %v3237_v29, %v3078_v54  ;;  %v3279_v24 = vmul.f32 %v3078_v54, %v3078_v54 }
 0x339   : > { %v2417_v58 = vpop.f32.mrf.mxu2 }
 0x33a   : > { %v3310_v11 = vadd.f32 %v3309_v52, %v3279_v24  ;;  %v2483_v60 = vadd.f32 %v2417_v58, %v2184_v62  ;;  %v2715_v61 = vpop.f32.mrf.mxu3 }
 0x33c   : > { %v2781_v3 = vadd.f32 %v2715_v61, %v2483_v60 }
 0x33e   : > { %v3079_v56 = vadd.f32 %v3013_v5, %v2781_v3 }
 0x340   : > { %v4031_v32 = vpack.c.bf16 %v3079_v56, %v3078_v54  ;;  %v3239_v55 = vadd.f32 %v3238_v39, %v3079_v56  ;;  %v3280_v33 = vmul.f32 %v3079_v56, %v3079_v56 }
 0x342   : > { %4062 = vst [vmem:[%s4160_s30 + $0x78] sm:$0xff] %v4031_v32   ;;  %v3240_v14 = vrot.slane %v3239_v55, 4  ;;  %v3311_v25 = vadd.f32 %v3310_v11, %v3280_v33 }
 0x344   : > { %v3241_v48 = vadd.f32 %v3240_v14, %v3239_v55  ;;  %v3312_v31 = vrot.slane %v3311_v25, 4 }
 0x346   : > { %v3242_v22 = vrot.slane %v3241_v48, 2  ;;  %v3313_v21 = vadd.f32 %v3312_v31, %v3311_v25 }
 0x348   : > { %v3243_v1 = vadd.f32 %v3242_v22, %v3241_v48  ;;  %v3314_v12 = vrot.slane %v3313_v21, 2 }
 0x34a   : > { %v3244_v20 = vrot.slane %v3243_v1, 1  ;;  %v3315_v7 = vadd.f32 %v3314_v12, %v3313_v21 }
 0x34c   : > { %v3245_v49 = vadd.f32 %v3244_v20, %v3243_v1  ;;  %v3316_v51 = vrot.slane %v3315_v7, 1 }
 0x34e   : > { %v3246_v38 = vadd.f32 %v3245_v49, %v3208_v46  ;;  %v3317_v26 = vadd.f32 %v3316_v51, %v3315_v7 }
 0x350   : > { %3247 = vst [vmem:[%s4969_s5] sm:$0x1] %v3246_v38  ;;  %v3318_v47 = vadd.f32 %v3317_v26, %v3248_v10 }
 0x352   : > { %3319 = vst [vmem:[%s4970_s6] sm:$0x1] %v3318_v47 }
 0x353 PF: > { %s17_s21 = sadd.s32 1, %s4106_s21  }
 0x354   : > { %p14_p5 = scmp.ge.s32.totalorder %s17_s21, 4  }
 0x356   :  { %16 = sbr.rel (!%p14_p5) target bundleno = 1 (0x1), region = 96 }

// kernel: vgg_block_forward.4
= control target key start
LH: loop header
LB: loop body
LE: loop exit
PB: predicated region body
PF: predicated region fallthrough
CT: control target
= control target key end

     0   :  { %s4176_s21 = smov 0   ;;  %s5069_s0 = inlined_call_operand.vmem [shape: bf16[2,16,16,128], index: 0, kind: input, shape index: {}]   ;;  %s5070_s1 = inlined_call_operand.vmem [shape: f32[1,128], index: 1, kind: input, shape index: {}]   ;;  %s5071_s2 = inlined_call_operand.vmem [shape: f32[1,128], index: 2, kind: input, shape index: {}]   ;;  %s5072_s3 = inlined_call_operand.vmem [shape: bf16[9,128,128], index: 3, kind: input, shape index: {}]   ;;  %s5073_s4 = inlined_call_operand.vmem [shape: bf16[2,16,16,128], index: 4, kind: output, shape index: {0}]   ;;  %s5074_s5 = inlined_call_operand.vmem [shape: f32[1,128], index: 5, kind: output, shape index: {1}]   ;;  %s5075_s6 = inlined_call_operand.vmem [shape: f32[1,128], index: 6, kind: output, shape index: {2}]  }
   0x1 LB: > { %s3419_s22 = sadd.s32 4294967295, %s4138_s21   ;;  %p3423_p0 = scmp.ge.s32.totalorder %s4138_s21, 1  ;;  %s4138_s21 = sphi %s4176_s21, %s17_s21  }
   0x2   : > { %p207_p1 = scmp.lt.s32.totalorder %s4138_s21, 3 }
   0x4   : > { %p208_p2 = pnand %p3423_p0, %p207_p1 }
   0x6   : > { %211 = sbr.rel (%p208_p2) target bundleno = 851 (0x353), region = 36 }
   0xb   : > { %p237_p3 = scmp.lt.s32.totalorder %s3419_s22, 1  ;;  %p3428_p4 = scmp.ne.s32.totalorder %s3419_s22, 0 }
   0xd   : > { %s238_s23 = scalar_select %p237_p3, %s3419_s22, 1 }
   0xe   : > { %250 = sbr.rel (%p3428_p4) target bundleno = 94 (0x5e), region = 40 }
   0xf   : > { %s3847_s24 = sshll.u32 %s238_s23, 7 }
  0x10   : > { %s4187_s27 = scalar_lea.vmem %s5069_s0, %s3847_s24  ;;  %s4192_s30 = scalar_lea.vmem %s5073_s4, %s3847_s24 }
  0x13   : > { %v4140_v0 = vmov 0.0  }
  0x14   : > { %251 = vst [vmem:[#allocation3] sm:$0xff] %v4140_v0 }
  0x15   : > { %252 = vst [vmem:[#allocation3 + $0x8] sm:$0xff] %v4140_v0 }
  0x16   : > { %253 = vst [vmem:[#allocation3 + $0x10] sm:$0xff] %v4140_v0 }
  0x17   : > { %254 = vst [vmem:[#allocation3 + $0x18] sm:$0xff] %v4140_v0 }
  0x18   : > { %255 = vst [vmem:[#allocation3 + $0x20] sm:$0xff] %v4140_v0 }
  0x19   : > { %256 = vst [vmem:[#allocation3 + $0x28] sm:$0xff] %v4140_v0 }
  0x1a   : > { %257 = vst [vmem:[#allocation3 + $0x30] sm:$0xff] %v4140_v0 }
  0x1b   : > { %258 = vst [vmem:[#allocation3 + $0x38] sm:$0xff] %v4140_v0 }
  0x1c   : > { %259 = vst [vmem:[#allocation3 + $0x40] sm:$0xff] %v4140_v0 }
  0x1d   : > { %260 = vst [vmem:[#allocation3 + $0x48] sm:$0xff] %v4140_v0 }
  0x1e   : > { %261 = vst [vmem:[#allocation3 + $0x50] sm:$0xff] %v4140_v0 }
  0x1f   : > { %262 = vst [vmem:[#allocation3 + $0x58] sm:$0xff] %v4140_v0 }
  0x20   : > { %263 = vst [vmem:[#allocation3 + $0x60] sm:$0xff] %v4140_v0 }
  0x21   : > { %264 = vst [vmem:[#allocation3 + $0x68] sm:$0xff] %v4140_v0 }
  0x22   : > { %265 = vst [vmem:[#allocation3 + $0x70] sm:$0xff] %v4140_v0 }
  0x23   : > { %266 = vst [vmem:[#allocation3 + $0x78] sm:$0xff] %v4140_v0 }
  0x24   : > { %267 = vst [vmem:[#allocation3 + $0x80] sm:$0xff] %v4140_v0 }
  0x25   : > { %268 = vst [vmem:[#allocation3 + $0x88] sm:$0xff] %v4140_v0 }
  0x26   : > { %269 = vst [vmem:[#allocation3 + $0x90] sm:$0xff] %v4140_v0 }
  0x27   : > { %270 = vst [vmem:[#allocation3 + $0x98] sm:$0xff] %v4140_v0 }
  0x28   : > { %271 = vst [vmem:[#allocation3 + $0xa0] sm:$0xff] %v4140_v0 }
  0x29   : > { %272 = vst [vmem:[#allocation3 + $0xa8] sm:$0xff] %v4140_v0 }
  0x2a   : > { %273 = vst [vmem:[#allocation3 + $0xb0] sm:$0xff] %v4140_v0 }
  0x2b   : > { %274 = vst [vmem:[#allocation3 + $0xb8] sm:$0xff] %v4140_v0 }
  0x2c   : > { %275 = vst [vmem:[#allocation3 + $0xc0] sm:$0xff] %v4140_v0 }
  0x2d   : > { %276 = vst [vmem:[#allocation3 + $0xc8] sm:$0xff] %v4140_v0 }
  0x2e   : > { %277 = vst [vmem:[#allocation3 + $0xd0] sm:$0xff] %v4140_v0 }
  0x2f   : > { %278 = vst [vmem:[#allocation3 + $0xd8] sm:$0xff] %v4140_v0 }
  0x30   : > { %279 = vst [vmem:[#allocation3 + $0xe0] sm:$0xff] %v4140_v0 }
  0x31   : > { %280 = vst [vmem:[#allocation3 + $0xe8] sm:$0xff] %v4140_v0 }
  0x32   : > { %281 = vst [vmem:[#allocation3 + $0xf0] sm:$0xff] %v4140_v0 }
  0x33   : > { %282 = vst [vmem:[#allocation3 + $0xf8] sm:$0xff] %v4140_v0 }
  0x34   : > { %283 = vst [vmem:[#allocation3 + $0x100] sm:$0xff] %v4140_v0 }
  0x35   : > { %284 = vst [vmem:[#allocation3 + $0x108] sm:$0xff] %v4140_v0 }
  0x36   : > { %285 = vst [vmem:[#allocation3 + $0x110] sm:$0xff] %v4140_v0 }
  0x37   : > { %286 = vst [vmem:[#allocation3 + $0x118] sm:$0xff] %v4140_v0 }
  0x38   : > { %287 = vst [vmem:[#allocation3 + $0x120] sm:$0xff] %v4140_v0 }
  0x39   : > { %288 = vst [vmem:[#allocation3 + $0x128] sm:$0xff] %v4140_v0 }
  0x3a   : > { %289 = vst [vmem:[#allocation3 + $0x130] sm:$0xff] %v4140_v0 }
  0x3b   : > { %290 = vst [vmem:[#allocation3 + $0x138] sm:$0xff] %v4140_v0 }
  0x3c   : > { %291 = vst [vmem:[#allocation3 + $0x140] sm:$0xff] %v4140_v0 }
  0x3d   : > { %292 = vst [vmem:[#allocation3 + $0x148] sm:$0xff] %v4140_v0 }
  0x3e   : > { %293 = vst [vmem:[#allocation3 + $0x150] sm:$0xff] %v4140_v0 }
  0x3f   : > { %294 = vst [vmem:[#allocation3 + $0x158] sm:$0xff] %v4140_v0 }
  0x40   : > { %295 = vst [vmem:[#allocation3 + $0x160] sm:$0xff] %v4140_v0 }
  0x41   : > { %296 = vst [vmem:[#allocation3 + $0x168] sm:$0xff] %v4140_v0 }
  0x42   : > { %297 = vst [vmem:[#allocation3 + $0x170] sm:$0xff] %v4140_v0 }
  0x43   : > { %298 = vst [vmem:[#allocation3 + $0x178] sm:$0xff] %v4140_v0 }
  0x44   : > { %299 = vst [vmem:[#allocation3 + $0x180] sm:$0xff] %v4140_v0 }
  0x45   : > { %300 = vst [vmem:[#allocation3 + $0x188] sm:$0xff] %v4140_v0 }
  0x46   : > { %301 = vst [vmem:[#allocation3 + $0x190] sm:$0xff] %v4140_v0 }
  0x47   : > { %302 = vst [vmem:[#allocation3 + $0x198] sm:$0xff] %v4140_v0 }
  0x48   : > { %303 = vst [vmem:[#allocation3 + $0x1a0] sm:$0xff] %v4140_v0 }
  0x49   : > { %304 = vst [vmem:[#allocation3 + $0x1a8] sm:$0xff] %v4140_v0 }
  0x4a   : > { %305 = vst [vmem:[#allocation3 + $0x1b0] sm:$0xff] %v4140_v0 }
  0x4b   : > { %306 = vst [vmem:[#allocation3 + $0x1b8] sm:$0xff] %v4140_v0 }
  0x4c   : > { %307 = vst [vmem:[#allocation3 + $0x1c0] sm:$0xff] %v4140_v0 }
  0x4d   : > { %308 = vst [vmem:[#allocation3 + $0x1c8] sm:$0xff] %v4140_v0 }
  0x4e   : > { %309 = vst [vmem:[#allocation3 + $0x1d0] sm:$0xff] %v4140_v0 }
  0x4f   : > { %310 = vst [vmem:[#allocation3 + $0x1d8] sm:$0xff] %v4140_v0 }
  0x50   : > { %311 = vst [vmem:[#allocation3 + $0x1e0] sm:$0xff] %v4140_v0 }
  0x51   : > { %312 = vst [vmem:[#allocation3 + $0x1e8] sm:$0xff] %v4140_v0 }
  0x52   : > { %313 = vst [vmem:[#allocation3 + $0x1f0] sm:$0xff] %v4140_v0 }
  0x53   : > { %314 = vst [vmem:[#allocation3 + $0x1f8] sm:$0xff] %v4140_v0 }
  0x54   : > { %315 = vst [vmem:[#allocation3 + $0x200] sm:$0xff] %v4140_v0 }
  0x55   : > { %316 = vst [vmem:[#allocation3 + $0x208] sm:$0xff] %v4140_v0 }
  0x56   : > { %317 = vst [vmem:[#allocation3 + $0x210] sm:$0xff] %v4140_v0 }
  0x57   : > { %318 = vst [vmem:[#allocation3 + $0x218] sm:$0xff] %v4140_v0 }
  0x58   : > { %319 = vst [vmem:[#allocation3 + $0x220] sm:$0xff] %v4140_v0 }
  0x59   : > { %320 = vst [vmem:[#allocation3 + $0x228] sm:$0xff] %v4140_v0 }
  0x5a   : > { %321 = vst [vmem:[#allocation3 + $0x230] sm:$0xff] %v4140_v0 }
  0x5b   : > { %322 = vst [vmem:[#allocation3 + $0x238] sm:$0xff] %v4140_v0 }
  0x5c   : > { %323 = vst [vmem:[%s5074_s5] sm:$0x1] %v4140_v0 }
  0x5d   : > { %324 = vst [vmem:[%s5075_s6] sm:$0x1] %v4140_v0 }
  0x5e PF: > { %v3856_v1 = vld [vmem:[%s5072_s3 + $0x38] sm:$0xff]  ;;  %v3855_v2 = vld [vmem:[%s5072_s3 + $0x30] sm:$0xff]  ;;  %v4284_v6 = vld [vmem:[%s5070_s1] ss:$0 sm:$0xff] }
  0x5f   : > { %4095 = vmatpush.bf16.msra.mxu1 %v3856_v1  ;;  %4096 = vmatpush.bf16.msra.mxu2 %v3856_v1  ;;  %v4067_v3 = vld [vmem:[%s4187_s27 + $0x18] sm:$0xff]   ;;  %v4289_v7 = vld [vmem:[%s5071_s2] ss:$0 sm:$0xff]  ;;  %v3854_v14 = vld [vmem:[%s5072_s3 + $0x28] sm:$0xff] }
  0x60   : > { %4097 = vmatpush.bf16.msra.mxu3 %v3856_v1  ;;  %638 = vmatpush.bf16.msra.mxu0 %v3856_v1  ;;  %v3935_v4 = vunpack.c.l.bf16 %v4067_v3  ;;  %v3936_v5 = vunpack.c.h.bf16 %v4067_v3  ;;  %v4071_v8 = vld [vmem:[%s4187_s27 + $0x38] sm:$0xff]   ;;  %v4068_v23 = vld [vmem:[%s4187_s27 + $0x20] sm:$0xff]   ;;  %v4069_v56 = vld [vmem:[%s4187_s27 + $0x28] sm:$0xff]  }
  0x61   : > { %v4075_v9 = vld [vmem:[%s4187_s27 + $0x58] sm:$0xff]   ;;  %v3951_v12 = vunpack.c.l.bf16 %v4071_v8  ;;  %v3952_v13 = vunpack.c.h.bf16 %v4071_v8  ;;  %v4072_v24 = vld [vmem:[%s4187_s27 + $0x40] sm:$0xff]   ;;  %v3939_v28 = vunpack.c.l.bf16 %v4068_v23  ;;  %v3940_v33 = vunpack.c.h.bf16 %v4068_v23  ;;  %v4073_v61 = vld [vmem:[%s4187_s27 + $0x48] sm:$0xff]  }
  0x62   : > { %v399_v10 = vmul.f32 %v4284_v6, %v3935_v4  ;;  %v400_v11 = vmul.f32 %v4284_v6, %v3936_v5  ;;  %v3967_v15 = vunpack.c.l.bf16 %v4075_v9  ;;  %v3968_v16 = vunpack.c.h.bf16 %v4075_v9  ;;  %v3853_v29 = vld [vmem:[%s5072_s3 + $0x20] sm:$0xff]  ;;  %v3852_v48 = vld [vmem:[%s5072_s3 + $0x18] sm:$0xff]  ;;  %v3850_v23 = vld [vmem:[%s5072_s3 + $0x8] sm:$0xff] }
  0x63   : > { %4098 = vmatpush.bf16.msra.mxu1 %v3855_v2  ;;  %4099 = vmatpush.bf16.msra.mxu2 %v3855_v2  ;;  %v407_v19 = vmul.f32 %v4284_v6, %v3951_v12  ;;  %v408_v20 = vmul.f32 %v4284_v6, %v3952_v13  ;;  %v4076_v34 = vld [vmem:[%s4187_s27 + $0x60] sm:$0xff]   ;;  %v401_v36 = vmul.f32 %v4284_v6, %v3939_v28  ;;  %v3955_v37 = vunpack.c.l.bf16 %v4072_v24  ;;  %v4077_v12 = vld [vmem:[%s4187_s27 + $0x68] sm:$0xff]  }
  0x64   : > { %4100 = vmatpush.bf16.msra.mxu3 %v3855_v2  ;;  %639 = vmatpush.bf16.msra.mxu0 %v3855_v2  ;;  %v4299_v17 = vadd.f32 %v4289_v7, %v399_v10  ;;  %v4302_v18 = vadd.f32 %v4289_v7, %v400_v11  ;;  %v415_v21 = vmul.f32 %v4284_v6, %v3967_v15  ;;  %v3956_v38 = vunpack.c.h.bf16 %v4072_v24  ;;  %v3922_v39 = vld [vmem:[%s4187_s27] sm:$0xff]   ;;  %v3851_v2 = vld [vmem:[%s5072_s3 + $0x10] sm:$0xff] }
  0x65   : > { %v416_v22 = vmul.f32 %v4284_v6, %v3968_v16  ;;  %v443_v27 = vadd.f32 %v4289_v7, %v407_v19  ;;  %v444_v30 = vadd.f32 %v4289_v7, %v408_v20  ;;  %v402_v43 = vmul.f32 %v4284_v6, %v3940_v33  ;;  %v4065_v16 = vld [vmem:[%s4187_s27 + $0x8] sm:$0xff]  }
  0x66   : > { %v467_v25 = vmax.f32 %v4299_v17, 0.0  ;;  %v468_v26 = vmax.f32 %v4302_v18, 0.0  ;;  %v451_v31 = vadd.f32 %v4289_v7, %v415_v21  ;;  %v4328_v44 = vadd.f32 %v4289_v7, %v401_v36  ;;  %v3849_v36 = vld [vmem:[%s5072_s3] sm:$0xff] }
  0x67   : > { %4101 = vmatpush.bf16.msra.mxu1 %v3854_v14  ;;  %4102 = vmatpush.bf16.msra.mxu2 %v3854_v14  ;;  %v452_v32 = vadd.f32 %v4289_v7, %v416_v22  ;;  %v475_v35 = vmax.f32 %v443_v27, 0.0  ;;  %v476_v40 = vmax.f32 %v444_v30, 0.0  ;;  %v409_v45 = vmul.f32 %v4284_v6, %v3955_v37  ;;  %v3901_v18 = vld [vmem:[%s5072_s3 + $0x1a0] sm:$0xff] }
  0x68   : > { %4103 = vmatpush.bf16.msra.mxu3 %v3854_v14  ;;  %640 = vmatpush.bf16.msra.mxu0 %v3854_v14  ;;  %500 = vst [vmem:[#allocation3 + $0x88] sm:$0xff] %v467_v25  ;;  %v483_v41 = vmax.f32 %v451_v31, 0.0  ;;  %v410_v46 = vmul.f32 %v4284_v6, %v3956_v38  ;;  %v3971_v47 = vunpack.c.l.bf16 %v4076_v34  ;;  %v4336_v49 = vadd.f32 %v4289_v7, %v402_v43  ;;  %v4401_v38 = vld [vmem:[#allocation3 + $0x7] sm:$0xff] }
  0x69   : > { %501 = vst [vmem:[#allocation3 + $0x90] sm:$0xff] %v468_v26  ;;  %v484_v42 = vmax.f32 %v452_v32, 0.0  ;;  %v3972_v50 = vunpack.c.h.bf16 %v4076_v34  ;;  %v3923_v51 = vunpack.c.l.bf16 %v3922_v39  ;;  %v3924_v52 = vunpack.c.h.bf16 %v3922_v39 }
  0x6a   : > { %508 = vst [vmem:[#allocation3 + $0x108] sm:$0xff] %v475_v35  ;;  %v469_v53 = vmax.f32 %v4328_v44, 0.0  ;;  %v4340_v54 = vadd.f32 %v4289_v7, %v409_v45  ;;  %v4343_v55 = vadd.f32 %v4289_v7, %v410_v46  ;;  %v470_v57 = vmax.f32 %v4336_v49, 0.0  ;;  %v3893_v49 = vld [vmem:[%s5072_s3 + $0x160] sm:$0xff] }
  0x6b   : > { %4104 = vmatpush.bf16.msra.mxu1 %v3853_v29  ;;  %4105 = vmatpush.bf16.msra.mxu2 %v3853_v29  ;;  %509 = vst [vmem:[#allocation3 + $0x110] sm:$0xff] %v476_v40  ;;  %v417_v58 = vmul.f32 %v4284_v6, %v3971_v47  ;;  %v418_v59 = vmul.f32 %v4284_v6, %v3972_v50  ;;  %v3943_v1 = vunpack.c.l.bf16 %v4069_v56  ;;  %v3944_v9 = vunpack.c.h.bf16 %v4069_v56 }
  0x6c   : > { %4106 = vmatpush.bf16.msra.mxu3 %v3853_v29  ;;  %641 = vmatpush.bf16.msra.mxu0 %v3853_v29  ;;  %516 = vst [vmem:[#allocation3 + $0x188] sm:$0xff] %v483_v41  ;;  %v393_v60 = vmul.f32 %v4284_v6, %v3923_v51  ;;  %v477_v62 = vmax.f32 %v4340_v54, 0.0  ;;  %v478_v63 = vmax.f32 %v4343_v55, 0.0  ;;  %v394_v0 = vmul.f32 %v4284_v6, %v3924_v52  ;;  %v527_v52 = vld [vmem:[#allocation3 + $0xf] sm:$0xff] }
  0x6d   : > { %517 = vst [vmem:[#allocation3 + $0x190] sm:$0xff] %v484_v42  ;;  %v453_v3 = vadd.f32 %v4289_v7, %v417_v58  ;;  %v454_v4 = vadd.f32 %v4289_v7, %v418_v59  ;;  %v403_v10 = vmul.f32 %v4284_v6, %v3943_v1  ;;  %v3959_v11 = vunpack.c.l.bf16 %v4073_v61  ;;  %v3907_v54 = vld [vmem:[%s5072_s3 + $0x1d0] sm:$0xff] }
  0x6e   : > { %502 = vst [vmem:[#allocation3 + $0xa8] sm:$0xff] %v469_v53  ;;  %v4364_v5 = vadd.f32 %v4289_v7, %v393_v60  ;;  %v4369_v8 = vadd.f32 %v4289_v7, %v394_v0  ;;  %v404_v20 = vmul.f32 %v4284_v6, %v3944_v9  ;;  %v3960_v22 = vunpack.c.h.bf16 %v4073_v61  ;;  %v3872_v60 = vld [vmem:[%s5072_s3 + $0xb8] sm:$0xff] }
  0x6f   : > { %4107 = vmatpush.bf16.msra.mxu1 %v3852_v48  ;;  %4108 = vmatpush.bf16.msra.mxu2 %v3852_v48  ;;  %503 = vst [vmem:[#allocation3 + $0xb0] sm:$0xff] %v470_v57  ;;  %v485_v13 = vmax.f32 %v453_v3, 0.0  ;;  %v486_v14 = vmax.f32 %v454_v4, 0.0  ;;  %v4380_v21 = vadd.f32 %v4289_v7, %v403_v10  ;;  %v411_v24 = vmul.f32 %v4284_v6, %v3959_v11  ;;  %v534_v37 = vld [vmem:[#allocation3 + $0x87] sm:$0xff]  ;;  %v3880_v61 = vld [vmem:[%s5072_s3 + $0xf8] sm:$0xff] }
  0x70   : > { %4109 = vmatpush.bf16.msra.mxu3 %v3852_v48  ;;  %642 = vmatpush.bf16.msra.mxu0 %v3852_v48  ;;  %510 = vst [vmem:[#allocation3 + $0x128] sm:$0xff] %v477_v62  ;;  %v461_v15 = vmax.f32 %v4364_v5, 0.0  ;;  %v462_v19 = vmax.f32 %v4369_v8, 0.0  ;;  %v3975_v27 = vunpack.c.l.bf16 %v4077_v12  ;;  %v3976_v28 = vunpack.c.h.bf16 %v4077_v12  ;;  %v535_v43 = vld [vmem:[#allocation3 + $0x8f] sm:$0xff]  ;;  %v3864_v12 = vld [vmem:[%s5072_s3 + $0x78] sm:$0xff] }
  0x71   : > { %511 = vst [vmem:[#allocation3 + $0x130] sm:$0xff] %v478_v63  ;;  %v4387_v29 = vadd.f32 %v4289_v7, %v404_v20  ;;  %v471_v30 = vmax.f32 %v4380_v21, 0.0  ;;  %v412_v31 = vmul.f32 %v4284_v6, %v3960_v22  ;;  %v3927_v32 = vunpack.c.l.bf16 %v4065_v16  ;;  %v542_v45 = vld [vmem:[#allocation3 + $0x107] sm:$0xff]  ;;  %v4070_v20 = vld [vmem:[%s4187_s27 + $0x30] sm:$0xff]  }
  0x72   : > { %518 = vst [vmem:[#allocation3 + $0x1a8] sm:$0xff] %v485_v13  ;;  %v4394_v33 = vadd.f32 %v4289_v7, %v411_v24  ;;  %v419_v34 = vmul.f32 %v4284_v6, %v3975_v27  ;;  %v420_v35 = vmul.f32 %v4284_v6, %v3976_v28  ;;  %v3928_v41 = vunpack.c.h.bf16 %v4065_v16  ;;  %v543_v46 = vld [vmem:[#allocation3 + $0x10f] sm:$0xff] }
  0x73   : > { %4110 = vmatpush.bf16.msra.mxu1 %v3851_v2  ;;  %4111 = vmatpush.bf16.msra.mxu2 %v3851_v2  ;;  %519 = vst [vmem:[#allocation3 + $0x1b0] sm:$0xff] %v486_v14  ;;  %v472_v39 = vmax.f32 %v4387_v29, 0.0  ;;  %v4407_v40 = vadd.f32 %v4289_v7, %v412_v31  ;;  %v395_v42 = vmul.f32 %v4284_v6, %v3927_v32  ;;  %v550_v50 = vld [vmem:[#allocation3 + $0x187] sm:$0xff]  ;;  %v3888_v14 = vld [vmem:[%s5072_s3 + $0x138] sm:$0xff]  ;;  %v4074_v22 = vld [vmem:[%s4187_s27 + $0x50] sm:$0xff]   ;;  %v3947_v27 = vunpack.c.l.bf16 %v4070_v20 }
  0x74   : > { %4112 = vmatpush.bf16.msra.mxu3 %v3851_v2  ;;  %643 = vmatpush.bf16.msra.mxu0 %v3851_v2  ;;  %494 = vst [vmem:[#allocation3 + $0x28] sm:$0xff] %v461_v15  ;;  %v479_v47 = vmax.f32 %v4394_v33, 0.0  ;;  %v455_v48 = vadd.f32 %v4289_v7, %v419_v34  ;;  %v551_v51 = vld [vmem:[#allocation3 + $0x18f] sm:$0xff]  ;;  %v456_v58 = vadd.f32 %v4289_v7, %v420_v35  ;;  %v3948_v28 = vunpack.c.h.bf16 %v4070_v20 }
  0x75   : > { %495 = vst [vmem:[#allocation3 + $0x30] sm:$0xff] %v462_v19  ;;  %v480_v56 = vmax.f32 %v4407_v40, 0.0  ;;  %v396_v59 = vmul.f32 %v4284_v6, %v3928_v41  ;;  %v4428_v1 = vadd.f32 %v4289_v7, %v395_v42  ;;  %v4430_v2 = vpack.c.bf16 %v535_v43, %v534_v37  ;;  %v3879_v24 = vld [vmem:[%s5072_s3 + $0xf0] sm:$0xff]  ;;  %v3862_v20 = vld [vmem:[%s5072_s3 + $0x68] sm:$0xff] }
  0x76   : > { %504 = vst [vmem:[#allocation3 + $0xc8] sm:$0xff] %v471_v30  ;;  %v487_v0 = vmax.f32 %v455_v48, 0.0  ;;  %v566_v3 = vpack.c.bf16 %v543_v46, %v542_v45  ;;  %v488_v4 = vmax.f32 %v456_v58, 0.0  ;;  %v570_v10 = vpack.c.bf16 %v551_v51, %v550_v50  ;;  %v4078_v34 = vld [vmem:[%s4187_s27 + $0x70] sm:$0xff]   ;;  %v3870_v51 = vld [vmem:[%s5072_s3 + $0xa8] sm:$0xff] }
  0x77   : > { %4113 = vmatpush.bf16.msra.mxu1 %v3850_v23  ;;  %4114 = vmatpush.bf16.msra.mxu2 %v3850_v23  ;;  %505 = vst [vmem:[#allocation3 + $0xd0] sm:$0xff] %v472_v39  ;;  %v4435_v9 = vadd.f32 %v4289_v7, %v396_v59  ;;  %v558_v11 = vpack.c.bf16 %v527_v52, %v4401_v38  ;;  %v463_v13 = vmax.f32 %v4428_v1, 0.0  ;;  %v3963_v31 = vunpack.c.l.bf16 %v4074_v22  ;;  %v4066_v37 = vld [vmem:[%s4187_s27 + $0x10] sm:$0xff]   ;;  %v3878_v52 = vld [vmem:[%s5072_s3 + $0xe8] sm:$0xff] }
  0x78   : > { %4115 = vmatpush.bf16.msra.mxu3 %v3850_v23  ;;  %644 = vmatpush.bf16.msra.mxu0 %v3850_v23  ;;  %512 = vst [vmem:[#allocation3 + $0x148] sm:$0xff] %v479_v47  ;;  %v3871_v23 = vld [vmem:[%s5072_s3 + $0xb0] sm:$0xff]  ;;  %v3964_v32 = vunpack.c.h.bf16 %v4074_v22  ;;  %v3979_v35 = vunpack.c.l.bf16 %v4078_v34  ;;  %v405_v38 = vmul.f32 %v4284_v6, %v3947_v27  ;;  %v406_v41 = vmul.f32 %v4284_v6, %v3948_v28  ;;  %v3886_v22 = vld [vmem:[%s5072_s3 + $0x128] sm:$0xff]  ;;  %v3869_v27 = vld [vmem:[%s5072_s3 + $0xa0] sm:$0xff] }
  0x79   : > { %513 = vst [vmem:[#allocation3 + $0x150] sm:$0xff] %v480_v56  ;;  %v464_v16 = vmax.f32 %v4435_v9, 0.0  ;;  %v413_v42 = vmul.f32 %v4284_v6, %v3963_v31  ;;  %v3931_v43 = vunpack.c.l.bf16 %v4066_v37  ;;  %v3863_v45 = vld [vmem:[%s5072_s3 + $0x70] sm:$0xff]  ;;  %v3877_v28 = vld [vmem:[%s5072_s3 + $0xe0] sm:$0xff]  ;;  %v1689_v17 = vpack.c.bf16 %v470_v57, %v469_v53 }
  0x7a   : > { %520 = vst [vmem:[#allocation3 + $0x1c8] sm:$0xff] %v487_v0  ;;  %v3887_v46 = vld [vmem:[%s5072_s3 + $0x130] sm:$0xff]  ;;  %v414_v48 = vmul.f32 %v4284_v6, %v3964_v32  ;;  %v421_v50 = vmul.f32 %v4284_v6, %v3979_v35  ;;  %v4479_v58 = vadd.f32 %v4289_v7, %v405_v38  ;;  %v4482_v59 = vadd.f32 %v4289_v7, %v406_v41  ;;  %v536_v35 = vld [vmem:[#allocation3 + $0xa7] sm:$0xff] }
  0x7b   : > { %4116 = vmatpush.bf16.msra.mxu1 %v3849_v36  ;;  %4117 = vmatpush.bf16.msra.mxu2 %v3849_v36  ;;  %521 = vst [vmem:[#allocation3 + $0x1d0] sm:$0xff] %v488_v4  ;;  %v3861_v38 = vld [vmem:[%s5072_s3 + $0x60] sm:$0xff]  ;;  %v3911_v9 = vld [vmem:[%s5072_s3 + $0x1f0] sm:$0xff] }
  0x7c   : > { %4118 = vmatpush.bf16.msra.mxu3 %v3849_v36  ;;  %645 = vmatpush.bf16.msra.mxu0 %v3849_v36  ;;  %496 = vst [vmem:[#allocation3 + $0x48] sm:$0xff] %v463_v13  ;;  %v3980_v36 = vunpack.c.h.bf16 %v4078_v34  ;;  %v4488_v0 = vadd.f32 %v4289_v7, %v414_v48  ;;  %v457_v4 = vadd.f32 %v4289_v7, %v421_v50  ;;  %v528_v48 = vld [vmem:[#allocation3 + $0x27] sm:$0xff]  ;;  %v529_v50 = vld [vmem:[#allocation3 + $0x2f] sm:$0xff] }
  0x7d   : > { %497 = vst [vmem:[#allocation3 + $0x50] sm:$0xff] %v464_v16 }
  0x7e   : > { %666 = vmatmul.bf16.vlgmr.msra.gmra.mxu1 %v4430_v2  ;;  %686 = vmatmul.bf16.vlgmr.msra.gmra.mxu2 %v566_v3  ;;  %v422_v3 = vmul.f32 %v4284_v6, %v3980_v36  ;;  %v489_v31 = vmax.f32 %v457_v4, 0.0  ;;  %v537_v36 = vld [vmem:[#allocation3 + $0xaf] sm:$0xff] }
  0x7f   : > { %1170 = vmatpush.bf16.msrb.mxu2 %v3872_v60  ;;  %706 = vmatmul.bf16.vlgmr.msra.gmra.mxu3 %v570_v10  ;;  %v4485_v60 = vadd.f32 %v4289_v7, %v413_v42  ;;  %v473_v10 = vmax.f32 %v4479_v58, 0.0  ;;  %v545_v42 = vld [vmem:[#allocation3 + $0x12f] sm:$0xff] }
  0x80   : > { %1468 = vmatpush.bf16.msrb.mxu3 %v3880_v61  ;;  %646 = vmatmul.bf16.vlgmr.msra.gmra.mxu0 %v558_v11  ;;  %v3932_v61 = vunpack.c.h.bf16 %v4066_v37  ;;  %v474_v11 = vmax.f32 %v4482_v59, 0.0  ;;  %v544_v37 = vld [vmem:[#allocation3 + $0x127] sm:$0xff]  ;;  %522 = vst [vmem:[#allocation3 + $0x1e8] sm:$0xff] %v489_v31  ;;  %v3859_v31 = vld [vmem:[%s5072_s3 + $0x50] sm:$0xff] }
  0x81   : > { %872 = vmatpush.bf16.msrb.mxu1 %v3864_v12  ;;  %1766 = vmatpush.bf16.msrb.mxu0 %v3888_v14  ;;  %v5077_v12 = vmax.f32 %v4485_v60, 0.0  ;;  %v397_v14 = vmul.f32 %v4284_v6, %v3931_v43  ;;  %506 = vst [vmem:[#allocation3 + $0xe8] sm:$0xff] %v473_v10  ;;  %v552_v43 = vld [vmem:[#allocation3 + $0x1a7] sm:$0xff]  ;;  %v4541_v4 = vpack.c.bf16 %v545_v42, %v544_v37 }
  0x82   : > { %v398_v32 = vmul.f32 %v4284_v6, %v3932_v61  ;;  %507 = vst [vmem:[#allocation3 + $0xf0] sm:$0xff] %v474_v11  ;;  %v3858_v37 = vld [vmem:[%s5072_s3 + $0x48] sm:$0xff]  ;;  %v3865_v42 = vld [vmem:[%s5072_s3 + $0x80] sm:$0xff] }
  0x83   : > { %1171 = vmatpush.bf16.msrb.mxu2 %v3871_v23  ;;  %v5076_v23 = vmax.f32 %v4488_v0, 0.0  ;;  %v4514_v34 = vadd.f32 %v4289_v7, %v397_v14  ;;  %514 = vst [vmem:[#allocation3 + $0x168] sm:$0xff] %v5077_v12  ;;  %v1069_v21 = vld [vmem:[#allocation3 + $0xc9] sm:$0xff]  ;;  %v1694_v12 = vpack.c.bf16 %v480_v56, %v479_v47 }
  0x84   : > { %1469 = vmatpush.bf16.msrb.mxu3 %v3879_v24  ;;  %v458_v24 = vadd.f32 %v4289_v7, %v422_v3  ;;  %v4524_v6 = vadd.f32 %v4289_v7, %v398_v32  ;;  %v3868_v7 = vld [vmem:[%s5072_s3 + $0x98] sm:$0xff]  ;;  %v4539_v3 = vpack.c.bf16 %v537_v36, %v536_v35  ;;  %v3883_v32 = vld [vmem:[%s5072_s3 + $0x110] sm:$0xff]  ;;  %v3866_v35 = vld [vmem:[%s5072_s3 + $0x88] sm:$0xff] }
  0x85   : > { %873 = vmatpush.bf16.msrb.mxu1 %v3863_v45  ;;  %1767 = vmatpush.bf16.msrb.mxu0 %v3887_v46  ;;  %v553_v45 = vld [vmem:[#allocation3 + $0x1af] sm:$0xff]  ;;  %v465_v46 = vmax.f32 %v4514_v34, 0.0  ;;  %515 = vst [vmem:[#allocation3 + $0x170] sm:$0xff] %v5076_v23 }
  0x86   : > { %v490_v41 = vmax.f32 %v458_v24, 0.0  ;;  %v466_v61 = vmax.f32 %v4524_v6, 0.0  ;;  %v571_v14 = vpack.c.bf16 %v553_v45, %v552_v43  ;;  %v3884_v24 = vld [vmem:[%s5072_s3 + $0x118] sm:$0xff]  ;;  %v3874_v36 = vld [vmem:[%s5072_s3 + $0xc8] sm:$0xff]  ;;  %v3873_v43 = vld [vmem:[%s5072_s3 + $0xc0] sm:$0xff] }
  0x87   : > { %1172 = vmatpush.bf16.msrb.mxu2 %v3870_v51  ;;  %v3885_v51 = vld [vmem:[%s5072_s3 + $0x120] sm:$0xff]  ;;  %498 = vst [vmem:[#allocation3 + $0x68] sm:$0xff] %v465_v46  ;;  %v539_v45 = vld [vmem:[#allocation3 + $0xcf] sm:$0xff] }
  0x88   : > { %1470 = vmatpush.bf16.msrb.mxu3 %v3878_v52  ;;  %v3876_v52 = vld [vmem:[%s5072_s3 + $0xd8] sm:$0xff]  ;;  %523 = vst [vmem:[#allocation3 + $0x1f0] sm:$0xff] %v490_v41  ;;  %v538_v41 = vld [vmem:[#allocation3 + $0xc7] sm:$0xff]  ;;  %v1687_v1 = vpack.c.bf16 %v466_v61, %v465_v46 }
  0x89   : > { %874 = vmatpush.bf16.msrb.mxu1 %v3862_v20  ;;  %1768 = vmatpush.bf16.msrb.mxu0 %v3886_v22  ;;  %v4543_v20 = vpack.c.bf16 %v529_v50, %v528_v48  ;;  %v3860_v22 = vld [vmem:[%s5072_s3 + $0x58] sm:$0xff]  ;;  %499 = vst [vmem:[#allocation3 + $0x70] sm:$0xff] %v466_v61  ;;  %v546_v48 = vld [vmem:[#allocation3 + $0x147] sm:$0xff]  ;;  %v547_v50 = vld [vmem:[#allocation3 + $0x14f] sm:$0xff] }
  0x8a   : > { %v540_v5 = vld [vmem:[#allocation3 + $0xe7] sm:$0xff]  ;;  %v1062_v61 = vld [vmem:[#allocation3 + $0x51] sm:$0xff] }
  0x8b   : > { %1173 = vmatpush.bf16.msrb.mxu2 %v3869_v27  ;;  %v3867_v27 = vld [vmem:[%s5072_s3 + $0x90] sm:$0xff]  ;;  %v548_v8 = vld [vmem:[#allocation3 + $0x167] sm:$0xff] }
  0x8c   : > { %1471 = vmatpush.bf16.msrb.mxu3 %v3877_v28  ;;  %v3875_v28 = vld [vmem:[%s5072_s3 + $0xd0] sm:$0xff] }
  0x8d   : > { %875 = vmatpush.bf16.msrb.mxu1 %v3861_v38  ;;  %1769 = vmatpush.bf16.msrb.mxu0 %v3885_v51  ;;  %v3882_v38 = vld [vmem:[%s5072_s3 + $0x108] sm:$0xff] }
  0x8e   : > { %671 = vmatmul.bf16.gmra.mxu1 %v4539_v3  ;;  %691 = vmatmul.bf16.gmra.mxu2 %v4541_v4  ;;  %v554_v51 = vld [vmem:[#allocation3 + $0x1c7] sm:$0xff] }
  0x8f   : > { %1174 = vmatpush.bf16.msrb.mxu2 %v3868_v7  ;;  %711 = vmatmul.bf16.gmra.mxu3 %v571_v14  ;;  %v555_v7 = vld [vmem:[#allocation3 + $0x1cf] sm:$0xff] }
  0x90   : > { %1472 = vmatpush.bf16.msrb.mxu3 %v3876_v52  ;;  %651 = vmatmul.bf16.gmra.mxu0 %v4543_v20  ;;  %v530_v52 = vld [vmem:[#allocation3 + $0x47] sm:$0xff]  ;;  %v531_v14 = vld [vmem:[#allocation3 + $0x4f] sm:$0xff] }
  0x91   : > { %876 = vmatpush.bf16.msrb.mxu1 %v3860_v22  ;;  %1770 = vmatpush.bf16.msrb.mxu0 %v3884_v24  ;;  %v3857_v22 = vld [vmem:[%s5072_s3 + $0x40] sm:$0xff]  ;;  %v1059_v34 = vld [vmem:[#allocation3 + $0x29] sm:$0xff] }
  0x92   : > { %v3881_v24 = vld [vmem:[%s5072_s3 + $0x100] sm:$0xff]  ;;  %v1061_v46 = vld [vmem:[#allocation3 + $0x49] sm:$0xff] }
  0x93   : > { %1175 = vmatpush.bf16.msrb.mxu2 %v3867_v27  ;;  %v4594_v27 = vpack.c.bf16 %v539_v45, %v538_v41  ;;  %v3920_v41 = vld [vmem:[%s5072_s3 + $0x238] sm:$0xff]  ;;  %v532_v45 = vld [vmem:[#allocation3 + $0x67] sm:$0xff] }
  0x94   : > { %1473 = vmatpush.bf16.msrb.mxu3 %v3875_v28  ;;  %v4596_v28 = vpack.c.bf16 %v547_v50, %v546_v48  ;;  %v533_v48 = vld [vmem:[#allocation3 + $0x6f] sm:$0xff] }
  0x95   : > { %877 = vmatpush.bf16.msrb.mxu1 %v3859_v31  ;;  %1771 = vmatpush.bf16.msrb.mxu0 %v3883_v32  ;;  %v572_v31 = vpack.c.bf16 %v555_v7, %v554_v51  ;;  %v560_v32 = vpack.c.bf16 %v531_v14, %v530_v52  ;;  %v561_v52 = vpack.c.bf16 %v533_v48, %v532_v45  ;;  %v1065_v48 = vld [vmem:[#allocation3 + $0x89] sm:$0xff] }
  0x96   : > { %v1686_v14 = vpack.c.bf16 %v464_v16, %v463_v13  ;;  %v3895_v13 = vld [vmem:[%s5072_s3 + $0x170] sm:$0xff]  ;;  %v1688_v45 = vpack.c.bf16 %v468_v26, %v467_v25  ;;  %v3909_v25 = vld [vmem:[%s5072_s3 + $0x1e0] sm:$0xff] }
  0x97   : > { %1176 = vmatpush.bf16.msrb.mxu2 %v3866_v35  ;;  %v3904_v35 = vld [vmem:[%s5072_s3 + $0x1b8] sm:$0xff]  ;;  %v3919_v16 = vld [vmem:[%s5072_s3 + $0x230] sm:$0xff] }
  0x98   : > { %1474 = vmatpush.bf16.msrb.mxu3 %v3874_v36  ;;  %v1685_v36 = vpack.c.bf16 %v462_v19, %v461_v15  ;;  %v549_v15 = vld [vmem:[#allocation3 + $0x16f] sm:$0xff]  ;;  %v556_v19 = vld [vmem:[#allocation3 + $0x1e7] sm:$0xff] }
  0x99   : > { %878 = vmatpush.bf16.msrb.mxu1 %v3858_v37  ;;  %1772 = vmatpush.bf16.msrb.mxu0 %v3882_v38  ;;  %v3912_v37 = vld [vmem:[%s5072_s3 + $0x1f8] sm:$0xff]  ;;  %v4618_v51 = vpack.c.bf16 %v549_v15, %v548_v8  ;;  %v3918_v8 = vld [vmem:[%s5072_s3 + $0x228] sm:$0xff] }
  0x9a   : > { %v3896_v38 = vld [vmem:[%s5072_s3 + $0x178] sm:$0xff]  ;;  %v1063_v15 = vld [vmem:[#allocation3 + $0x69] sm:$0xff] }
  0x9b   : > { %1177 = vmatpush.bf16.msrb.mxu2 %v3865_v42  ;;  %v541_v42 = vld [vmem:[#allocation3 + $0xef] sm:$0xff] }
  0x9c   : > { %1475 = vmatpush.bf16.msrb.mxu3 %v3873_v43  ;;  %v557_v43 = vld [vmem:[#allocation3 + $0x1ef] sm:$0xff]  ;;  %v4616_v50 = vpack.c.bf16 %v541_v42, %v540_v5  ;;  %v4646_v5 = vpack.c.bf16 %v1062_v61, %v1061_v46 }
  0x9d   : > { %879 = vmatpush.bf16.msrb.mxu1 %v3857_v22  ;;  %1773 = vmatpush.bf16.msrb.mxu0 %v3881_v24  ;;  %v573_v7 = vpack.c.bf16 %v557_v43, %v556_v19  ;;  %v759_v22 = vld [vmem:[#allocation3 + $0x8] sm:$0xff]  ;;  %v760_v24 = vld [vmem:[#allocation3 + $0x10] sm:$0xff] }
  0x9e   : > { %676 = vmatmul.bf16.gmra.mxu1 %v4594_v27  ;;  %696 = vmatmul.bf16.gmra.mxu2 %v4596_v28  ;;  %v3902_v42 = vld [vmem:[%s5072_s3 + $0x1a8] sm:$0xff]  ;;  %v1064_v19 = vld [vmem:[#allocation3 + $0x71] sm:$0xff] }
  0x9f   : > { %716 = vmatmul.bf16.gmra.mxu3 %v572_v31  ;;  %2363 = vmatpush.bf16.msra.mxu2 %v3904_v35  ;;  %v1057_v31 = vld [vmem:[#allocation3 + $0x9] sm:$0xff]  ;;  %v1058_v35 = vld [vmem:[#allocation3 + $0x11] sm:$0xff]  ;;  %v4661_v43 = vpack.c.bf16 %v1064_v19, %v1063_v15 }
  0xa0   : > { %656 = vmatmul.bf16.gmra.mxu0 %v560_v32  ;;  %2661 = vmatpush.bf16.msra.mxu3 %v3912_v37  ;;  %v791_v37 = vpack.c.bf16 %v760_v24, %v759_v22  ;;  %v1068_v24 = vld [vmem:[#allocation3 + $0xb1] sm:$0xff]  ;;  %v1369_v19 = vld [vmem:[#allocation3 + $0x107] sm:$0xff] }
  0xa1   : > { %2064 = vmatpush.bf16.msra.mxu1 %v3896_v38  ;;  %2959 = vmatpush.bf16.msra.mxu0 %v3920_v41  ;;  %v1089_v38 = vpack.c.bf16 %v1058_v35, %v1057_v31  ;;  %v3903_v41 = vld [vmem:[%s5072_s3 + $0x1b0] sm:$0xff] }
  0xa2   : > { %v1072_v15 = vld [vmem:[#allocation3 + $0xf1] sm:$0xff] }
  0xa3   : > { %2364 = vmatpush.bf16.msra.mxu2 %v3903_v41  ;;  %v1690_v41 = vpack.c.bf16 %v472_v39, %v471_v30 }
  0xa4   : > { %2662 = vmatpush.bf16.msra.mxu3 %v3911_v9 }
  0xa5   : > { %2065 = vmatpush.bf16.msra.mxu1 %v3895_v13  ;;  %2960 = vmatpush.bf16.msra.mxu0 %v3919_v16 }
  0xa7   : > { %2365 = vmatpush.bf16.msra.mxu2 %v3902_v42  ;;  %v3900_v42 = vld [vmem:[%s5072_s3 + $0x198] sm:$0xff] }
  0xa9   : > { %2961 = vmatpush.bf16.msra.mxu0 %v3918_v8  ;;  %v1071_v8 = vld [vmem:[#allocation3 + $0xe9] sm:$0xff] }
  0xab   : > { %2366 = vmatpush.bf16.msra.mxu2 %v3901_v18 }
  0xae   : > { %681 = vmatmul.bf16.gmra.mxu1 %v4616_v50  ;;  %701 = vmatmul.bf16.gmra.mxu2 %v4618_v51 }
  0xaf   : > { %721 = vmatmul.bf16.gmra.mxu3 %v573_v7  ;;  %v1066_v7 = vld [vmem:[#allocation3 + $0x91] sm:$0xff]  ;;  %2367 = vmatpush.bf16.msra.mxu2 %v3900_v42 }
  0xb0   : > { %661 = vmatmul.bf16.gmra.mxu0 %v561_v52 }
  0xbe   : > { %880 = vmatmul.bf16.vlgmr.msrb.gmra.mxu1 %v791_v37  ;;  %1178 = vmatmul.bf16.vlgmr.msrb.gmra.mxu2 %v1089_v38 }
  0xbf   : > { %1476 = vmatmul.bf16.vlgmr.msrb.gmra.mxu3 %v4543_v20  ;;  %v1060_v20 = vld [vmem:[#allocation3 + $0x31] sm:$0xff] }
  0xc0   : > { %1774 = vmatmul.bf16.vlgmr.msrb.gmra.mxu0 %v1685_v36  ;;  %v4643_v6 = vpack.c.bf16 %v1060_v20, %v1059_v34  ;;  %v1070_v20 = vld [vmem:[#allocation3 + $0xd1] sm:$0xff] }
  0xc1   : > { %v4729_v39 = vpack.c.bf16 %v1070_v20, %v1069_v21 }
  0xce   : > { %885 = vmatmul.bf16.gmra.mxu1 %v1685_v36  ;;  %1183 = vmatmul.bf16.gmra.mxu2 %v4643_v6  ;;  %v3910_v36 = vld [vmem:[%s5072_s3 + $0x1e8] sm:$0xff] }
  0xcf   : > { %1481 = vmatmul.bf16.gmra.mxu3 %v560_v32  ;;  %v3894_v32 = vld [vmem:[%s5072_s3 + $0x168] sm:$0xff] }
  0xd0   : > { %1779 = vmatmul.bf16.gmra.mxu0 %v1686_v14  ;;  %2663 = vmatpush.bf16.msra.mxu3 %v3910_v36  ;;  %v3908_v36 = vld [vmem:[%s5072_s3 + $0x1d8] sm:$0xff] }
  0xd1   : > { %2066 = vmatpush.bf16.msra.mxu1 %v3894_v32  ;;  %v3916_v32 = vld [vmem:[%s5072_s3 + $0x218] sm:$0xff] }
  0xd4   : > { %2664 = vmatpush.bf16.msra.mxu3 %v3909_v25  ;;  %v4765_v25 = vpack.c.bf16 %v1072_v15, %v1071_v8 }
  0xd5   : > { %2067 = vmatpush.bf16.msra.mxu1 %v3893_v49 }
  0xd8   : > { %2665 = vmatpush.bf16.msra.mxu3 %v3908_v36  ;;  %v1073_v36 = vld [vmem:[#allocation3 + $0x109] sm:$0xff] }
  0xdc   : > { %2666 = vmatpush.bf16.msra.mxu3 %v3907_v54  ;;  %v1076_v54 = vld [vmem:[#allocation3 + $0x131] sm:$0xff] }
  0xde   : > { %890 = vmatmul.bf16.gmra.mxu1 %v1686_v14  ;;  %1188 = vmatmul.bf16.gmra.mxu2 %v4646_v5 }
  0xdf   : > { %1486 = vmatmul.bf16.gmra.mxu3 %v561_v52  ;;  %v4669_v52 = vpack.c.bf16 %v1066_v7, %v1065_v48  ;;  %v1667_v48 = vld [vmem:[#allocation3 + $0x108] sm:$0xff]  ;;  %v1668_v7 = vld [vmem:[#allocation3 + $0x110] sm:$0xff] }
  0xe0   : > { %1784 = vmatmul.bf16.gmra.mxu0 %v1687_v1 }
  0xee   : > { %895 = vmatmul.bf16.gmra.mxu1 %v1687_v1  ;;  %1193 = vmatmul.bf16.gmra.mxu2 %v4661_v43 }
  0xef   : > { %1491 = vmatmul.bf16.gmra.mxu3 %v4430_v2  ;;  %v3917_v2 = vld [vmem:[%s5072_s3 + $0x220] sm:$0xff] }
  0xf0   : > { %1789 = vmatmul.bf16.gmra.mxu0 %v1688_v45 }
  0xf1   : > { %2962 = vmatpush.bf16.msra.mxu0 %v3917_v2 }
  0xf5   : > { %2963 = vmatpush.bf16.msra.mxu0 %v3916_v32 }
  0xfb   : > { %v4671_v14 = vpop.f32.mrf.mxu1 }
  0xfd   : > { %v4677_v22 = vpop.f32.mrf.mxu0 }
  0xfe   : > { %900 = vmatmul.bf16.gmra.mxu1 %v1688_v45  ;;  %1198 = vmatmul.bf16.gmra.mxu2 %v4669_v52  ;;  %v1370_v45 = vld [vmem:[#allocation3 + $0x10f] sm:$0xff] }
  0xff   : > { %1496 = vmatmul.bf16.gmra.mxu3 %v4539_v3  ;;  %v1067_v3 = vld [vmem:[#allocation3 + $0xa9] sm:$0xff]  ;;  %v1394_v2 = vpack.c.bf16 %v1370_v45, %v1369_v19  ;;  %v1693_v19 = vpack.c.bf16 %v478_v63, %v477_v62 }
 0x100   : > { %1794 = vmatmul.bf16.gmra.mxu0 %v1689_v17  ;;  %v4705_v37 = vpack.c.bf16 %v1068_v24, %v1067_v3  ;;  %v1692_v3 = vpack.c.bf16 %v1668_v7, %v1667_v48  ;;  %v3899_v7 = vld [vmem:[%s5072_s3 + $0x190] sm:$0xff] }
 0x101   : > { %v4687_v26 = vpop.f32.mrf.mxu2  ;;  %2368 = vmatpush.bf16.msra.mxu2 %v3899_v7  ;;  %v1075_v7 = vld [vmem:[#allocation3 + $0x129] sm:$0xff] }
 0x102   : > { %v4689_v44 = vpop.f32.mrf.mxu3 }
 0x103   : > { %v4694_v53 = vpop.f32.mrf.mxu1 }
 0x105   : > { %v4696_v57 = vpop.f32.mrf.mxu0 }
 0x109   : > { %v4701_v31 = vpop.f32.mrf.mxu2 }
 0x10a   : > { %v4703_v35 = vpop.f32.mrf.mxu3 }
 0x10b   : > { %v4707_v38 = vpop.f32.mrf.mxu1 }
 0x10d   : > { %v4713_v1 = vpop.f32.mrf.mxu0 }
 0x10e   : > { %905 = vmatmul.bf16.gmra.mxu1 %v1689_v17  ;;  %1203 = vmatmul.bf16.gmra.mxu2 %v4705_v37 }
 0x10f   : > { %1501 = vmatmul.bf16.gmra.mxu3 %v4594_v27  ;;  %v1691_v27 = vpack.c.bf16 %v474_v11, %v473_v10 }
 0x110   : > { %1799 = vmatmul.bf16.gmra.mxu0 %v1690_v41 }
 0x111   : > { %v4717_v9 = vpop.f32.mrf.mxu2 }
 0x112   : > { %v4719_v13 = vpop.f32.mrf.mxu3 }
 0x113   : > { %v4721_v16 = vpop.f32.mrf.mxu1 }
 0x115   : > { %v4723_v34 = vpop.f32.mrf.mxu0 }
 0x119   : > { %v4725_v29 = vpop.f32.mrf.mxu2 }
 0x11a   : > { %v4727_v30 = vpop.f32.mrf.mxu3 }
 0x11b   : > { %v4731_v46 = vpop.f32.mrf.mxu1 }
 0x11d   : > { %v4737_v61 = vpop.f32.mrf.mxu0 }
 0x11e   : > { %910 = vmatmul.bf16.gmra.mxu1 %v1690_v41  ;;  %1208 = vmatmul.bf16.gmra.mxu2 %v4729_v39 }
 0x11f   : > { %1506 = vmatmul.bf16.gmra.mxu3 %v4616_v50  ;;  %v3892_v50 = vld [vmem:[%s5072_s3 + $0x158] sm:$0xff] }
 0x120   : > { %1804 = vmatmul.bf16.gmra.mxu0 %v1691_v27  ;;  %2068 = vmatpush.bf16.msra.mxu1 %v3892_v50  ;;  %v1074_v50 = vld [vmem:[#allocation3 + $0x111] sm:$0xff] }
 0x121   : > { %v4747_v58 = vpop.f32.mrf.mxu2  ;;  %v4784_v15 = vpack.c.bf16 %v1074_v50, %v1073_v36  ;;  %v3915_v50 = vld [vmem:[%s5072_s3 + $0x210] sm:$0xff] }
 0x122   : > { %v4749_v59 = vpop.f32.mrf.mxu3  ;;  %2964 = vmatpush.bf16.msra.mxu0 %v3915_v50 }
 0x123   : > { %v4751_v10 = vpop.f32.mrf.mxu1 }
 0x125   : > { %v4753_v11 = vpop.f32.mrf.mxu0 }
 0x129   : > { %v4761_v17 = vpop.f32.mrf.mxu2 }
 0x12a   : > { %v4763_v18 = vpop.f32.mrf.mxu3 }
 0x12b   : > { %v4767_v49 = vpop.f32.mrf.mxu1 }
 0x12d   : > { %v4769_v24 = vpop.f32.mrf.mxu0 }
 0x12e   : > { %915 = vmatmul.bf16.gmra.mxu1 %v1691_v27  ;;  %1213 = vmatmul.bf16.gmra.mxu2 %v4765_v25 }
 0x12f   : > { %1511 = vmatmul.bf16.gmra.mxu3 %v1394_v2 }
 0x130   : > { %1809 = vmatmul.bf16.gmra.mxu0 %v1692_v3 }
 0x131   : > { %v4772_v41 = vpop.f32.mrf.mxu2 }
 0x132   : > { %v4774_v21 = vpop.f32.mrf.mxu3 }
 0x133   : > { %v4776_v20 = vpop.f32.mrf.mxu1 }
 0x135   : > { %v4778_v42 = vpop.f32.mrf.mxu0 }
 0x139   : > { %v4780_v32 = vpop.f32.mrf.mxu2 }
 0x13a   : > { %v4782_v8 = vpop.f32.mrf.mxu3 }
 0x13b   : > { %v881_v27 = vpop.f32.mrf.mxu1 }
 0x13c   : > { %v993_v45 = vadd.f32 %v881_v27, %v4677_v22  ;;  %v777_v27 = vld [vmem:[#allocation3 + $0x128] sm:$0xff] }
 0x13d   : > { %v1775_v48 = vpop.f32.mrf.mxu0 }
 0x13e   : > { %920 = vmatmul.bf16.gmra.mxu1 %v1692_v3  ;;  %1218 = vmatmul.bf16.gmra.mxu2 %v4784_v15 }
 0x13f   : > { %1516 = vmatmul.bf16.gmra.mxu3 %v4541_v4  ;;  %v3891_v4 = vld [vmem:[%s5072_s3 + $0x150] sm:$0xff] }
 0x140   : > { %1814 = vmatmul.bf16.gmra.mxu0 %v1693_v19  ;;  %2069 = vmatpush.bf16.msra.mxu1 %v3891_v4 }
 0x141   : > { %v1179_v2 = vpop.f32.mrf.mxu2 }
 0x142   : > { %v1291_v55 = vadd.f32 %v1179_v2, %v993_v45  ;;  %v1477_v62 = vpop.f32.mrf.mxu3  ;;  %v778_v45 = vld [vmem:[#allocation3 + $0x130] sm:$0xff] }
 0x143   : > { %v883_v63 = vpop.f32.mrf.mxu1 }
 0x144   : > { %v1589_v22 = vadd.f32 %v1477_v62, %v1291_v55  ;;  %v994_v3 = vadd.f32 %v883_v63, %v4696_v57  ;;  %v4808_v62 = vpack.c.bf16 %v778_v45, %v777_v27  ;;  %v4810_v63 = vpack.c.bf16 %v1076_v54, %v1075_v7 }
 0x145   : > { %v1777_v36 = vpop.f32.mrf.mxu0 }
 0x146   : > { %v4806_v19 = vadd.f32 %v1775_v48, %v1589_v22 }
 0x149   : > { %v1181_v2 = vpop.f32.mrf.mxu2 }
 0x14a   : > { %v1292_v55 = vadd.f32 %v1181_v2, %v994_v3  ;;  %v1479_v57 = vpop.f32.mrf.mxu3 }
 0x14b   : > { %v886_v23 = vpop.f32.mrf.mxu1 }
 0x14c   : > { %v1590_v4 = vadd.f32 %v1479_v57, %v1292_v55  ;;  %v995_v48 = vadd.f32 %v886_v23, %v4713_v1  ;;  %v1077_v23 = vld [vmem:[#allocation3 + $0x149] sm:$0xff]  ;;  %v1078_v1 = vld [vmem:[#allocation3 + $0x151] sm:$0xff] }
 0x14d   : > { %v1780_v22 = vpop.f32.mrf.mxu0 }
 0x14e   : > { %925 = vmatmul.bf16.gmra.mxu1 %v4808_v62  ;;  %1223 = vmatmul.bf16.gmra.mxu2 %v4810_v63  ;;  %v4819_v3 = vadd.f32 %v1777_v36, %v1590_v4  ;;  %v4825_v36 = vpack.c.bf16 %v1078_v1, %v1077_v23  ;;  %v5083_v4 = vmax.f32 %v4488_v0, 0.0  ;;  %v3914_v23 = vld [vmem:[%s5072_s3 + $0x208] sm:$0xff] }
 0x14f   : > { %1521 = vmatmul.bf16.gmra.mxu3 %v4596_v28  ;;  %v5082_v28 = vmax.f32 %v4485_v60, 0.0  ;;  %v3906_v60 = vld [vmem:[%s5072_s3 + $0x1c8] sm:$0xff]  ;;  %2965 = vmatpush.bf16.msra.mxu0 %v3914_v23 }
 0x150   : > { %1819 = vmatmul.bf16.gmra.mxu0 %v1694_v12  ;;  %2667 = vmatpush.bf16.msra.mxu3 %v3906_v60 }
 0x151   : > { %v1184_v50 = vpop.f32.mrf.mxu2 }
 0x152   : > { %v1293_v27 = vadd.f32 %v1184_v50, %v995_v48  ;;  %v1482_v45 = vpop.f32.mrf.mxu3  ;;  %v1695_v48 = vpack.c.bf16 %v5083_v4, %v5082_v28  ;;  %v1675_v28 = vld [vmem:[#allocation3 + $0x188] sm:$0xff]  ;;  %v1676_v4 = vld [vmem:[#allocation3 + $0x190] sm:$0xff] }
 0x153   : > { %v888_v33 = vpop.f32.mrf.mxu1 }
 0x154   : > { %v1591_v7 = vadd.f32 %v1482_v45, %v1293_v27  ;;  %v996_v40 = vadd.f32 %v888_v33, %v4723_v34  ;;  %v3898_v45 = vld [vmem:[%s5072_s3 + $0x188] sm:$0xff] }
 0x155   : > { %v1782_v47 = vpop.f32.mrf.mxu0  ;;  %2369 = vmatpush.bf16.msra.mxu2 %v3898_v45 }
 0x156   : > { %v4823_v56 = vadd.f32 %v1780_v22, %v1591_v7 }
 0x159   : > { %v1186_v54 = vpop.f32.mrf.mxu2 }
 0x15a   : > { %v1294_v2 = vadd.f32 %v1186_v54, %v996_v40  ;;  %v1484_v55 = vpop.f32.mrf.mxu3  ;;  %v1079_v54 = vld [vmem:[#allocation3 + $0x169] sm:$0xff] }
 0x15b   : > { %v891_v57 = vpop.f32.mrf.mxu1 }
 0x15c   : > { %v1592_v50 = vadd.f32 %v1484_v55, %v1294_v2  ;;  %v997_v27 = vadd.f32 %v891_v57, %v4737_v61  ;;  %v1080_v2 = vld [vmem:[#allocation3 + $0x171] sm:$0xff]  ;;  %v1377_v55 = vld [vmem:[#allocation3 + $0x187] sm:$0xff] }
 0x15d   : > { %v1785_v34 = vpop.f32.mrf.mxu0  ;;  %v1378_v57 = vld [vmem:[#allocation3 + $0x18f] sm:$0xff]  ;;  %v4851_v45 = vpack.c.bf16 %v1080_v2, %v1079_v54 }
 0x15e   : > { %930 = vmatmul.bf16.gmra.mxu1 %v1694_v12  ;;  %1228 = vmatmul.bf16.gmra.mxu2 %v4825_v36  ;;  %v4833_v22 = vadd.f32 %v1782_v47, %v1592_v50 }
 0x15f   : > { %1526 = vmatmul.bf16.gmra.mxu3 %v4618_v51  ;;  %v3890_v51 = vld [vmem:[%s5072_s3 + $0x148] sm:$0xff] }
 0x160   : > { %1824 = vmatmul.bf16.gmra.mxu0 %v1695_v48  ;;  %2070 = vmatpush.bf16.msra.mxu1 %v3890_v51 }
 0x161   : > { %v1189_v0 = vpop.f32.mrf.mxu2 }
 0x162   : > { %v1295_v61 = vadd.f32 %v1189_v0, %v997_v27  ;;  %v1487_v12 = vpop.f32.mrf.mxu3  ;;  %v4853_v0 = vpack.c.bf16 %v1378_v57, %v1377_v55 }
 0x163   : > { %v893_v33 = vpop.f32.mrf.mxu1 }
 0x164   : > { %v1593_v7 = vadd.f32 %v1487_v12, %v1295_v61  ;;  %v998_v40 = vadd.f32 %v893_v33, %v4753_v11  ;;  %v4855_v61 = vpack.c.bf16 %v1676_v4, %v1675_v28  ;;  %v1379_v4 = vld [vmem:[#allocation3 + $0x1a7] sm:$0xff] }
 0x165   : > { %v1787_v47 = vpop.f32.mrf.mxu0 }
 0x166   : > { %v4849_v1 = vadd.f32 %v1785_v34, %v1593_v7  ;;  %5085 = vst [vmem:[#allocation5_spill] sm:$0xff] %v4855_v61 }
 0x168   : > { %5084 = vst [vmem:[#allocation4_spill] sm:$0xff] %v4849_v1 }
 0x169   : > { %v1191_v11 = vpop.f32.mrf.mxu2 }
 0x16a   : > { %v1296_v50 = vadd.f32 %v1191_v11, %v998_v40  ;;  %v1489_v27 = vpop.f32.mrf.mxu3  ;;  %v1677_v11 = vld [vmem:[#allocation3 + $0x1a8] sm:$0xff] }
 0x16b   : > { %v896_v60 = vpop.f32.mrf.mxu1 }
 0x16c   : > { %v1594_v12 = vadd.f32 %v1489_v27, %v1296_v50  ;;  %v999_v34 = vadd.f32 %v896_v60, %v4769_v24  ;;  %v1081_v24 = vld [vmem:[#allocation3 + $0x189] sm:$0xff] }
 0x16d   : > { %v1790_v33 = vpop.f32.mrf.mxu0  ;;  %v1678_v50 = vld [vmem:[#allocation3 + $0x1b0] sm:$0xff] }
 0x16e   : > { %935 = vmatmul.bf16.gmra.mxu1 %v1695_v48  ;;  %1233 = vmatmul.bf16.gmra.mxu2 %v4851_v45  ;;  %v4859_v7 = vadd.f32 %v1787_v47, %v1594_v12  ;;  %v1082_v48 = vld [vmem:[#allocation3 + $0x191] sm:$0xff] }
 0x16f   : > { %1531 = vmatmul.bf16.gmra.mxu3 %v4853_v0  ;;  %v1380_v47 = vld [vmem:[#allocation3 + $0x1af] sm:$0xff] }
 0x170   : > { %5086 = vst [vmem:[#allocation6_spill] sm:$0xff] %v4859_v7  ;;  %1829 = vmatmul.bf16.gmra.mxu0 %v4855_v61  ;;  %v4866_v7 = vpack.c.bf16 %v1082_v48, %v1081_v24  ;;  %v3905_v24 = vld [vmem:[%s5072_s3 + $0x1c0] sm:$0xff] }
 0x171   : > { %v1194_v40 = vpop.f32.mrf.mxu2  ;;  %2668 = vmatpush.bf16.msra.mxu3 %v3905_v24 }
 0x172   : > { %v1297_v51 = vadd.f32 %v1194_v40, %v999_v34  ;;  %v1492_v23 = vpop.f32.mrf.mxu3  ;;  %5088 = vst [vmem:[#allocation8_spill] sm:$0xff] %v4866_v7  ;;  %v1399_v40 = vpack.c.bf16 %v1380_v47, %v1379_v4  ;;  %v4130_v4 = vld [vmem:[%s5070_s1] ss:$0 sm:$0xff] }
 0x173   : > { %v898_v54 = vpop.f32.mrf.mxu1 }
 0x174   : > { %v1595_v2 = vadd.f32 %v1492_v23, %v1297_v51  ;;  %v1000_v55 = vadd.f32 %v898_v54, %v4778_v42  ;;  %v1697_v51 = vpack.c.bf16 %v1678_v50, %v1677_v11  ;;  %v4079_v54 = vld [vmem:[%s4187_s27 + $0x78] sm:$0xff]  }
 0x175   : > { %v1792_v57 = vpop.f32.mrf.mxu0 }
 0x176   : > { %v4864_v28 = vadd.f32 %v1790_v33, %v1595_v2  ;;  %v3983_v33 = vunpack.c.l.bf16 %v4079_v54  ;;  %v3984_v2 = vunpack.c.h.bf16 %v4079_v54  ;;  %v3889_v54 = vld [vmem:[%s5072_s3 + $0x140] sm:$0xff] }
 0x177   : > { %2071 = vmatpush.bf16.msra.mxu1 %v3889_v54 }
 0x178   : > { %5087 = vst [vmem:[#allocation7_spill] sm:$0xff] %v4864_v28  ;;  %v423_v47 = vmul.f32 %v4130_v4, %v3983_v33  ;;  %v424_v11 = vmul.f32 %v4130_v4, %v3984_v2  ;;  %v3913_v33 = vld [vmem:[%s5072_s3 + $0x200] sm:$0xff]  ;;  %v1084_v4 = vld [vmem:[#allocation3 + $0x1b1] sm:$0xff] }
 0x179   : > { %v1196_v27 = vpop.f32.mrf.mxu2  ;;  %2966 = vmatpush.bf16.msra.mxu0 %v3913_v33 }
 0x17a   : > { %v1298_v60 = vadd.f32 %v1196_v27, %v1000_v55  ;;  %v1494_v12 = vpop.f32.mrf.mxu3  ;;  %v3897_v55 = vld [vmem:[%s5072_s3 + $0x180] sm:$0xff] }
 0x17b   : > { %v901_v34 = vpop.f32.mrf.mxu1  ;;  %2370 = vmatpush.bf16.msra.mxu2 %v3897_v55 }
 0x17c   : > { %v1596_v23 = vadd.f32 %v1494_v12, %v1298_v60  ;;  %v1001_v48 = vadd.f32 %v901_v34, %v4671_v14  ;;  %v4131_v60 = vld [vmem:[%s5071_s2] ss:$0 sm:$0xff] }
 0x17d   : > { %v1795_v42 = vpop.f32.mrf.mxu0  ;;  %v4886_v12 = vadd.f32 %v4131_v60, %v423_v47  ;;  %v1381_v47 = vld [vmem:[#allocation3 + $0x1c7] sm:$0xff] }
 0x17e   : > { %940 = vmatmul.bf16.gmra.mxu1 %v4855_v61  ;;  %1238 = vmatmul.bf16.gmra.mxu2 %v4866_v7  ;;  %v4871_v28 = vadd.f32 %v1792_v57, %v1596_v23 }
 0x17f   : > { %1536 = vmatmul.bf16.gmra.mxu3 %v1399_v40  ;;  %v4888_v40 = vadd.f32 %v4131_v60, %v424_v11  ;;  %v5078_v2 = vmax.f32 %v4886_v12, 0.0 }
 0x180   : > { %5089 = vst [vmem:[#allocation9_spill] sm:$0xff] %v4871_v28  ;;  %1834 = vmatmul.bf16.gmra.mxu0 %v1697_v51 }
 0x181   : > { %v1199_v57 = vpop.f32.mrf.mxu2  ;;  %v5080_v55 = vmax.f32 %v4888_v40, 0.0  ;;  %524 = vst [vmem:[#allocation3 + $0x208] sm:$0xff] %v5078_v2 }
 0x182   : > { %v1299_v50 = vadd.f32 %v1199_v57, %v1001_v48  ;;  %v1497_v27 = vpop.f32.mrf.mxu3  ;;  %v1083_v48 = vld [vmem:[#allocation3 + $0x1a9] sm:$0xff] }
 0x183   : > { %v903_v14 = vpop.f32.mrf.mxu1  ;;  %525 = vst [vmem:[#allocation3 + $0x210] sm:$0xff] %v5080_v55  ;;  %v1382_v57 = vld [vmem:[#allocation3 + $0x1cf] sm:$0xff]  ;;  %v4905_v33 = vpack.c.bf16 %v1084_v4, %v1083_v48 }
 0x184   : > { %v1597_v34 = vadd.f32 %v1497_v27, %v1299_v50  ;;  %v1002_v11 = vadd.f32 %v903_v14, %v4694_v53  ;;  %v1679_v50 = vld [vmem:[#allocation3 + $0x1c8] sm:$0xff]  ;;  %v1680_v27 = vld [vmem:[#allocation3 + $0x1d0] sm:$0xff]  ;;  %v1400_v2 = vpack.c.bf16 %v1382_v57, %v1381_v47 }
 0x185   : > { %v1797_v23 = vpop.f32.mrf.mxu0  ;;  %v1085_v47 = vld [vmem:[#allocation3 + $0x1c9] sm:$0xff] }
 0x186   : > { %v4900_v24 = vadd.f32 %v1795_v42, %v1597_v34  ;;  %v1698_v42 = vpack.c.bf16 %v1680_v27, %v1679_v50  ;;  %v1383_v57 = vld [vmem:[#allocation3 + $0x1e7] sm:$0xff]  ;;  %v1384_v50 = vld [vmem:[#allocation3 + $0x1ef] sm:$0xff] }
 0x187   : > { %v1682_v27 = vld [vmem:[#allocation3 + $0x1f0] sm:$0xff] }
 0x188   : > { %5090 = vst [vmem:[#allocation10_spill] sm:$0xff] %v4900_v24 }
 0x189   : > { %v1201_v60 = vpop.f32.mrf.mxu2 }
 0x18a   : > { %v1300_v28 = vadd.f32 %v1201_v60, %v1002_v11  ;;  %v1499_v54 = vpop.f32.mrf.mxu3 }
 0x18b   : > { %v906_v1 = vpop.f32.mrf.mxu1 }
 0x18c   : > { %v1598_v34 = vadd.f32 %v1499_v54, %v1300_v28  ;;  %v1003_v53 = vadd.f32 %v906_v1, %v4707_v38  ;;  %v1086_v28 = vld [vmem:[#allocation3 + $0x1d1] sm:$0xff] }
 0x18d   : > { %v1800_v24 = vpop.f32.mrf.mxu0  ;;  %v4914_v38 = vpack.c.bf16 %v1086_v28, %v1085_v47 }
 0x18e   : > { %945 = vmatmul.bf16.gmra.mxu1 %v1697_v51  ;;  %1243 = vmatmul.bf16.gmra.mxu2 %v4905_v33  ;;  %v4908_v7 = vadd.f32 %v1797_v23, %v1598_v34  ;;  %v1681_v23 = vld [vmem:[#allocation3 + $0x1e8] sm:$0xff] }
 0x18f   : > { %1541 = vmatmul.bf16.gmra.mxu3 %v1400_v2 }
 0x190   : > { %1839 = vmatmul.bf16.gmra.mxu0 %v1698_v42 }
 0x191   : > { %v1204_v14 = vpop.f32.mrf.mxu2 }
 0x192   : > { %v1301_v55 = vadd.f32 %v1204_v14, %v1003_v53  ;;  %v1502_v11 = vpop.f32.mrf.mxu3  ;;  %v1401_v53 = vpack.c.bf16 %v1384_v50, %v1383_v57  ;;  %v1699_v14 = vpack.c.bf16 %v1682_v27, %v1681_v23  ;;  %v1087_v57 = vld [vmem:[#allocation3 + $0x1e9] sm:$0xff]  ;;  %v1088_v50 = vld [vmem:[#allocation3 + $0x1f1] sm:$0xff] }
 0x193   : > { %v908_v60 = vpop.f32.mrf.mxu1  ;;  %v1385_v23 = vld [vmem:[#allocation3 + $0x207] sm:$0xff]  ;;  %v1386_v27 = vld [vmem:[#allocation3 + $0x20f] sm:$0xff] }
 0x194   : > { %v1599_v48 = vadd.f32 %v1502_v11, %v1301_v55  ;;  %v1004_v51 = vadd.f32 %v908_v60, %v4721_v16 }
 0x195   : > { %v1802_v4 = vpop.f32.mrf.mxu0 }
 0x196   : > { %v4911_v61 = vadd.f32 %v1800_v24, %v1599_v48 }
 0x198   : > { %5091 = vst [vmem:[#allocation11_spill] sm:$0xff] %v4911_v61 }
 0x199   : > { %v1206_v2 = vpop.f32.mrf.mxu2 }
 0x19a   : > { %v1302_v54 = vadd.f32 %v1206_v2, %v1004_v51  ;;  %v1504_v34 = vpop.f32.mrf.mxu3 }
 0x19b   : > { %v911_v1 = vpop.f32.mrf.mxu1 }
 0x19c   : > { %v1600_v55 = vadd.f32 %v1504_v34, %v1302_v54  ;;  %v1005_v16 = vadd.f32 %v911_v1, %v4731_v46  ;;  %v1402_v1 = vpack.c.bf16 %v1386_v27, %v1385_v23  ;;  %v2251_v27 = vld [vmem:[#allocation3 + $0x4f] sm:$0xff] }
 0x19d   : > { %v1805_v11 = vpop.f32.mrf.mxu0 }
 0x19e   : > { %950 = vmatmul.bf16.gmra.mxu1 %v1698_v42  ;;  %1248 = vmatmul.bf16.gmra.mxu2 %v4914_v38  ;;  %v4917_v24 = vadd.f32 %v1802_v4, %v1600_v55  ;;  %v5092_v55 = vmax.f32 %v4886_v12, 0.0 }
 0x19f   : > { %1546 = vmatmul.bf16.gmra.mxu3 %v1401_v53  ;;  %v4923_v53 = vpack.c.bf16 %v1088_v50, %v1087_v57 }
 0x1a0   : > { %1844 = vmatmul.bf16.gmra.mxu0 %v1699_v14 }
 0x1a1   : > { %v1209_v60 = vpop.f32.mrf.mxu2 }
 0x1a2   : > { %v1303_v48 = vadd.f32 %v1209_v60, %v1005_v16  ;;  %v1507_v51 = vpop.f32.mrf.mxu3  ;;  %v5093_v16 = vmax.f32 %v4888_v40, 0.0  ;;  %v2250_v40 = vld [vmem:[#allocation3 + $0x47] sm:$0xff] }
 0x1a3   : > { %v913_v2 = vpop.f32.mrf.mxu1 }
 0x1a4   : > { %v1601_v47 = vadd.f32 %v1507_v51, %v1303_v48  ;;  %v1006_v42 = vadd.f32 %v913_v2, %v4751_v10  ;;  %v1700_v60 = vpack.c.bf16 %v5093_v16, %v5092_v55  ;;  %v2282_v55 = vpack.c.bf16 %v2251_v27, %v2250_v40  ;;  %v1954_v27 = vld [vmem:[#allocation3 + $0x51] sm:$0xff] }
 0x1a5   : > { %v1807_v28 = vpop.f32.mrf.mxu0 }
 0x1a6   : > { %v4920_v61 = vadd.f32 %v1805_v11, %v1601_v47 }
 0x1a9   : > { %v1211_v4 = vpop.f32.mrf.mxu2 }
 0x1aa   : > { %v1304_v54 = vadd.f32 %v1211_v4, %v1006_v42  ;;  %v1509_v34 = vpop.f32.mrf.mxu3  ;;  %v2548_v4 = vld [vmem:[#allocation3 + $0x48] sm:$0xff] }
 0x1ab   : > { %v916_v46 = vpop.f32.mrf.mxu1 }
 0x1ac   : > { %v1602_v11 = vadd.f32 %v1509_v34, %v1304_v54  ;;  %v1007_v51 = vadd.f32 %v916_v46, %v4767_v49  ;;  %v2549_v54 = vld [vmem:[#allocation3 + $0x50] sm:$0xff] }
 0x1ad   : > { %v1810_v48 = vpop.f32.mrf.mxu0  ;;  %v2580_v49 = vpack.c.bf16 %v2549_v54, %v2548_v4  ;;  %v2550_v4 = vld [vmem:[#allocation3 + $0x68] sm:$0xff]  ;;  %v2551_v54 = vld [vmem:[#allocation3 + $0x70] sm:$0xff] }
 0x1ae   : > { %955 = vmatmul.bf16.gmra.mxu1 %v1699_v14  ;;  %1253 = vmatmul.bf16.gmra.mxu2 %v4923_v53  ;;  %v4930_v10 = vadd.f32 %v1807_v28, %v1602_v11 }
 0x1af   : > { %1551 = vmatmul.bf16.gmra.mxu3 %v1402_v1 }
 0x1b0   : > { %1849 = vmatmul.bf16.gmra.mxu0 %v1700_v60 }
 0x1b1   : > { %v1214_v2 = vpop.f32.mrf.mxu2 }
 0x1b2   : > { %v1305_v47 = vadd.f32 %v1214_v2, %v1007_v51  ;;  %v1512_v57 = vpop.f32.mrf.mxu3 }
 0x1b3   : > { %v918_v50 = vpop.f32.mrf.mxu1 }
 0x1b4   : > { %v1603_v42 = vadd.f32 %v1512_v57, %v1305_v47  ;;  %v1008_v14 = vadd.f32 %v918_v50, %v4776_v20 }
 0x1b5   : > { %v1812_v12 = vpop.f32.mrf.mxu0 }
 0x1b6   : > { %v4933_v23 = vadd.f32 %v1810_v48, %v1603_v42  ;;  %v1953_v42 = vld [vmem:[#allocation3 + $0x49] sm:$0xff] }
 0x1b9   : > { %v1216_v28 = vpop.f32.mrf.mxu2 }
 0x1ba   : > { %v1306_v34 = vadd.f32 %v1216_v28, %v1008_v14  ;;  %v1514_v1 = vpop.f32.mrf.mxu3  ;;  %v2252_v14 = vld [vmem:[#allocation3 + $0x67] sm:$0xff] }
 0x1bb   : > { %v921_v16 = vpop.f32.mrf.mxu1 }
 0x1bc   : > { %v1604_v46 = vadd.f32 %v1514_v1, %v1306_v34  ;;  %v1009_v20 = vadd.f32 %v921_v16, %v4687_v26  ;;  %v1984_v26 = vpack.c.bf16 %v1954_v27, %v1953_v42  ;;  %v2581_v16 = vpack.c.bf16 %v2551_v54, %v2550_v4  ;;  %v1955_v42 = vld [vmem:[#allocation3 + $0x69] sm:$0xff] }
 0x1bd   : > { %v1815_v60 = vpop.f32.mrf.mxu0  ;;  %v2552_v4 = vld [vmem:[#allocation3 + $0x88] sm:$0xff]  ;;  %v2553_v54 = vld [vmem:[#allocation3 + $0x90] sm:$0xff] }
 0x1be   : > { %2072 = vmatmul.bf16.vlgmr.msra.gmra.mxu1 %v4643_v6  ;;  %2371 = vmatmul.bf16.vlgmr.msra.gmra.mxu2 %v2282_v55  ;;  %v4937_v11 = vadd.f32 %v1812_v12, %v1604_v46  ;;  %v2253_v6 = vld [vmem:[#allocation3 + $0x6f] sm:$0xff] }
 0x1bf   : > { %2669 = vmatmul.bf16.vlgmr.msra.gmra.mxu3 %v2580_v49  ;;  %v2283_v1 = vpack.c.bf16 %v2253_v6, %v2252_v14  ;;  %v1956_v14 = vld [vmem:[#allocation3 + $0x71] sm:$0xff]  ;;  %v2254_v6 = vld [vmem:[#allocation3 + $0x87] sm:$0xff] }
 0x1c0   : > { %2967 = vmatmul.bf16.vlgmr.msra.gmra.mxu0 %v4646_v5 }
 0x1c1   : > { %v1219_v48 = vpop.f32.mrf.mxu2 }
 0x1c2   : > { %v1307_v51 = vadd.f32 %v1219_v48, %v1009_v20  ;;  %v1517_v2 = vpop.f32.mrf.mxu3 }
 0x1c3   : > { %v923_v47 = vpop.f32.mrf.mxu1 }
 0x1c4   : > { %v1605_v57 = vadd.f32 %v1517_v2, %v1307_v51  ;;  %v1010_v12 = vadd.f32 %v923_v47, %v4701_v31 }
 0x1c5   : > { %v1817_v50 = vpop.f32.mrf.mxu0 }
 0x1c6   : > { %v4941_v40 = vadd.f32 %v1815_v60, %v1605_v57 }
 0x1c9   : > { %v1221_v28 = vpop.f32.mrf.mxu2 }
 0x1ca   : > { %v1308_v5 = vadd.f32 %v1221_v28, %v1010_v12  ;;  %v1519_v34 = vpop.f32.mrf.mxu3  ;;  %v2255_v12 = vld [vmem:[#allocation3 + $0x8f] sm:$0xff] }
 0x1cb   : > { %v926_v55 = vpop.f32.mrf.mxu1 }
 0x1cc   : > { %v1606_v49 = vadd.f32 %v1519_v34, %v1308_v5  ;;  %v1011_v31 = vadd.f32 %v926_v55, %v4717_v9  ;;  %v1985_v9 = vpack.c.bf16 %v1956_v14, %v1955_v42  ;;  %v2284_v34 = vpack.c.bf16 %v2255_v12, %v2254_v6  ;;  %v1958_v14 = vld [vmem:[#allocation3 + $0x91] sm:$0xff]  ;;  %v2256_v6 = vld [vmem:[#allocation3 + $0xa7] sm:$0xff] }
 0x1cd   : > { %v1820_v46 = vpop.f32.mrf.mxu0  ;;  %v2257_v12 = vld [vmem:[#allocation3 + $0xaf] sm:$0xff] }
 0x1ce   : > { %2077 = vmatmul.bf16.gmra.mxu1 %v1984_v26  ;;  %2376 = vmatmul.bf16.gmra.mxu2 %v2283_v1  ;;  %v4944_v60 = vadd.f32 %v1817_v50, %v1606_v49  ;;  %v2582_v1 = vpack.c.bf16 %v2553_v54, %v2552_v4  ;;  %v2555_v4 = vld [vmem:[#allocation3 + $0xb0] sm:$0xff] }
 0x1cf   : > { %2674 = vmatmul.bf16.gmra.mxu3 %v2581_v16 }
 0x1d0   : > { %2972 = vmatmul.bf16.gmra.mxu0 %v4661_v43 }
 0x1d1   : > { %v1224_v20 = vpop.f32.mrf.mxu2 }
 0x1d2   : > { %v1309_v48 = vadd.f32 %v1224_v20, %v1011_v31  ;;  %v1522_v51 = vpop.f32.mrf.mxu3 }
 0x1d3   : > { %v928_v2 = vpop.f32.mrf.mxu1 }
 0x1d4   : > { %v1607_v47 = vadd.f32 %v1522_v51, %v1309_v48  ;;  %v1012_v50 = vadd.f32 %v928_v2, %v4725_v29 }
 0x1d5   : > { %v1822_v57 = vpop.f32.mrf.mxu0 }
 0x1d6   : > { %v4948_v27 = vadd.f32 %v1820_v46, %v1607_v47  ;;  %v1957_v47 = vld [vmem:[#allocation3 + $0x89] sm:$0xff] }
 0x1d9   : > { %v1226_v28 = vpop.f32.mrf.mxu2 }
 0x1da   : > { %v1310_v43 = vadd.f32 %v1226_v28, %v1012_v50  ;;  %v1524_v5 = vpop.f32.mrf.mxu3  ;;  %v2554_v50 = vld [vmem:[#allocation3 + $0xa8] sm:$0xff] }
 0x1db   : > { %v931_v26 = vpop.f32.mrf.mxu1 }
 0x1dc   : > { %v1608_v55 = vadd.f32 %v1524_v5, %v1310_v43  ;;  %v1013_v29 = vadd.f32 %v931_v26, %v4747_v58  ;;  %v1986_v58 = vpack.c.bf16 %v1958_v14, %v1957_v47  ;;  %v2285_v43 = vpack.c.bf16 %v2257_v12, %v2256_v6  ;;  %v1960_v47 = vld [vmem:[#allocation3 + $0xb1] sm:$0xff]  ;;  %v2258_v14 = vld [vmem:[#allocation3 + $0xc7] sm:$0xff] }
 0x1dd   : > { %v1825_v16 = vpop.f32.mrf.mxu0  ;;  %v2259_v6 = vld [vmem:[#allocation3 + $0xcf] sm:$0xff] }
 0x1de   : > { %2082 = vmatmul.bf16.gmra.mxu1 %v1985_v9  ;;  %2381 = vmatmul.bf16.gmra.mxu2 %v2284_v34  ;;  %v4951_v49 = vadd.f32 %v1822_v57, %v1608_v55  ;;  %v2583_v9 = vpack.c.bf16 %v2555_v4, %v2554_v50  ;;  %v2556_v12 = vld [vmem:[#allocation3 + $0xc8] sm:$0xff] }
 0x1df   : > { %2679 = vmatmul.bf16.gmra.mxu3 %v2582_v1 }
 0x1e0   : > { %2977 = vmatmul.bf16.gmra.mxu0 %v4669_v52 }
 0x1e1   : > { %v1229_v46 = vpop.f32.mrf.mxu2 }
 0x1e2   : > { %v1311_v31 = vadd.f32 %v1229_v46, %v1013_v29  ;;  %v1527_v20 = vpop.f32.mrf.mxu3 }
 0x1e3   : > { %v933_v48 = vpop.f32.mrf.mxu1 }
 0x1e4   : > { %v1609_v51 = vadd.f32 %v1527_v20, %v1311_v31  ;;  %v1014_v57 = vadd.f32 %v933_v48, %v4761_v17  ;;  %v1959_v48 = vld [vmem:[#allocation3 + $0xa9] sm:$0xff] }
 0x1e5   : > { %v1827_v2 = vpop.f32.mrf.mxu0 }
 0x1e6   : > { %v4955_v42 = vadd.f32 %v1825_v16, %v1609_v51 }
 0x1e9   : > { %v1231_v54 = vpop.f32.mrf.mxu2 }
 0x1ea   : > { %v1312_v52 = vadd.f32 %v1231_v54, %v1014_v57  ;;  %v1529_v28 = vpop.f32.mrf.mxu3  ;;  %v2557_v57 = vld [vmem:[#allocation3 + $0xd0] sm:$0xff]  ;;  %v2286_v54 = vpack.c.bf16 %v2259_v6, %v2258_v14  ;;  %v2558_v14 = vld [vmem:[#allocation3 + $0xe8] sm:$0xff] }
 0x1eb   : > { %v936_v5 = vpop.f32.mrf.mxu1  ;;  %v2559_v6 = vld [vmem:[#allocation3 + $0xf0] sm:$0xff] }
 0x1ec   : > { %v1610_v34 = vadd.f32 %v1529_v28, %v1312_v52  ;;  %v1015_v17 = vadd.f32 %v936_v5, %v4772_v41  ;;  %v1987_v41 = vpack.c.bf16 %v1960_v47, %v1959_v48  ;;  %v2584_v28 = vpack.c.bf16 %v2557_v57, %v2556_v12  ;;  %v2260_v48 = vld [vmem:[#allocation3 + $0xe7] sm:$0xff]  ;;  %v2261_v47 = vld [vmem:[#allocation3 + $0xef] sm:$0xff] }
 0x1ed   : > { %v1830_v26 = vpop.f32.mrf.mxu0  ;;  %v2287_v57 = vpack.c.bf16 %v2261_v47, %v2260_v48  ;;  %v2561_v48 = vld [vmem:[#allocation3 + $0x110] sm:$0xff] }
 0x1ee   : > { %2087 = vmatmul.bf16.gmra.mxu1 %v1986_v58  ;;  %2386 = vmatmul.bf16.gmra.mxu2 %v2285_v43  ;;  %v4958_v1 = vadd.f32 %v1827_v2, %v1610_v34 }
 0x1ef   : > { %2684 = vmatmul.bf16.gmra.mxu3 %v2583_v9 }
 0x1f0   : > { %2982 = vmatmul.bf16.gmra.mxu0 %v4705_v37 }
 0x1f1   : > { %v1234_v55 = vpop.f32.mrf.mxu2 }
 0x1f2   : > { %v1313_v16 = vadd.f32 %v1234_v55, %v1015_v17  ;;  %v1532_v29 = vpop.f32.mrf.mxu3 }
 0x1f3   : > { %v938_v46 = vpop.f32.mrf.mxu1 }
 0x1f4   : > { %v1611_v31 = vadd.f32 %v1532_v29, %v1313_v16  ;;  %v1016_v2 = vadd.f32 %v938_v46, %v4780_v32  ;;  %v1961_v29 = vld [vmem:[#allocation3 + $0xc9] sm:$0xff] }
 0x1f5   : > { %v1832_v20 = vpop.f32.mrf.mxu0 }
 0x1f6   : > { %v4962_v51 = vadd.f32 %v1830_v26, %v1611_v31  ;;  %v1962_v31 = vld [vmem:[#allocation3 + $0xd1] sm:$0xff] }
 0x1f9   : > { %v1236_v50 = vpop.f32.mrf.mxu2 }
 0x1fa   : > { %v1314_v37 = vadd.f32 %v1236_v50, %v1016_v2  ;;  %v1534_v4 = vpop.f32.mrf.mxu3 }
 0x1fb   : > { %v941_v52 = vpop.f32.mrf.mxu1 }
 0x1fc   : > { %v1612_v58 = vadd.f32 %v1534_v4, %v1314_v37  ;;  %v1017_v32 = vadd.f32 %v941_v52, %v4689_v44  ;;  %v1988_v44 = vpack.c.bf16 %v1962_v31, %v1961_v29  ;;  %v2585_v37 = vpack.c.bf16 %v2559_v6, %v2558_v14  ;;  %v2263_v29 = vld [vmem:[#allocation3 + $0x10f] sm:$0xff] }
 0x1fd   : > { %v1835_v43 = vpop.f32.mrf.mxu0  ;;  %v2560_v31 = vld [vmem:[#allocation3 + $0x108] sm:$0xff] }
 0x1fe   : > { %2092 = vmatmul.bf16.gmra.mxu1 %v1987_v41  ;;  %2391 = vmatmul.bf16.gmra.mxu2 %v2286_v54  ;;  %v4965_v5 = vadd.f32 %v1832_v20, %v1612_v58 }
 0x1ff   : > { %2689 = vmatmul.bf16.gmra.mxu3 %v2584_v28 }
 0x200   : > { %2987 = vmatmul.bf16.gmra.mxu0 %v4729_v39 }
 0x201   : > { %v1239_v9 = vpop.f32.mrf.mxu2 }
 0x202   : > { %v1315_v34 = vadd.f32 %v1239_v9, %v1017_v32  ;;  %v1537_v26 = vpop.f32.mrf.mxu3 }
 0x203   : > { %v943_v17 = vpop.f32.mrf.mxu1 }
 0x204   : > { %v1613_v55 = vadd.f32 %v1537_v26, %v1315_v34  ;;  %v1018_v20 = vadd.f32 %v943_v17, %v4703_v35  ;;  %v1963_v34 = vld [vmem:[#allocation3 + $0xe9] sm:$0xff]  ;;  %v1964_v17 = vld [vmem:[#allocation3 + $0xf1] sm:$0xff] }
 0x205   : > { %v1837_v16 = vpop.f32.mrf.mxu0 }
 0x206   : > { %v4969_v46 = vadd.f32 %v1835_v43, %v1613_v55  ;;  %v2262_v55 = vld [vmem:[#allocation3 + $0x107] sm:$0xff] }
 0x207   : > { %v2288_v14 = vpack.c.bf16 %v2263_v29, %v2262_v55 }
 0x209   : > { %v1241_v2 = vpop.f32.mrf.mxu2 }
 0x20a   : > { %v1316_v39 = vadd.f32 %v1241_v2, %v1018_v20  ;;  %v1539_v12 = vpop.f32.mrf.mxu3  ;;  %v2586_v2 = vpack.c.bf16 %v2561_v48, %v2560_v31 }
 0x20b   : > { %v946_v50 = vpop.f32.mrf.mxu1 }
 0x20c   : > { %v1614_v4 = vadd.f32 %v1539_v12, %v1316_v39  ;;  %v1019_v35 = vadd.f32 %v946_v50, %v4719_v13  ;;  %v1989_v13 = vpack.c.bf16 %v1964_v17, %v1963_v34 }
 0x20d   : > { %v1840_v41 = vpop.f32.mrf.mxu0 }
 0x20e   : > { %2097 = vmatmul.bf16.gmra.mxu1 %v1988_v44  ;;  %2396 = vmatmul.bf16.gmra.mxu2 %v2287_v57  ;;  %v4972_v54 = vadd.f32 %v1837_v16, %v1614_v4 }
 0x20f   : > { %2694 = vmatmul.bf16.gmra.mxu3 %v2585_v37 }
 0x210   : > { %2992 = vmatmul.bf16.gmra.mxu0 %v4765_v25 }
 0x211   : > { %v1244_v52 = vpop.f32.mrf.mxu2 }
 0x212   : > { %v1317_v28 = vadd.f32 %v1244_v52, %v1019_v35  ;;  %v1542_v58 = vpop.f32.mrf.mxu3  ;;  %v1965_v52 = vld [vmem:[#allocation3 + $0x109] sm:$0xff] }
 0x213   : > { %v948_v43 = vpop.f32.mrf.mxu1 }
 0x214   : > { %v1615_v32 = vadd.f32 %v1542_v58, %v1317_v28  ;;  %v1020_v16 = vadd.f32 %v948_v43, %v4727_v30  ;;  %v1966_v58 = vld [vmem:[#allocation3 + $0x111] sm:$0xff]  ;;  %v2264_v43 = vld [vmem:[#allocation3 + $0x127] sm:$0xff] }
 0x215   : > { %v1842_v9 = vpop.f32.mrf.mxu0 }
 0x216   : > { %v4976_v26 = vadd.f32 %v1840_v41, %v1615_v32  ;;  %v2265_v32 = vld [vmem:[#allocation3 + $0x12f] sm:$0xff] }
 0x217   : > { %v2289_v29 = vpack.c.bf16 %v2265_v32, %v2264_v43 }
 0x219   : > { %v1246_v47 = vpop.f32.mrf.mxu2 }
 0x21a   : > { %v1318_v25 = vadd.f32 %v1246_v47, %v1020_v16  ;;  %v1544_v20 = vpop.f32.mrf.mxu3 }
 0x21b   : > { %v951_v6 = vpop.f32.mrf.mxu1 }
 0x21c   : > { %v1616_v39 = vadd.f32 %v1544_v20, %v1318_v25  ;;  %v1021_v30 = vadd.f32 %v951_v6, %v4749_v59 }
 0x21d   : > { %v1845_v12 = vpop.f32.mrf.mxu0 }
 0x21e   : > { %2102 = vmatmul.bf16.gmra.mxu1 %v1989_v13  ;;  %2401 = vmatmul.bf16.gmra.mxu2 %v2288_v14  ;;  %v4979_v44 = vadd.f32 %v1842_v9, %v1616_v39  ;;  %v2266_v39 = vld [vmem:[#allocation3 + $0x147] sm:$0xff] }
 0x21f   : > { %2699 = vmatmul.bf16.gmra.mxu3 %v2586_v2 }
 0x220   : > { %2997 = vmatmul.bf16.gmra.mxu0 %v4784_v15  ;;  %v1990_v15 = vpack.c.bf16 %v1966_v58, %v1965_v52 }
 0x221   : > { %v1249_v57 = vpop.f32.mrf.mxu2 }
 0x222   : > { %v1319_v50 = vadd.f32 %v1249_v57, %v1021_v30  ;;  %v1547_v37 = vpop.f32.mrf.mxu3  ;;  %v2564_v57 = vld [vmem:[#allocation3 + $0x148] sm:$0xff] }
 0x223   : > { %v953_v4 = vpop.f32.mrf.mxu1 }
 0x224   : > { %v1617_v41 = vadd.f32 %v1547_v37, %v1319_v50  ;;  %v1022_v9 = vadd.f32 %v953_v4, %v4763_v18  ;;  %v2565_v50 = vld [vmem:[#allocation3 + $0x150] sm:$0xff] }
 0x225   : > { %v1847_v35 = vpop.f32.mrf.mxu0 }
 0x226   : > { %v4983_v28 = vadd.f32 %v1845_v12, %v1617_v41  ;;  %v2267_v12 = vld [vmem:[#allocation3 + $0x14f] sm:$0xff] }
 0x227   : > { %v2290_v41 = vpack.c.bf16 %v2267_v12, %v2266_v39 }
 0x229   : > { %v1251_v34 = vpop.f32.mrf.mxu2 }
 0x22a   : > { %v1320_v17 = vadd.f32 %v1251_v34, %v1022_v9  ;;  %v1549_v55 = vpop.f32.mrf.mxu3 }
 0x22b   : > { %v956_v59 = vpop.f32.mrf.mxu1 }
 0x22c   : > { %v1618_v16 = vadd.f32 %v1549_v55, %v1320_v17  ;;  %v1023_v47 = vadd.f32 %v956_v59, %v4774_v21  ;;  %v2588_v21 = vpack.c.bf16 %v2565_v50, %v2564_v57  ;;  %v1970_v59 = vld [vmem:[#allocation3 + $0x151] sm:$0xff] }
 0x22d   : > { %v1850_v31 = vpop.f32.mrf.mxu0 }
 0x22e   : > { %2107 = vmatmul.bf16.gmra.mxu1 %v1990_v15  ;;  %2406 = vmatmul.bf16.gmra.mxu2 %v2289_v29  ;;  %v4986_v48 = vadd.f32 %v1847_v35, %v1618_v16  ;;  %v1969_v15 = vld [vmem:[#allocation3 + $0x149] sm:$0xff] }
 0x22f   : > { %2704 = vmatmul.bf16.gmra.mxu3 %v4808_v62  ;;  %v2268_v16 = vld [vmem:[#allocation3 + $0x167] sm:$0xff] }
 0x230   : > { %3002 = vmatmul.bf16.gmra.mxu0 %v4810_v63 }
 0x231   : > { %v1254_v25 = vpop.f32.mrf.mxu2 }
 0x232   : > { %v1321_v18 = vadd.f32 %v1254_v25, %v1023_v47  ;;  %v1552_v20 = vpop.f32.mrf.mxu3  ;;  %v2566_v47 = vld [vmem:[#allocation3 + $0x168] sm:$0xff]  ;;  %v2567_v25 = vld [vmem:[#allocation3 + $0x170] sm:$0xff] }
 0x233   : > { %v958_v13 = vpop.f32.mrf.mxu1  ;;  %v2589_v39 = vpack.c.bf16 %v2567_v25, %v2566_v47  ;;  %v5094_v25 = vld [vmem:[#allocation5_spill] sm:$0xff] }
 0x234   : > { %v1619_v14 = vadd.f32 %v1552_v20, %v1321_v18  ;;  %v1024_v30 = vadd.f32 %v958_v13, %v4782_v8 }
 0x235   : > { %v1852_v6 = vpop.f32.mrf.mxu0 }
 0x236   : > { %v4991_v2 = vadd.f32 %v1850_v31, %v1619_v14  ;;  %v2269_v31 = vld [vmem:[#allocation3 + $0x16f] sm:$0xff] }
 0x237   : > { %v2291_v14 = vpack.c.bf16 %v2269_v31, %v2268_v16 }
 0x239   : > { %v1256_v37 = vpop.f32.mrf.mxu2 }
 0x23a   : > { %v1322_v62 = vadd.f32 %v1256_v37, %v1024_v30  ;;  %v1554_v4 = vpop.f32.mrf.mxu3 }
 0x23b   : > { %v2073_v35 = vpop.f32.mrf.mxu1 }
 0x23c   : > { %v1620_v52 = vadd.f32 %v1554_v4, %v1322_v62  ;;  %v2185_v8 = vadd.f32 %v2073_v35, %v4806_v19 }
 0x23d   : > { %v2968_v58 = vpop.f32.mrf.mxu0 }
 0x23e   : > { %2112 = vmatmul.bf16.gmra.mxu1 %v4810_v63  ;;  %2411 = vmatmul.bf16.gmra.mxu2 %v2290_v41  ;;  %v4995_v43 = vadd.f32 %v1852_v6, %v1620_v52 }
 0x23f   : > { %2709 = vmatmul.bf16.gmra.mxu3 %v2588_v21 }
 0x240   : > { %3007 = vmatmul.bf16.gmra.mxu0 %v4825_v36  ;;  %v1992_v36 = vpack.c.bf16 %v1970_v59, %v1969_v15 }
 0x241   : > { %v2372_v32 = vpop.f32.mrf.mxu2 }
 0x242   : > { %v2670_v9 = vpop.f32.mrf.mxu3  ;;  %v2484_v34 = vadd.f32 %v2372_v32, %v2185_v8 }
 0x243   : > { %v2075_v17 = vpop.f32.mrf.mxu1 }
 0x244   : > { %v2782_v29 = vadd.f32 %v2670_v9, %v2484_v34  ;;  %v2186_v63 = vadd.f32 %v2075_v17, %v4819_v3 }
 0x245   : > { %v2970_v55 = vpop.f32.mrf.mxu0 }
 0x246   : > { %v3080_v19 = vadd.f32 %v2968_v58, %v2782_v29 }
 0x248   : > { %v3281_v50 = vmul.f32 %v3080_v19, %v3080_v19 }
 0x249   : > { %v2374_v18 = vpop.f32.mrf.mxu2 }
 0x24a   : > { %v2485_v20 = vadd.f32 %v2374_v18, %v2186_v63  ;;  %v2672_v13 = vpop.f32.mrf.mxu3  ;;  %v5095_v18 = vld [vmem:[#allocation8_spill] sm:$0xff] }
 0x24b   : > { %v2078_v6 = vpop.f32.mrf.mxu1 }
 0x24c   : > { %v2783_v12 = vadd.f32 %v2672_v13, %v2485_v20  ;;  %v2187_v4 = vadd.f32 %v2078_v6, %v4823_v56 }
 0x24d   : > { %v2973_v30 = vpop.f32.mrf.mxu0 }
 0x24e   : > { %v3081_v57 = vadd.f32 %v2970_v55, %v2783_v12  ;;  %2117 = vmatmul.bf16.gmra.mxu1 %v1992_v36  ;;  %2416 = vmatmul.bf16.gmra.mxu2 %v2291_v14  ;;  %v5096_v36 = vld [vmem:[#allocation4_spill] sm:$0xff] }
 0x24f   : > { %2714 = vmatmul.bf16.gmra.mxu3 %v2589_v39 }
 0x250   : > { %3012 = vmatmul.bf16.gmra.mxu0 %v4851_v45  ;;  %v3988_v3 = vpack.c.bf16 %v3081_v57, %v3080_v19  ;;  %v3241_v37 = vadd.f32 %v3081_v57, %v3080_v19  ;;  %v3282_v62 = vmul.f32 %v3081_v57, %v3081_v57 }
 0x251   : > { %v2377_v41 = vpop.f32.mrf.mxu2 }
 0x252   : > { %3989 = vst [vmem:[%s4192_s30] sm:$0xff] %v3988_v3   ;;  %v3313_v35 = vadd.f32 %v3282_v62, %v3281_v50  ;;  %v2486_v21 = vadd.f32 %v2377_v41, %v2187_v4  ;;  %v2675_v52 = vpop.f32.mrf.mxu3  ;;  %v1973_v3 = vld [vmem:[#allocation3 + $0x189] sm:$0xff] }
 0x253   : > { %v2080_v58 = vpop.f32.mrf.mxu1  ;;  %v2273_v62 = vld [vmem:[#allocation3 + $0x1af] sm:$0xff] }
 0x254   : > { %v2784_v8 = vadd.f32 %v2675_v52, %v2486_v21  ;;  %v2188_v55 = vadd.f32 %v2080_v58, %v4833_v22  ;;  %v2570_v52 = vld [vmem:[#allocation3 + $0x1a8] sm:$0xff]  ;;  %v2571_v58 = vld [vmem:[#allocation3 + $0x1b0] sm:$0xff] }
 0x255   : > { %v2975_v32 = vpop.f32.mrf.mxu0 }
 0x256   : > { %v3082_v9 = vadd.f32 %v2973_v30, %v2784_v8 }
 0x258   : > { %v3242_v34 = vadd.f32 %v3241_v37, %v3082_v9  ;;  %v3283_v17 = vmul.f32 %v3082_v9, %v3082_v9  ;;  %v2272_v37 = vld [vmem:[#allocation3 + $0x1a7] sm:$0xff] }
 0x259   : > { %v2379_v15 = vpop.f32.mrf.mxu2 }
 0x25a   : > { %v3314_v29 = vadd.f32 %v3313_v35, %v3283_v17  ;;  %v2487_v59 = vadd.f32 %v2379_v15, %v2188_v55  ;;  %v2677_v16 = vpop.f32.mrf.mxu3  ;;  %v5097_v35 = vld [vmem:[#allocation6_spill] sm:$0xff]  ;;  %v2293_v55 = vpack.c.bf16 %v2273_v62, %v2272_v37  ;;  %v2572_v37 = vld [vmem:[#allocation3 + $0x1c8] sm:$0xff] }
 0x25b   : > { %v2083_v31 = vpop.f32.mrf.mxu1  ;;  %v2573_v62 = vld [vmem:[#allocation3 + $0x1d0] sm:$0xff] }
 0x25c   : > { %v2785_v56 = vadd.f32 %v2677_v16, %v2487_v59  ;;  %v2189_v14 = vadd.f32 %v2083_v31, %v5096_v36 }
 0x25d   : > { %v2978_v63 = vpop.f32.mrf.mxu0 }
 0x25e   : > { %v3083_v47 = vadd.f32 %v2975_v32, %v2785_v56  ;;  %2122 = vmatmul.bf16.gmra.mxu1 %v4851_v45  ;;  %2421 = vmatmul.bf16.gmra.mxu2 %v4853_v0  ;;  %v1974_v0 = vld [vmem:[#allocation3 + $0x191] sm:$0xff] }
 0x25f   : > { %2719 = vmatmul.bf16.gmra.mxu3 %v5094_v25  ;;  %v1994_v17 = vpack.c.bf16 %v1974_v0, %v1973_v3  ;;  %v5098_v25 = vld [vmem:[#allocation7_spill] sm:$0xff] }
 0x260   : > { %3017 = vmatmul.bf16.gmra.mxu0 %v5095_v18  ;;  %v3993_v20 = vpack.c.bf16 %v3083_v47, %v3082_v9  ;;  %v3243_v13 = vadd.f32 %v3242_v34, %v3083_v47  ;;  %v3284_v22 = vmul.f32 %v3083_v47, %v3083_v47 }
 0x261   : > { %v2382_v19 = vpop.f32.mrf.mxu2 }
 0x262   : > { %4080 = vst [vmem:[%s4192_s30 + $0x8] sm:$0xff] %v3993_v20   ;;  %v3315_v6 = vadd.f32 %v3314_v29, %v3284_v22  ;;  %v2488_v39 = vadd.f32 %v2382_v19, %v2189_v14  ;;  %v2680_v12 = vpop.f32.mrf.mxu3  ;;  %v2591_v29 = vpack.c.bf16 %v2571_v58, %v2570_v52 }
 0x263   : > { %v2085_v30 = vpop.f32.mrf.mxu1 }
 0x264   : > { %v2786_v57 = vadd.f32 %v2680_v12, %v2488_v39  ;;  %v2190_v21 = vadd.f32 %v2085_v30, %v5097_v35  ;;  %v1975_v12 = vld [vmem:[#allocation3 + $0x1a9] sm:$0xff]  ;;  %v1976_v30 = vld [vmem:[#allocation3 + $0x1b1] sm:$0xff] }
 0x265   : > { %v2980_v50 = vpop.f32.mrf.mxu0  ;;  %v1995_v52 = vpack.c.bf16 %v1976_v30, %v1975_v12  ;;  %v2574_v12 = vld [vmem:[#allocation3 + $0x1e8] sm:$0xff]  ;;  %v2575_v30 = vld [vmem:[#allocation3 + $0x1f0] sm:$0xff] }
 0x266   : > { %v3084_v45 = vadd.f32 %v2978_v63, %v2786_v57  ;;  %v2274_v57 = vld [vmem:[#allocation3 + $0x1c7] sm:$0xff] }
 0x268   : > { %v3244_v4 = vadd.f32 %v3243_v13, %v3084_v45  ;;  %v3285_v41 = vmul.f32 %v3084_v45, %v3084_v45 }
 0x269   : > { %v2384_v8 = vpop.f32.mrf.mxu2 }
 0x26a   : > { %v3316_v32 = vadd.f32 %v3315_v6, %v3285_v41  ;;  %v2489_v9 = vadd.f32 %v2384_v8, %v2190_v21  ;;  %v2682_v34 = vpop.f32.mrf.mxu3 }
 0x26b   : > { %v2088_v15 = vpop.f32.mrf.mxu1 }
 0x26c   : > { %v2787_v59 = vadd.f32 %v2682_v34, %v2489_v9  ;;  %v2191_v18 = vadd.f32 %v2088_v15, %v5098_v25 }
 0x26d   : > { %v2983_v16 = vpop.f32.mrf.mxu0 }
 0x26e   : > { %v3085_v31 = vadd.f32 %v2980_v50, %v2787_v59  ;;  %2127 = vmatmul.bf16.gmra.mxu1 %v1994_v17  ;;  %2426 = vmatmul.bf16.gmra.mxu2 %v2293_v55  ;;  %v2275_v50 = vld [vmem:[#allocation3 + $0x1cf] sm:$0xff] }
 0x26f   : > { %2724 = vmatmul.bf16.gmra.mxu3 %v2591_v29  ;;  %v2294_v58 = vpack.c.bf16 %v2275_v50, %v2274_v57  ;;  %v5100_v59 = vld [vmem:[#allocation10_spill] sm:$0xff] }
 0x270   : > { %3022 = vmatmul.bf16.gmra.mxu0 %v4905_v33  ;;  %v3998_v56 = vpack.c.bf16 %v3085_v31, %v3084_v45  ;;  %v3245_v63 = vadd.f32 %v3244_v4, %v3085_v31  ;;  %v3286_v47 = vmul.f32 %v3085_v31, %v3085_v31  ;;  %v5099_v45 = vld [vmem:[#allocation9_spill] sm:$0xff] }
 0x271   : > { %v2387_v20 = vpop.f32.mrf.mxu2 }
 0x272   : > { %4081 = vst [vmem:[%s4192_s30 + $0x10] sm:$0xff] %v3998_v56   ;;  %v3317_v13 = vadd.f32 %v3316_v32, %v3286_v47  ;;  %v2490_v22 = vadd.f32 %v2387_v20, %v2191_v18  ;;  %v2685_v36 = vpop.f32.mrf.mxu3  ;;  %v2592_v32 = vpack.c.bf16 %v2573_v62, %v2572_v37  ;;  %v2593_v62 = vpack.c.bf16 %v2575_v30, %v2574_v12 }
 0x273   : > { %v2090_v14 = vpop.f32.mrf.mxu1 }
 0x274   : > { %v2788_v19 = vadd.f32 %v2685_v36, %v2490_v22  ;;  %v2192_v0 = vadd.f32 %v2090_v14, %v5099_v45  ;;  %v1977_v22 = vld [vmem:[#allocation3 + $0x1c9] sm:$0xff]  ;;  %v1978_v36 = vld [vmem:[#allocation3 + $0x1d1] sm:$0xff] }
 0x275   : > { %v2985_v6 = vpop.f32.mrf.mxu0  ;;  %v2276_v14 = vld [vmem:[#allocation3 + $0x1e7] sm:$0xff]  ;;  %v1996_v45 = vpack.c.bf16 %v1978_v36, %v1977_v22  ;;  %v2875_v22 = vld [vmem:[#allocation3 + $0x211] sm:$0xff] }
 0x276   : > { %v3086_v39 = vadd.f32 %v2983_v16, %v2788_v19  ;;  %v2277_v19 = vld [vmem:[#allocation3 + $0x1ef] sm:$0xff] }
 0x278   : > { %v3246_v3 = vadd.f32 %v3245_v63, %v3086_v39  ;;  %v3287_v33 = vmul.f32 %v3086_v39, %v3086_v39 }
 0x279   : > { %v2389_v4 = vpop.f32.mrf.mxu2 }
 0x27a   : > { %v3318_v41 = vadd.f32 %v3317_v13, %v3287_v33  ;;  %v2491_v35 = vadd.f32 %v2389_v4, %v2192_v0  ;;  %v2687_v21 = vpop.f32.mrf.mxu3  ;;  %v2295_v0 = vpack.c.bf16 %v2277_v19, %v2276_v14 }
 0x27b   : > { %v2093_v8 = vpop.f32.mrf.mxu1 }
 0x27c   : > { %v2789_v9 = vadd.f32 %v2687_v21, %v2491_v35  ;;  %v2193_v16 = vadd.f32 %v2093_v8, %v5100_v59 }
 0x27d   : > { %v2988_v34 = vpop.f32.mrf.mxu0 }
 0x27e   : > { %v3087_v17 = vadd.f32 %v2985_v6, %v2789_v9  ;;  %2132 = vmatmul.bf16.gmra.mxu1 %v1995_v52  ;;  %2431 = vmatmul.bf16.gmra.mxu2 %v2294_v58  ;;  %v5101_v58 = vld [vmem:[#allocation11_spill] sm:$0xff] }
 0x27f   : > { %2729 = vmatmul.bf16.gmra.mxu3 %v2592_v32 }
 0x280   : > { %3027 = vmatmul.bf16.gmra.mxu0 %v4914_v38  ;;  %v4003_v55 = vpack.c.bf16 %v3087_v17, %v3086_v39  ;;  %v3247_v15 = vadd.f32 %v3246_v3, %v3087_v17  ;;  %v3288_v29 = vmul.f32 %v3087_v17, %v3087_v17 }
 0x281   : > { %v2392_v31 = vpop.f32.mrf.mxu2 }
 0x282   : > { %4082 = vst [vmem:[%s4192_s30 + $0x18] sm:$0xff] %v4003_v55   ;;  %v3319_v56 = vadd.f32 %v3318_v41, %v3288_v29  ;;  %v2492_v63 = vadd.f32 %v2392_v31, %v2193_v16  ;;  %v2690_v47 = vpop.f32.mrf.mxu3  ;;  %v1979_v16 = vld [vmem:[#allocation3 + $0x1e9] sm:$0xff]  ;;  %v1980_v31 = vld [vmem:[#allocation3 + $0x1f1] sm:$0xff] }
 0x283   : > { %v2095_v25 = vpop.f32.mrf.mxu1 }
 0x284   : > { %v2790_v18 = vadd.f32 %v2690_v47, %v2492_v63  ;;  %v2194_v39 = vadd.f32 %v2095_v25, %v4908_v7  ;;  %v2279_v63 = vld [vmem:[#allocation3 + $0x20f] sm:$0xff] }
 0x285   : > { %v2990_v20 = vpop.f32.mrf.mxu0  ;;  %v2576_v47 = vld [vmem:[#allocation3 + $0x208] sm:$0xff] }
 0x286   : > { %v3088_v13 = vadd.f32 %v2988_v34, %v2790_v18 }
 0x288   : > { %v3248_v6 = vadd.f32 %v3247_v15, %v3088_v13  ;;  %v3289_v38 = vmul.f32 %v3088_v13, %v3088_v13 }
 0x289   : > { %v2394_v57 = vpop.f32.mrf.mxu2 }
 0x28a   : > { %v3320_v50 = vadd.f32 %v3319_v56, %v3289_v38  ;;  %v2493_v3 = vadd.f32 %v2394_v57, %v2194_v39  ;;  %v2692_v33 = vpop.f32.mrf.mxu3  ;;  %v2278_v56 = vld [vmem:[#allocation3 + $0x207] sm:$0xff]  ;;  %v1997_v38 = vpack.c.bf16 %v1980_v31, %v1979_v16 }
 0x28b   : > { %v2098_v37 = vpop.f32.mrf.mxu1  ;;  %v2296_v39 = vpack.c.bf16 %v2279_v63, %v2278_v56 }
 0x28c   : > { %v2791_v4 = vadd.f32 %v2692_v33, %v2493_v3  ;;  %v2195_v8 = vadd.f32 %v2098_v37, %v5101_v58 }
 0x28d   : > { %v2993_v41 = vpop.f32.mrf.mxu0 }
 0x28e   : > { %v3089_v35 = vadd.f32 %v2990_v20, %v2791_v4  ;;  %2137 = vmatmul.bf16.gmra.mxu1 %v1996_v45  ;;  %2436 = vmatmul.bf16.gmra.mxu2 %v2295_v0  ;;  %v2577_v20 = vld [vmem:[#allocation3 + $0x210] sm:$0xff] }
 0x28f   : > { %2734 = vmatmul.bf16.gmra.mxu3 %v2593_v62  ;;  %v2594_v30 = vpack.c.bf16 %v2577_v20, %v2576_v47 }
 0x290   : > { %3032 = vmatmul.bf16.gmra.mxu0 %v4923_v53  ;;  %v4008_v7 = vpack.c.bf16 %v3089_v35, %v3088_v13  ;;  %v3249_v21 = vadd.f32 %v3248_v6, %v3089_v35  ;;  %v3290_v52 = vmul.f32 %v3089_v35, %v3089_v35  ;;  %v2874_v13 = vld [vmem:[#allocation3 + $0x209] sm:$0xff] }
 0x291   : > { %v2397_v32 = vpop.f32.mrf.mxu2  ;;  %v2892_v57 = vpack.c.bf16 %v2875_v22, %v2874_v13 }
 0x292   : > { %4083 = vst [vmem:[%s4192_s30 + $0x20] sm:$0xff] %v4008_v7   ;;  %v3321_v9 = vadd.f32 %v3320_v50, %v3290_v52  ;;  %v2494_v34 = vadd.f32 %v2397_v32, %v2195_v8  ;;  %v2695_v17 = vpop.f32.mrf.mxu3  ;;  %v2280_v8 = vld [vmem:[#allocation3 + $0x227] sm:$0xff]  ;;  %v2281_v32 = vld [vmem:[#allocation3 + $0x22f] sm:$0xff] }
 0x293   : > { %v2100_v55 = vpop.f32.mrf.mxu1  ;;  %v2297_v63 = vpack.c.bf16 %v2281_v32, %v2280_v8 }
 0x294   : > { %v2792_v15 = vadd.f32 %v2695_v17, %v2494_v34  ;;  %v2196_v18 = vadd.f32 %v2100_v55, %v4917_v24 }
 0x295   : > { %v2995_v29 = vpop.f32.mrf.mxu0 }
 0x296   : > { %v3090_v59 = vadd.f32 %v2993_v41, %v2792_v15  ;;  %v2579_v15 = vld [vmem:[#allocation3 + $0x230] sm:$0xff] }
 0x298   : > { %v3250_v53 = vadd.f32 %v3249_v21, %v3090_v59  ;;  %v3291_v25 = vmul.f32 %v3090_v59, %v3090_v59 }
 0x299   : > { %v2399_v36 = vpop.f32.mrf.mxu2 }
 0x29a   : > { %v3322_v14 = vadd.f32 %v3321_v9, %v3291_v25  ;;  %v2495_v19 = vadd.f32 %v2399_v36, %v2196_v18  ;;  %v2697_v6 = vpop.f32.mrf.mxu3  ;;  %v2578_v9 = vld [vmem:[#allocation3 + $0x228] sm:$0xff] }
 0x29b   : > { %v2103_v12 = vpop.f32.mrf.mxu1 }
 0x29c   : > { %v2793_v50 = vadd.f32 %v2697_v6, %v2495_v19  ;;  %v2197_v37 = vadd.f32 %v2103_v12, %v4920_v61 }
 0x29d   : > { %v2998_v3 = vpop.f32.mrf.mxu0 }
 0x29e   : > { %v3091_v33 = vadd.f32 %v2995_v29, %v2793_v50  ;;  %2142 = vmatmul.bf16.gmra.mxu1 %v1997_v38  ;;  %2441 = vmatmul.bf16.gmra.mxu2 %v2296_v39  ;;  %v2876_v29 = vld [vmem:[#allocation3 + $0x229] sm:$0xff] }
 0x29f   : > { %2739 = vmatmul.bf16.gmra.mxu3 %v2594_v30 }
 0x2a0   : > { %3037 = vmatmul.bf16.gmra.mxu0 %v2892_v57  ;;  %v4013_v24 = vpack.c.bf16 %v3091_v33, %v3090_v59  ;;  %v3251_v45 = vadd.f32 %v3250_v53, %v3091_v33  ;;  %v3292_v0 = vmul.f32 %v3091_v33, %v3091_v33  ;;  %v2877_v59 = vld [vmem:[#allocation3 + $0x231] sm:$0xff]  ;;  %v2595_v53 = vpack.c.bf16 %v2579_v15, %v2578_v9 }
 0x2a1   : > { %v2402_v62 = vpop.f32.mrf.mxu2  ;;  %v2893_v25 = vpack.c.bf16 %v2877_v59, %v2876_v29 }
 0x2a2   : > { %4084 = vst [vmem:[%s4192_s30 + $0x28] sm:$0xff] %v4013_v24   ;;  %v3323_v4 = vadd.f32 %v3322_v14, %v3292_v0  ;;  %v2496_v41 = vadd.f32 %v2402_v62, %v2197_v37  ;;  %v2700_v35 = vpop.f32.mrf.mxu3 }
 0x2a3   : > { %v2105_v7 = vpop.f32.mrf.mxu1 }
 0x2a4   : > { %v2794_v21 = vadd.f32 %v2700_v35, %v2496_v41  ;;  %v2198_v55 = vadd.f32 %v2105_v7, %v4930_v10 }
 0x2a5   : > { %v3000_v52 = vpop.f32.mrf.mxu0 }
 0x2a6   : > { %v3092_v58 = vadd.f32 %v2998_v3, %v2794_v21 }
 0x2a8   : > { %v3252_v34 = vadd.f32 %v3251_v45, %v3092_v58  ;;  %v3293_v17 = vmul.f32 %v3092_v58, %v3092_v58 }
 0x2a9   : > { %v2404_v61 = vpop.f32.mrf.mxu2 }
 0x2aa   : > { %v3324_v16 = vadd.f32 %v3323_v4, %v3293_v17  ;;  %v2497_v31 = vadd.f32 %v2404_v61, %v2198_v55  ;;  %v2702_v56 = vpop.f32.mrf.mxu3 }
 0x2ab   : > { %v2108_v47 = vpop.f32.mrf.mxu1 }
 0x2ac   : > { %v2795_v18 = vadd.f32 %v2702_v56, %v2497_v31  ;;  %v2199_v14 = vadd.f32 %v2108_v47, %v4933_v23 }
 0x2ad   : > { %v3003_v20 = vpop.f32.mrf.mxu0 }
 0x2ae   : > { %v3093_v13 = vadd.f32 %v3000_v52, %v2795_v18  ;;  %2147 = vmatmul.bf16.gmra.mxu1 %v2892_v57  ;;  %2446 = vmatmul.bf16.gmra.mxu2 %v2297_v63 }
 0x2af   : > { %2744 = vmatmul.bf16.gmra.mxu3 %v2595_v53 }
 0x2b0   : > { %3042 = vmatmul.bf16.gmra.mxu0 %v2893_v25  ;;  %v4018_v10 = vpack.c.bf16 %v3093_v13, %v3092_v58  ;;  %v3253_v22 = vadd.f32 %v3252_v34, %v3093_v13  ;;  %v3294_v36 = vmul.f32 %v3093_v13, %v3093_v13 }
 0x2b1   : > { %v2407_v19 = vpop.f32.mrf.mxu2 }
 0x2b2   : > { %4085 = vst [vmem:[%s4192_s30 + $0x30] sm:$0xff] %v4018_v10   ;;  %v3325_v6 = vadd.f32 %v3324_v16, %v3294_v36  ;;  %v2498_v38 = vadd.f32 %v2407_v19, %v2199_v14  ;;  %v2705_v39 = vpop.f32.mrf.mxu3 }
 0x2b3   : > { %v2110_v12 = vpop.f32.mrf.mxu1 }
 0x2b4   : > { %v2796_v30 = vadd.f32 %v2705_v39, %v2498_v38  ;;  %v2200_v24 = vadd.f32 %v2110_v12, %v4937_v11 }
 0x2b5   : > { %v3005_v50 = vpop.f32.mrf.mxu0 }
 0x2b6   : > { %v3094_v3 = vadd.f32 %v3003_v20, %v2796_v30 }
 0x2b8   : > { %v3254_v33 = vadd.f32 %v3253_v22, %v3094_v3  ;;  %v3295_v57 = vmul.f32 %v3094_v3, %v3094_v3 }
 0x2b9   : > { %v2409_v45 = vpop.f32.mrf.mxu2 }
 0x2ba   : > { %v3326_v0 = vadd.f32 %v3325_v6, %v3295_v57  ;;  %v2499_v37 = vadd.f32 %v2409_v45, %v2200_v24  ;;  %v2707_v62 = vpop.f32.mrf.mxu3 }
 0x2bb   : > { %v2113_v4 = vpop.f32.mrf.mxu1 }
 0x2bc   : > { %v2797_v23 = vadd.f32 %v2707_v62, %v2499_v37  ;;  %v2201_v58 = vadd.f32 %v2113_v4, %v4941_v40 }
 0x2bd   : > { %v3008_v41 = vpop.f32.mrf.mxu0 }
 0x2be   : > { %v3095_v35 = vadd.f32 %v3005_v50, %v2797_v23 }
 0x2c0   : > { %v4023_v7 = vpack.c.bf16 %v3095_v35, %v3094_v3  ;;  %v3255_v21 = vadd.f32 %v3254_v33, %v3095_v35  ;;  %v3296_v52 = vmul.f32 %v3095_v35, %v3095_v35 }
 0x2c1   : > { %v2412_v8 = vpop.f32.mrf.mxu2 }
 0x2c2   : > { %4086 = vst [vmem:[%s4192_s30 + $0x38] sm:$0xff] %v4023_v7   ;;  %v3327_v32 = vadd.f32 %v3326_v0, %v3296_v52  ;;  %v2500_v9 = vadd.f32 %v2412_v8, %v2201_v58  ;;  %v2710_v34 = vpop.f32.mrf.mxu3 }
 0x2c3   : > { %v2115_v17 = vpop.f32.mrf.mxu1 }
 0x2c4   : > { %v2798_v11 = vadd.f32 %v2710_v34, %v2500_v9  ;;  %v2202_v61 = vadd.f32 %v2115_v17, %v4944_v60 }
 0x2c5   : > { %v3010_v55 = vpop.f32.mrf.mxu0 }
 0x2c6   : > { %v3096_v15 = vadd.f32 %v3008_v41, %v2798_v11 }
 0x2c8   : > { %v3256_v29 = vadd.f32 %v3255_v21, %v3096_v15  ;;  %v3297_v59 = vmul.f32 %v3096_v15, %v3096_v15 }
 0x2c9   : > { %v2414_v16 = vpop.f32.mrf.mxu2 }
 0x2ca   : > { %v3328_v31 = vadd.f32 %v3327_v32, %v3297_v59  ;;  %v2501_v56 = vadd.f32 %v2414_v16, %v2202_v61  ;;  %v2712_v63 = vpop.f32.mrf.mxu3 }
 0x2cb   : > { %v2118_v47 = vpop.f32.mrf.mxu1 }
 0x2cc   : > { %v2799_v40 = vadd.f32 %v2712_v63, %v2501_v56  ;;  %v2203_v10 = vadd.f32 %v2118_v47, %v4948_v27 }
 0x2cd   : > { %v3013_v53 = vpop.f32.mrf.mxu0 }
 0x2ce   : > { %v3097_v25 = vadd.f32 %v3010_v55, %v2799_v40 }
 0x2d0   : > { %v4028_v18 = vpack.c.bf16 %v3097_v25, %v3096_v15  ;;  %v3257_v20 = vadd.f32 %v3256_v29, %v3097_v25  ;;  %v3298_v13 = vmul.f32 %v3097_v25, %v3097_v25 }
 0x2d1   : > { %v2417_v22 = vpop.f32.mrf.mxu2 }
 0x2d2   : > { %4087 = vst [vmem:[%s4192_s30 + $0x40] sm:$0xff] %v4028_v18   ;;  %v3329_v36 = vadd.f32 %v3328_v31, %v3298_v13  ;;  %v2502_v14 = vadd.f32 %v2417_v22, %v2203_v10  ;;  %v2715_v19 = vpop.f32.mrf.mxu3 }
 0x2d3   : > { %v2120_v6 = vpop.f32.mrf.mxu1 }
 0x2d4   : > { %v2800_v60 = vadd.f32 %v2715_v19, %v2502_v14  ;;  %v2204_v50 = vadd.f32 %v2120_v6, %v4951_v49 }
 0x2d5   : > { %v3015_v38 = vpop.f32.mrf.mxu0 }
 0x2d6   : > { %v3098_v39 = vadd.f32 %v3013_v53, %v2800_v60 }
 0x2d8   : > { %v3258_v12 = vadd.f32 %v3257_v20, %v3098_v39  ;;  %v3299_v30 = vmul.f32 %v3098_v39, %v3098_v39 }
 0x2d9   : > { %v2419_v3 = vpop.f32.mrf.mxu2 }
 0x2da   : > { %v3330_v33 = vadd.f32 %v3329_v36, %v3299_v30  ;;  %v2503_v57 = vadd.f32 %v2419_v3, %v2204_v50  ;;  %v2717_v24 = vpop.f32.mrf.mxu3 }
 0x2db   : > { %v2123_v45 = vpop.f32.mrf.mxu1 }
 0x2dc   : > { %v2801_v27 = vadd.f32 %v2717_v24, %v2503_v57  ;;  %v2205_v41 = vadd.f32 %v2123_v45, %v4955_v42 }
 0x2dd   : > { %v3018_v0 = vpop.f32.mrf.mxu0 }
 0x2de   : > { %v3099_v37 = vadd.f32 %v3015_v38, %v2801_v27 }
 0x2e0   : > { %v4033_v62 = vpack.c.bf16 %v3099_v37, %v3098_v39  ;;  %v3259_v4 = vadd.f32 %v3258_v12, %v3099_v37  ;;  %v3300_v23 = vmul.f32 %v3099_v37, %v3099_v37 }
 0x2e1   : > { %v2422_v35 = vpop.f32.mrf.mxu2 }
 0x2e2   : > { %4088 = vst [vmem:[%s4192_s30 + $0x48] sm:$0xff] %v4033_v62   ;;  %v3331_v7 = vadd.f32 %v3330_v33, %v3300_v23  ;;  %v2504_v21 = vadd.f32 %v2422_v35, %v2205_v41  ;;  %v2720_v52 = vpop.f32.mrf.mxu3 }
 0x2e3   : > { %v2125_v58 = vpop.f32.mrf.mxu1 }
 0x2e4   : > { %v2802_v49 = vadd.f32 %v2720_v52, %v2504_v21  ;;  %v2206_v17 = vadd.f32 %v2125_v58, %v4958_v1 }
 0x2e5   : > { %v3020_v8 = vpop.f32.mrf.mxu0 }
 0x2e6   : > { %v3100_v32 = vadd.f32 %v3018_v0, %v2802_v49 }
 0x2e8   : > { %v3260_v9 = vadd.f32 %v3259_v4, %v3100_v32  ;;  %v3301_v34 = vmul.f32 %v3100_v32, %v3100_v32 }
 0x2e9   : > { %v2424_v11 = vpop.f32.mrf.mxu2 }
 0x2ea   : > { %v3332_v55 = vadd.f32 %v3331_v7, %v3301_v34  ;;  %v2505_v15 = vadd.f32 %v2424_v11, %v2206_v17  ;;  %v2722_v29 = vpop.f32.mrf.mxu3 }
 0x2eb   : > { %v2128_v59 = vpop.f32.mrf.mxu1 }
 0x2ec   : > { %v2803_v42 = vadd.f32 %v2722_v29, %v2505_v15  ;;  %v2207_v47 = vadd.f32 %v2128_v59, %v4962_v51 }
 0x2ed   : > { %v3023_v61 = vpop.f32.mrf.mxu0 }
 0x2ee   : > { %v3101_v16 = vadd.f32 %v3020_v8, %v2803_v42 }
 0x2f0   : > { %v4038_v31 = vpack.c.bf16 %v3101_v16, %v3100_v32  ;;  %v3261_v56 = vadd.f32 %v3260_v9, %v3101_v16  ;;  %v3302_v63 = vmul.f32 %v3101_v16, %v3101_v16 }
 0x2f1   : > { %v2427_v40 = vpop.f32.mrf.mxu2 }
 0x2f2   : > { %4089 = vst [vmem:[%s4192_s30 + $0x50] sm:$0xff] %v4038_v31   ;;  %v3333_v53 = vadd.f32 %v3332_v55, %v3302_v63  ;;  %v2506_v25 = vadd.f32 %v2427_v40, %v2207_v47  ;;  %v2725_v18 = vpop.f32.mrf.mxu3 }
 0x2f3   : > { %v2130_v20 = vpop.f32.mrf.mxu1 }
 0x2f4   : > { %v2804_v1 = vadd.f32 %v2725_v18, %v2506_v25  ;;  %v2208_v14 = vadd.f32 %v2130_v20, %v4965_v5 }
 0x2f5   : > { %v3025_v13 = vpop.f32.mrf.mxu0 }
 0x2f6   : > { %v3102_v10 = vadd.f32 %v3023_v61, %v2804_v1 }
 0x2f8   : > { %v3262_v22 = vadd.f32 %v3261_v56, %v3102_v10  ;;  %v3303_v36 = vmul.f32 %v3102_v10, %v3102_v10 }
 0x2f9   : > { %v2429_v19 = vpop.f32.mrf.mxu2 }
 0x2fa   : > { %v3334_v6 = vadd.f32 %v3333_v53, %v3303_v36  ;;  %v2507_v60 = vadd.f32 %v2429_v19, %v2208_v14  ;;  %v2727_v38 = vpop.f32.mrf.mxu3 }
 0x2fb   : > { %v2133_v39 = vpop.f32.mrf.mxu1 }
 0x2fc   : > { %v2805_v51 = vadd.f32 %v2727_v38, %v2507_v60  ;;  %v2209_v57 = vadd.f32 %v2133_v39, %v4969_v46 }
 0x2fd   : > { %v3028_v12 = vpop.f32.mrf.mxu0 }
 0x2fe   : > { %v3103_v30 = vadd.f32 %v3025_v13, %v2805_v51 }
 0x300   : > { %v4043_v50 = vpack.c.bf16 %v3103_v30, %v3102_v10  ;;  %v3263_v3 = vadd.f32 %v3262_v22, %v3103_v30  ;;  %v3304_v33 = vmul.f32 %v3103_v30, %v3103_v30 }
 0x301   : > { %v2432_v24 = vpop.f32.mrf.mxu2 }
 0x302   : > { %4090 = vst [vmem:[%s4192_s30 + $0x58] sm:$0xff] %v4043_v50   ;;  %v3335_v45 = vadd.f32 %v3334_v6, %v3304_v33  ;;  %v2508_v27 = vadd.f32 %v2432_v24, %v2209_v57  ;;  %v2730_v0 = vpop.f32.mrf.mxu3 }
 0x303   : > { %v2135_v37 = vpop.f32.mrf.mxu1 }
 0x304   : > { %v2806_v5 = vadd.f32 %v2730_v0, %v2508_v27  ;;  %v2210_v35 = vadd.f32 %v2135_v37, %v4972_v54 }
 0x305   : > { %v3030_v62 = vpop.f32.mrf.mxu0 }
 0x306   : > { %v3104_v4 = vadd.f32 %v3028_v12, %v2806_v5 }
 0x308   : > { %v3264_v23 = vadd.f32 %v3263_v3, %v3104_v4  ;;  %v3305_v41 = vmul.f32 %v3104_v4, %v3104_v4 }
 0x309   : > { %v2434_v7 = vpop.f32.mrf.mxu2 }
 0x30a   : > { %v3336_v21 = vadd.f32 %v3335_v45, %v3305_v41  ;;  %v2509_v52 = vadd.f32 %v2434_v7, %v2210_v35  ;;  %v2732_v58 = vpop.f32.mrf.mxu3 }
 0x30b   : > { %v2138_v49 = vpop.f32.mrf.mxu1 }
 0x30c   : > { %v2807_v46 = vadd.f32 %v2732_v58, %v2509_v52  ;;  %v2211_v11 = vadd.f32 %v2138_v49, %v4976_v26 }
 0x30d   : > { %v3033_v8 = vpop.f32.mrf.mxu0 }
 0x30e   : > { %v3105_v32 = vadd.f32 %v3030_v62, %v2807_v46 }
 0x310   : > { %v4048_v9 = vpack.c.bf16 %v3105_v32, %v3104_v4  ;;  %v3265_v34 = vadd.f32 %v3264_v23, %v3105_v32  ;;  %v3306_v17 = vmul.f32 %v3105_v32, %v3105_v32 }
 0x311   : > { %v2437_v55 = vpop.f32.mrf.mxu2 }
 0x312   : > { %4091 = vst [vmem:[%s4192_s30 + $0x60] sm:$0xff] %v4048_v9   ;;  %v3337_v15 = vadd.f32 %v3336_v21, %v3306_v17  ;;  %v2510_v29 = vadd.f32 %v2437_v55, %v2211_v11  ;;  %v2735_v59 = vpop.f32.mrf.mxu3 }
 0x313   : > { %v2140_v42 = vpop.f32.mrf.mxu1 }
 0x314   : > { %v2808_v54 = vadd.f32 %v2735_v59, %v2510_v29  ;;  %v2212_v63 = vadd.f32 %v2140_v42, %v4979_v44 }
 0x315   : > { %v3035_v61 = vpop.f32.mrf.mxu0 }
 0x316   : > { %v3106_v16 = vadd.f32 %v3033_v8, %v2808_v54 }
 0x318   : > { %v3266_v31 = vadd.f32 %v3265_v34, %v3106_v16  ;;  %v3307_v56 = vmul.f32 %v3106_v16, %v3106_v16 }
 0x319   : > { %v2439_v47 = vpop.f32.mrf.mxu2 }
 0x31a   : > { %v3338_v40 = vadd.f32 %v3337_v15, %v3307_v56  ;;  %v2511_v53 = vadd.f32 %v2439_v47, %v2212_v63  ;;  %v2737_v25 = vpop.f32.mrf.mxu3 }
 0x31b   : > { %v2143_v18 = vpop.f32.mrf.mxu1 }
 0x31c   : > { %v2809_v26 = vadd.f32 %v2737_v25, %v2511_v53  ;;  %v2213_v36 = vadd.f32 %v2143_v18, %v4983_v28  ;;  %v3280_v18 = vld [vmem:[%s5075_s6] sm:$0x1] }
 0x31d   : > { %v3038_v1 = vpop.f32.mrf.mxu0 }
 0x31e   : > { %v3107_v20 = vadd.f32 %v3035_v61, %v2809_v26 }
 0x320   : > { %v4053_v13 = vpack.c.bf16 %v3107_v20, %v3106_v16  ;;  %v3267_v10 = vadd.f32 %v3266_v31, %v3107_v20  ;;  %v3308_v22 = vmul.f32 %v3107_v20, %v3107_v20 }
 0x321   : > { %v2442_v14 = vpop.f32.mrf.mxu2 }
 0x322   : > { %4092 = vst [vmem:[%s4192_s30 + $0x68] sm:$0xff] %v4053_v13   ;;  %v3339_v19 = vadd.f32 %v3338_v40, %v3308_v22  ;;  %v2512_v6 = vadd.f32 %v2442_v14, %v2213_v36  ;;  %v2740_v60 = vpop.f32.mrf.mxu3  ;;  %v3240_v40 = vld [vmem:[%s5074_s5] sm:$0x1] }
 0x323   : > { %v2145_v38 = vpop.f32.mrf.mxu1 }
 0x324   : > { %v2810_v44 = vadd.f32 %v2740_v60, %v2512_v6  ;;  %v2214_v30 = vadd.f32 %v2145_v38, %v4986_v48 }
 0x325   : > { %v3040_v50 = vpop.f32.mrf.mxu0 }
 0x326   : > { %v3108_v39 = vadd.f32 %v3038_v1, %v2810_v44 }
 0x328   : > { %v3268_v51 = vadd.f32 %v3267_v10, %v3108_v39  ;;  %v3309_v12 = vmul.f32 %v3108_v39, %v3108_v39 }
 0x329   : > { %v2444_v3 = vpop.f32.mrf.mxu2 }
 0x32a   : > { %v3340_v33 = vadd.f32 %v3339_v19, %v3309_v12  ;;  %v2513_v57 = vadd.f32 %v2444_v3, %v2214_v30  ;;  %v2742_v24 = vpop.f32.mrf.mxu3 }
 0x32b   : > { %v2148_v45 = vpop.f32.mrf.mxu1 }
 0x32c   : > { %v2811_v28 = vadd.f32 %v2742_v24, %v2513_v57  ;;  %v2215_v62 = vadd.f32 %v2148_v45, %v4991_v2 }
 0x32d   : > { %v3043_v7 = vpop.f32.mrf.mxu0 }
 0x32e   : > { %v3109_v27 = vadd.f32 %v3040_v50, %v2811_v28 }
 0x330   : > { %v4058_v0 = vpack.c.bf16 %v3109_v27, %v3108_v39  ;;  %v3269_v37 = vadd.f32 %v3268_v51, %v3109_v27  ;;  %v3310_v5 = vmul.f32 %v3109_v27, %v3109_v27 }
 0x331   : > { %v2447_v4 = vpop.f32.mrf.mxu2 }
 0x332   : > { %4093 = vst [vmem:[%s4192_s30 + $0x70] sm:$0xff] %v4058_v0   ;;  %v3341_v23 = vadd.f32 %v3340_v33, %v3310_v5  ;;  %v2514_v41 = vadd.f32 %v2447_v4, %v2215_v62  ;;  %v2745_v35 = vpop.f32.mrf.mxu3 }
 0x333   : > { %v2150_v21 = vpop.f32.mrf.mxu1 }
 0x334   : > { %v2812_v48 = vadd.f32 %v2745_v35, %v2514_v41  ;;  %v2216_v46 = vadd.f32 %v2150_v21, %v4995_v43 }
 0x335   : > { %v3045_v2 = vpop.f32.mrf.mxu0 }
 0x336   : > { %v3110_v52 = vadd.f32 %v3043_v7, %v2812_v48 }
 0x338   : > { %v3270_v58 = vadd.f32 %v3269_v37, %v3110_v52  ;;  %v3311_v49 = vmul.f32 %v3110_v52, %v3110_v52 }
 0x339   : > { %v2449_v8 = vpop.f32.mrf.mxu2 }
 0x33a   : > { %v3342_v32 = vadd.f32 %v3341_v23, %v3311_v49  ;;  %v2515_v9 = vadd.f32 %v2449_v8, %v2216_v46  ;;  %v2747_v34 = vpop.f32.mrf.mxu3 }
 0x33c   : > { %v2813_v17 = vadd.f32 %v2747_v34, %v2515_v9 }
 0x33e   : > { %v3111_v11 = vadd.f32 %v3045_v2, %v2813_v17 }
 0x340   : > { %v4063_v55 = vpack.c.bf16 %v3111_v11, %v3110_v52  ;;  %v3271_v15 = vadd.f32 %v3270_v58, %v3111_v11  ;;  %v3312_v29 = vmul.f32 %v3111_v11, %v3111_v11 }
 0x342   : > { %4094 = vst [vmem:[%s4192_s30 + $0x78] sm:$0xff] %v4063_v55   ;;  %v3272_v59 = vrot.slane %v3271_v15, 4  ;;  %v3343_v42 = vadd.f32 %v3342_v32, %v3312_v29 }
 0x344   : > { %v3273_v54 = vadd.f32 %v3272_v59, %v3271_v15  ;;  %v3344_v61 = vrot.slane %v3343_v42, 4 }
 0x346   : > { %v3274_v16 = vrot.slane %v3273_v54, 2  ;;  %v3345_v31 = vadd.f32 %v3344_v61, %v3343_v42 }
 0x348   : > { %v3275_v56 = vadd.f32 %v3274_v16, %v3273_v54  ;;  %v3346_v63 = vrot.slane %v3345_v31, 2 }
 0x34a   : > { %v3276_v43 = vrot.slane %v3275_v56, 1  ;;  %v3347_v47 = vadd.f32 %v3346_v63, %v3345_v31 }
 0x34c   : > { %v3277_v53 = vadd.f32 %v3276_v43, %v3275_v56  ;;  %v3348_v25 = vrot.slane %v3347_v47, 1 }
 0x34e   : > { %v3278_v26 = vadd.f32 %v3277_v53, %v3240_v40  ;;  %v3349_v20 = vadd.f32 %v3348_v25, %v3347_v47 }
 0x350   : > { %3279 = vst [vmem:[%s5074_s5] sm:$0x1] %v3278_v26  ;;  %v3350_v1 = vadd.f32 %v3349_v20, %v3280_v18 }
 0x352   : > { %3351 = vst [vmem:[%s5075_s6] sm:$0x1] %v3350_v1 }
 0x353 PF: > { %s17_s21 = sadd.s32 1, %s4138_s21  }
 0x354   : > { %p14_p5 = scmp.ge.s32.totalorder %s17_s21, 4  }
 0x356   :  { %16 = sbr.rel (!%p14_p5) target bundleno = 1 (0x1), region = 96 }

</bundles_post_ra>
